<compile_context>
chip_gen: v7x
topology: tpu7x:2x2x1
jax: 0.10.0
libtpu: 0.0.40
codegen_flags: <defaults>
</compile_context>

<pallas_src>
import jax
import jax.numpy as jnp
from jax.experimental import pallas as pl
from jax.experimental.pallas import tpu as pltpu


# ----------------------------------------------------------------------------
# Pallas kernels
# ----------------------------------------------------------------------------
def _matmul_bias_relu_kernel(x_ref, w_ref, b_ref, o_ref):
    """Single-K-step fused conv-as-matmul: out = relu(x @ w + b)."""
    y = jnp.dot(x_ref[...], w_ref[...], preferred_element_type=jnp.float32)
    y = jnp.maximum(y + b_ref[...], 0.0)          # epilogue math in f32
    o_ref[...] = y.astype(o_ref.dtype)


def _fc_fused_kernel(x_ref, w1_ref, b1_ref, w2_ref, b2_ref, o_ref, acc_ref):
    """fc1 (K-tiled, f32 accumulator) with fc2 fused into the final epilogue."""
    k = pl.program_id(1)

    @pl.when(k == 0)
    def _():
        acc_ref[...] = jnp.zeros_like(acc_ref)

    acc_ref[...] += jnp.dot(x_ref[...], w1_ref[...],
                            preferred_element_type=jnp.float32)

    @pl.when(k == pl.num_programs(1) - 1)
    def _():
        h = jnp.maximum(acc_ref[...] + b1_ref[...], 0.0)          # relu(fc1)
        y = jnp.dot(h, w2_ref[...], preferred_element_type=jnp.float32)
        o_ref[...] = (y + b2_ref[...]).astype(o_ref.dtype)        # fc2


def _maxpool2x2_kernel(x_ref, o_ref):
    # x_ref block: (tr, 2, Wo, 2*C) — axis 1 is the vertical (h) pair,
    # lane halves [0:C] / [C:2C] are the horizontal (w) pair.
    x = x_ref[...]
    v = jnp.maximum(x[:, 0], x[:, 1])             # vertical max (leading dim)
    C = o_ref.shape[-1]
    o_ref[...] = jnp.maximum(v[..., :C], v[..., C:])   # horizontal max


# ----------------------------------------------------------------------------
# Pallas wrappers
# ----------------------------------------------------------------------------
def conv_matmul_bias_relu(x, w, b, *, tm=1024):
    """relu(x @ w + b).  x: (M, K) bf16, w: (K, N) bf16, b: (N,) f32 -> bf16."""
    M, K = x.shape
    K2, N = w.shape
    assert K == K2
    tm = min(tm, M)
    assert M % tm == 0
    b2 = b.reshape(1, N).astype(jnp.float32)
    return pl.pallas_call(
        _matmul_bias_relu_kernel,
        out_shape=jax.ShapeDtypeStruct((M, N), jnp.bfloat16),
        grid_spec=pltpu.PrefetchScalarGridSpec(
            num_scalar_prefetch=0,
            grid=(M // tm,),
            in_specs=[
                pl.BlockSpec((tm, K), lambda i: (i, 0)),
                pl.BlockSpec((K, N), lambda i: (0, 0)),
                pl.BlockSpec((1, N), lambda i: (0, 0)),
            ],
            out_specs=pl.BlockSpec((tm, N), lambda i: (i, 0)),
        ),
        compiler_params=pltpu.CompilerParams(
            dimension_semantics=("parallel",)),
    )(x, w, b2)


def fc1_fc2_fused(x, w1, b1, w2, b2, *, tk=4096):
    """fc2(relu(fc1(x))) in one pallas_call.  x:(M,K) bf16, w1:(K,H) bf16,
    w2:(H,N) f32; output (M, N) f32."""
    M, K = x.shape
    K2, H = w1.shape
    H2, N = w2.shape
    assert K == K2 and H == H2
    tk = min(tk, K)
    assert K % tk == 0
    b1r = b1.reshape(1, H).astype(jnp.float32)
    b2r = b2.reshape(1, N).astype(jnp.float32)
    return pl.pallas_call(
        _fc_fused_kernel,
        out_shape=jax.ShapeDtypeStruct((M, N), jnp.float32),
        grid_spec=pltpu.PrefetchScalarGridSpec(
            num_scalar_prefetch=0,
            grid=(1, K // tk),
            in_specs=[
                pl.BlockSpec((M, tk), lambda i, k: (i, k)),
                pl.BlockSpec((tk, H), lambda i, k: (k, 0)),
                pl.BlockSpec((1, H), lambda i, k: (0, 0)),
                pl.BlockSpec((H, N), lambda i, k: (0, 0)),
                pl.BlockSpec((1, N), lambda i, k: (0, 0)),
            ],
            out_specs=pl.BlockSpec((M, N), lambda i, k: (i, 0)),
            scratch_shapes=[pltpu.VMEM((M, H), jnp.float32)],
        ),
        compiler_params=pltpu.CompilerParams(
            dimension_semantics=("parallel", "arbitrary")),
    )(x, w1, b1r, w2, b2r)


def maxpool2x2(x_nhwc):
    """2x2 / stride-2 max pool.  Pure reshape (no transpose copy) + tiled kernel."""
    B, H, W, C = x_nhwc.shape
    Ho, Wo = H // 2, W // 2
    # (B, H, W, C) -> (B*Ho, 2, Wo, 2*C): contiguous reshape, no data movement.
    xr = x_nhwc.reshape(B * Ho, 2, Wo, 2 * C)
    R = B * Ho
    tr = Ho                       # one image's row-pairs per block (~128 KB)
    assert R % tr == 0
    out = pl.pallas_call(
        _maxpool2x2_kernel,
        out_shape=jax.ShapeDtypeStruct((R, Wo, C), x_nhwc.dtype),
        grid_spec=pltpu.PrefetchScalarGridSpec(
            num_scalar_prefetch=0,
            grid=(R // tr,),
            in_specs=[pl.BlockSpec((tr, 2, Wo, 2 * C),
                                   lambda i: (i, 0, 0, 0))],
            out_specs=pl.BlockSpec((tr, Wo, C), lambda i: (i, 0, 0)),
        ),
        compiler_params=pltpu.CompilerParams(
            dimension_semantics=("parallel",)),
    )(xr)
    return out.reshape(B, Ho, Wo, C)


# ----------------------------------------------------------------------------
# Glue: im2col, parameter init / prep, forward pass
# ----------------------------------------------------------------------------
def im2col_3x3_same(x_nhwc):
    """3x3, padding=1 patches.  Returns (B*H*W, 9*C) with (ky, kx, c) order."""
    # TODO(synk): move the 3x3 tap accumulation inside the conv kernel (9-step
    # "arbitrary" grid axis over a padded NHWC input) to avoid materializing
    # this 9x-expanded buffer in HBM.
    B, H, W, C = x_nhwc.shape
    xp = jnp.pad(x_nhwc, ((0, 0), (1, 1), (1, 1), (0, 0)))
    cols = [xp[:, ky:ky + H, kx:kx + W, :] for ky in range(3) for kx in range(3)]
    return jnp.concatenate(cols, axis=-1).reshape(B * H * W, 9 * C)


def init_params(key):
    """Deterministic synthetic params matching SimpleCifarCNN shapes (f32,
    PyTorch layout conventions)."""
    ks = jax.random.split(key, 8)

    def u(k, shape, fan_in):
        bound = 1.0 / jnp.sqrt(float(fan_in))
        return jax.random.uniform(k, shape, jnp.float32, -bound, bound)

    return {
        # conv weights as (kh, kw, Cin, Cout); PyTorch stores (Cout, Cin, kh, kw).
        "conv1_w": u(ks[0], (3, 3, 3, 32), 3 * 9),
        "conv1_b": u(ks[1], (32,), 3 * 9),
        "conv2_w": u(ks[2], (3, 3, 32, 64), 32 * 9),
        "conv2_b": u(ks[3], (64,), 32 * 9),
        # linear weights as (in, out); fc1 "in" index in PyTorch NCHW order.
        "fc1_w": u(ks[4], (64 * 16 * 16, 128), 64 * 16 * 16),
        "fc1_b": u(ks[5], (128,), 64 * 16 * 16),
        "fc2_w": u(ks[6], (128, 10), 128),
        "fc2_b": u(ks[7], (10,), 128),
    }


def prepare_params(params):
    """One-time prep: matmul layouts, bf16 casts, and fold the NCHW-flatten
    permutation into fc1's weight rows (so activations flatten NHWC for free)."""
    w1 = params["conv1_w"].reshape(9 * 3, 32).astype(jnp.bfloat16)
    w2 = params["conv2_w"].reshape(9 * 32, 64).astype(jnp.bfloat16)
    fw = params["fc1_w"].reshape(64, 16, 16, 128)        # rows were (c, h, w)
    fw = jnp.transpose(fw, (1, 2, 0, 3)).reshape(64 * 16 * 16, 128)  # -> (h,w,c)
    return {
        "conv1_w": w1, "conv1_b": params["conv1_b"].astype(jnp.float32),
        "conv2_w": w2, "conv2_b": params["conv2_b"].astype(jnp.float32),
        "fc1_w": fw.astype(jnp.bfloat16),
        "fc1_b": params["fc1_b"].astype(jnp.float32),
        "fc2_w": params["fc2_w"].astype(jnp.float32),   # tiny: keep f32
        "fc2_b": params["fc2_b"].astype(jnp.float32),
    }


def simple_cifar_cnn_forward(params, x_nchw):
    B, C, H, W = x_nchw.shape                      # expects (B, 3, 32, 32)
    x = jnp.transpose(x_nchw, (0, 2, 3, 1)).astype(jnp.bfloat16)   # NHWC bf16

    # conv1 (3->32, 3x3, pad 1) + ReLU
    cols1 = im2col_3x3_same(x)                                     # (B*H*W, 27)
    y1 = conv_matmul_bias_relu(cols1, params["conv1_w"], params["conv1_b"],
                               tm=1024)
    y1 = y1.reshape(B, H, W, 32)

    # conv2 (32->64, 3x3, pad 1) + ReLU
    cols2 = im2col_3x3_same(y1)                                    # (B*H*W, 288)
    y2 = conv_matmul_bias_relu(cols2, params["conv2_w"], params["conv2_b"],
                               tm=1024)
    y2 = y2.reshape(B, H, W, 64)

    # 2x2 max pool -> (B, 16, 16, 64).  TODO(synk): could be fused into the
    # conv2 kernel epilogue to skip the y2 HBM round trip entirely.
    p = maxpool2x2(y2)

    # Dropout(0.25): inference/eval semantics -> identity.
    # TODO(synk): training-mode dropout (random mask + 1/(1-p) scaling).

    # NHWC flatten is a pure reshape; fc1_w rows were pre-permuted to match
    # PyTorch's NCHW .view(B, -1) ordering.
    flat = p.reshape(B, 16 * 16 * 64)

    # fc1 + ReLU + fc2 fused in a single Pallas call (K tiled at 4096).
    out = fc1_fc2_fused(flat, params["fc1_w"], params["fc1_b"],
                        params["fc2_w"], params["fc2_b"], tk=4096)
    return out                                                     # (B, 10) f32


if __name__ == "__main__":
    key = jax.random.PRNGKey(0)
    pkey, xkey = jax.random.split(key)
    params = prepare_params(init_params(pkey))
    # Forward hard-codes fc1 = Linear(64*16*16, 128) => input must be (B, 3, 32, 32).
    x = jax.random.normal(xkey, (2, 3, 32, 32), jnp.float32)
    fwd = jax.jit(simple_cifar_cnn_forward)
    out = fwd(params, x)
    jax.block_until_ready(out)
    assert out.shape == (2, 10) and out.dtype == jnp.float32
    print("KERNEL_OK")
</pallas_src>

<mosaic_0001>
module attributes {stable_mosaic.version = 11 : i64} {
  func.func @_matmul_bias_relu_kernel(%arg0: i32, %arg1: memref<1024x27xbf16, #tpu.memory_space<vmem>>, %arg2: memref<27x32xbf16, #tpu.memory_space<vmem>>, %arg3: memref<1x32xf32, #tpu.memory_space<vmem>>, %arg4: memref<1024x32xbf16, #tpu.memory_space<vmem>>) attributes {dimension_semantics = [#tpu.dimension_semantics<parallel>], iteration_bounds = array<i64: 2>, scalar_prefetch = 0 : i64, scratch_operands = 0 : i64, tpu.core_type = #tpu.core_type<tc>, window_params = [{transform_indices = @transform_0, window_bounds = array<i64: 1024, 27>}, {pipeline_mode = #tpu.pipeline_mode<synchronous>, transform_indices = @transform_1, window_bounds = array<i64: 27, 32>}, {pipeline_mode = #tpu.pipeline_mode<synchronous>, transform_indices = @transform_2, window_bounds = array<i64: 1, 32>}, {transform_indices = @transform_3, window_bounds = array<i64: 1024, 32>}]} {
    %c0 = arith.constant 0 : index
    %c0_0 = arith.constant 0 : index
    %0 = vector.load %arg1[%c0, %c0_0] : memref<1024x27xbf16, #tpu.memory_space<vmem>>, vector<1024x27xbf16>
    %c0_1 = arith.constant 0 : index
    %c0_2 = arith.constant 0 : index
    %1 = vector.load %arg2[%c0_1, %c0_2] : memref<27x32xbf16, #tpu.memory_space<vmem>>, vector<27x32xbf16>
    %cst = arith.constant dense<0.000000e+00> : vector<1024x32xf32>
    %2 = tpu.matmul %0, %1, %cst {dimension_numbers = #tpu.dot_dimension_numbers<[1], [0], [0], [1], [0, 0, 1, 1], [], []>} : vector<1024x27xbf16>, vector<27x32xbf16>, vector<1024x32xf32> -> vector<1024x32xf32>
    %c0_3 = arith.constant 0 : index
    %c0_4 = arith.constant 0 : index
    %3 = vector.load %arg3[%c0_3, %c0_4] : memref<1x32xf32, #tpu.memory_space<vmem>>, vector<1x32xf32>
    %4 = vector.broadcast %3 : vector<1x32xf32> to vector<1024x32xf32>
    %5 = arith.addf %2, %4 : vector<1024x32xf32>
    %cst_5 = arith.constant 0.000000e+00 : f32
    %6 = vector.broadcast %cst_5 : f32 to vector<1024x32xf32>
    %7 = arith.maximumf %5, %6 : vector<1024x32xf32>
    %8 = arith.truncf %7 : vector<1024x32xf32> to vector<1024x32xbf16>
    %c0_6 = arith.constant 0 : index
    %c0_7 = arith.constant 0 : index
    %9 = vector.load %arg4[%c0_6, %c0_7] : memref<1024x32xbf16, #tpu.memory_space<vmem>>, vector<1024x32xbf16>
    tpu.vector_store %arg4[%c0_6, %c0_7], %8 {strides = array<i32>} : memref<1024x32xbf16, #tpu.memory_space<vmem>>, vector<1024x32xbf16>,
    return
  }
  func.func @transform_0(%arg0: i32) -> (i32, i32) {
    %c0_i32 = arith.constant 0 : i32
    %c0_i32_0 = arith.constant 0 : i32
    return %arg0, %c0_i32 : i32, i32
  }
  func.func @transform_1(%arg0: i32) -> (i32, i32) {
    %c0_i32 = arith.constant 0 : i32
    %c0_i32_0 = arith.constant 0 : i32
    %c0_i32_1 = arith.constant 0 : i32
    return %c0_i32, %c0_i32_0 : i32, i32
  }
  func.func @transform_2(%arg0: i32) -> (i32, i32) {
    %c0_i32 = arith.constant 0 : i32
    %c0_i32_0 = arith.constant 0 : i32
    %c0_i32_1 = arith.constant 0 : i32
    return %c0_i32, %c0_i32_0 : i32, i32
  }
  func.func @transform_3(%arg0: i32) -> (i32, i32) {
    %c0_i32 = arith.constant 0 : i32
    %c0_i32_0 = arith.constant 0 : i32
    return %arg0, %c0_i32 : i32, i32
  }
}

module attributes {stable_mosaic.version = 11 : i64} {
  func.func @_matmul_bias_relu_kernel(%arg0: i32, %arg1: memref<1024x288xbf16, #tpu.memory_space<vmem>>, %arg2: memref<288x64xbf16, #tpu.memory_space<vmem>>, %arg3: memref<1x64xf32, #tpu.memory_space<vmem>>, %arg4: memref<1024x64xbf16, #tpu.memory_space<vmem>>) attributes {dimension_semantics = [#tpu.dimension_semantics<parallel>], iteration_bounds = array<i64: 2>, scalar_prefetch = 0 : i64, scratch_operands = 0 : i64, tpu.core_type = #tpu.core_type<tc>, window_params = [{transform_indices = @transform_0, window_bounds = array<i64: 1024, 288>}, {pipeline_mode = #tpu.pipeline_mode<synchronous>, transform_indices = @transform_1, window_bounds = array<i64: 288, 64>}, {pipeline_mode = #tpu.pipeline_mode<synchronous>, transform_indices = @transform_2, window_bounds = array<i64: 1, 64>}, {transform_indices = @transform_3, window_bounds = array<i64: 1024, 64>}]} {
    %c0 = arith.constant 0 : index
    %c0_0 = arith.constant 0 : index
    %0 = vector.load %arg1[%c0, %c0_0] : memref<1024x288xbf16, #tpu.memory_space<vmem>>, vector<1024x288xbf16>
    %c0_1 = arith.constant 0 : index
    %c0_2 = arith.constant 0 : index
    %1 = vector.load %arg2[%c0_1, %c0_2] : memref<288x64xbf16, #tpu.memory_space<vmem>>, vector<288x64xbf16>
    %cst = arith.constant dense<0.000000e+00> : vector<1024x64xf32>
    %2 = tpu.matmul %0, %1, %cst {dimension_numbers = #tpu.dot_dimension_numbers<[1], [0], [0], [1], [0, 0, 1, 1], [], []>} : vector<1024x288xbf16>, vector<288x64xbf16>, vector<1024x64xf32> -> vector<1024x64xf32>
    %c0_3 = arith.constant 0 : index
    %c0_4 = arith.constant 0 : index
    %3 = vector.load %arg3[%c0_3, %c0_4] : memref<1x64xf32, #tpu.memory_space<vmem>>, vector<1x64xf32>
    %4 = vector.broadcast %3 : vector<1x64xf32> to vector<1024x64xf32>
    %5 = arith.addf %2, %4 : vector<1024x64xf32>
    %cst_5 = arith.constant 0.000000e+00 : f32
    %6 = vector.broadcast %cst_5 : f32 to vector<1024x64xf32>
    %7 = arith.maximumf %5, %6 : vector<1024x64xf32>
    %8 = arith.truncf %7 : vector<1024x64xf32> to vector<1024x64xbf16>
    %c0_6 = arith.constant 0 : index
    %c0_7 = arith.constant 0 : index
    %9 = vector.load %arg4[%c0_6, %c0_7] : memref<1024x64xbf16, #tpu.memory_space<vmem>>, vector<1024x64xbf16>
    tpu.vector_store %arg4[%c0_6, %c0_7], %8 {strides = array<i32>} : memref<1024x64xbf16, #tpu.memory_space<vmem>>, vector<1024x64xbf16>,
    return
  }
  func.func @transform_0(%arg0: i32) -> (i32, i32) {
    %c0_i32 = arith.constant 0 : i32
    %c0_i32_0 = arith.constant 0 : i32
    return %arg0, %c0_i32 : i32, i32
  }
  func.func @transform_1(%arg0: i32) -> (i32, i32) {
    %c0_i32 = arith.constant 0 : i32
    %c0_i32_0 = arith.constant 0 : i32
    %c0_i32_1 = arith.constant 0 : i32
    return %c0_i32, %c0_i32_0 : i32, i32
  }
  func.func @transform_2(%arg0: i32) -> (i32, i32) {
    %c0_i32 = arith.constant 0 : i32
    %c0_i32_0 = arith.constant 0 : i32
    %c0_i32_1 = arith.constant 0 : i32
    return %c0_i32, %c0_i32_0 : i32, i32
  }
  func.func @transform_3(%arg0: i32) -> (i32, i32) {
    %c0_i32 = arith.constant 0 : i32
    %c0_i32_0 = arith.constant 0 : i32
    return %arg0, %c0_i32 : i32, i32
  }
}

module attributes {stable_mosaic.version = 11 : i64} {
  func.func @_maxpool2x2_kernel(%arg0: i32, %arg1: memref<16x2x16x128xbf16, #tpu.memory_space<vmem>>, %arg2: memref<16x16x64xbf16, #tpu.memory_space<vmem>>) attributes {dimension_semantics = [#tpu.dimension_semantics<parallel>], iteration_bounds = array<i64: 2>, scalar_prefetch = 0 : i64, scratch_operands = 0 : i64, tpu.core_type = #tpu.core_type<tc>, window_params = [{transform_indices = @transform_0, window_bounds = array<i64: 16, 2, 16, 128>}, {transform_indices = @transform_1, window_bounds = array<i64: 16, 16, 64>}]} {
    %c0 = arith.constant 0 : index
    %c0_0 = arith.constant 0 : index
    %c0_1 = arith.constant 0 : index
    %c0_2 = arith.constant 0 : index
    %0 = vector.load %arg1[%c0, %c0_0, %c0_1, %c0_2] : memref<16x2x16x128xbf16, #tpu.memory_space<vmem>>, vector<16x2x16x128xbf16>
    %1 = vector.extract_strided_slice %0 {offsets = [0, 0, 0, 0], sizes = [16, 1, 16, 128], strides = [1, 1, 1, 1]} : vector<16x2x16x128xbf16> to vector<16x1x16x128xbf16>
    %2 = vector.shape_cast %1 : vector<16x1x16x128xbf16> to vector<16x16x128xbf16>
    %3 = vector.extract_strided_slice %0 {offsets = [0, 1, 0, 0], sizes = [16, 1, 16, 128], strides = [1, 1, 1, 1]} : vector<16x2x16x128xbf16> to vector<16x1x16x128xbf16>
    %4 = vector.shape_cast %3 : vector<16x1x16x128xbf16> to vector<16x16x128xbf16>
    %5 = arith.maximumf %2, %4 : vector<16x16x128xbf16>
    %6 = vector.extract_strided_slice %5 {offsets = [0, 0, 0], sizes = [16, 16, 64], strides = [1, 1, 1]} : vector<16x16x128xbf16> to vector<16x16x64xbf16>
    %7 = vector.extract_strided_slice %5 {offsets = [0, 0, 64], sizes = [16, 16, 64], strides = [1, 1, 1]} : vector<16x16x128xbf16> to vector<16x16x64xbf16>
    %8 = arith.maximumf %6, %7 : vector<16x16x64xbf16>
    %c0_3 = arith.constant 0 : index
    %c0_4 = arith.constant 0 : index
    %c0_5 = arith.constant 0 : index
    %9 = vector.load %arg2[%c0_3, %c0_4, %c0_5] : memref<16x16x64xbf16, #tpu.memory_space<vmem>>, vector<16x16x64xbf16>
    tpu.vector_store %arg2[%c0_3, %c0_4, %c0_5], %8 {strides = array<i32>} : memref<16x16x64xbf16, #tpu.memory_space<vmem>>, vector<16x16x64xbf16>,
    return
  }
  func.func @transform_0(%arg0: i32) -> (i32, i32, i32, i32) {
    %c0_i32 = arith.constant 0 : i32
    %c0_i32_0 = arith.constant 0 : i32
    %c0_i32_1 = arith.constant 0 : i32
    %c0_i32_2 = arith.constant 0 : i32
    return %arg0, %c0_i32, %c0_i32_0, %c0_i32_1 : i32, i32, i32, i32
  }
  func.func @transform_1(%arg0: i32) -> (i32, i32, i32) {
    %c0_i32 = arith.constant 0 : i32
    %c0_i32_0 = arith.constant 0 : i32
    %c0_i32_1 = arith.constant 0 : i32
    return %arg0, %c0_i32, %c0_i32_0 : i32, i32, i32
  }
}

module attributes {stable_mosaic.version = 11 : i64} {
  func.func @_fc_fused_kernel(%arg0: i32, %arg1: i32, %arg2: memref<2x4096xbf16, #tpu.memory_space<vmem>>, %arg3: memref<4096x128xbf16, #tpu.memory_space<vmem>>, %arg4: memref<1x128xf32, #tpu.memory_space<vmem>>, %arg5: memref<128x10xf32, #tpu.memory_space<vmem>>, %arg6: memref<1x10xf32, #tpu.memory_space<vmem>>, %arg7: memref<2x10xf32, #tpu.memory_space<vmem>>, %arg8: memref<2x128xf32, #tpu.memory_space<vmem>>) attributes {dimension_semantics = [#tpu.dimension_semantics<parallel>, #tpu.dimension_semantics<arbitrary>], iteration_bounds = array<i64: 1, 4>, scalar_prefetch = 0 : i64, scratch_operands = 1 : i64, tpu.core_type = #tpu.core_type<tc>, window_params = [{transform_indices = @transform_0, window_bounds = array<i64: 2, 4096>}, {transform_indices = @transform_1, window_bounds = array<i64: 4096, 128>}, {pipeline_mode = #tpu.pipeline_mode<synchronous>, transform_indices = @transform_2, window_bounds = array<i64: 1, 128>}, {pipeline_mode = #tpu.pipeline_mode<synchronous>, transform_indices = @transform_3, window_bounds = array<i64: 128, 10>}, {pipeline_mode = #tpu.pipeline_mode<synchronous>, transform_indices = @transform_4, window_bounds = array<i64: 1, 10>}, {transform_indices = @transform_5, window_bounds = array<i64: 2, 10>}]} {
    %c0_i32 = arith.constant 0 : i32
    %0 = arith.cmpi eq, %arg1, %c0_i32 : i32
    %1 = arith.extui %0 : i1 to i32
    %c0_i32_0 = arith.constant 0 : i32
    %2 = arith.cmpi ne, %1, %c0_i32_0 : i32
    scf.if %2 {
      %cst_9 = arith.constant 0.000000e+00 : f32
      %12 = vector.broadcast %cst_9 : f32 to vector<2x128xf32>
      %c0_10 = arith.constant 0 : index
      %c0_11 = arith.constant 0 : index
      %13 = vector.load %arg8[%c0_10, %c0_11] : memref<2x128xf32, #tpu.memory_space<vmem>>, vector<2x128xf32>
      tpu.vector_store %arg8[%c0_10, %c0_11], %12 {strides = array<i32>} : memref<2x128xf32, #tpu.memory_space<vmem>>, vector<2x128xf32>,
    } else {
    }
    %c0 = arith.constant 0 : index
    %c0_1 = arith.constant 0 : index
    %3 = vector.load %arg8[%c0, %c0_1] : memref<2x128xf32, #tpu.memory_space<vmem>>, vector<2x128xf32>
    %c0_2 = arith.constant 0 : index
    %c0_3 = arith.constant 0 : index
    %4 = vector.load %arg2[%c0_2, %c0_3] : memref<2x4096xbf16, #tpu.memory_space<vmem>>, vector<2x4096xbf16>
    %c0_4 = arith.constant 0 : index
    %c0_5 = arith.constant 0 : index
    %5 = vector.load %arg3[%c0_4, %c0_5] : memref<4096x128xbf16, #tpu.memory_space<vmem>>, vector<4096x128xbf16>
    %cst = arith.constant dense<0.000000e+00> : vector<2x128xf32>
    %6 = tpu.matmul %4, %5, %cst {dimension_numbers = #tpu.dot_dimension_numbers<[1], [0], [0], [1], [0, 0, 1, 1], [], []>} : vector<2x4096xbf16>, vector<4096x128xbf16>, vector<2x128xf32> -> vector<2x128xf32>
    %7 = arith.addf %3, %6 : vector<2x128xf32>
    %c0_6 = arith.constant 0 : index
    %c0_7 = arith.constant 0 : index
    %8 = vector.load %arg8[%c0_6, %c0_7] : memref<2x128xf32, #tpu.memory_space<vmem>>, vector<2x128xf32>
    tpu.vector_store %arg8[%c0_6, %c0_7], %7 {strides = array<i32>} : memref<2x128xf32, #tpu.memory_space<vmem>>, vector<2x128xf32>,
    %c3_i32 = arith.constant 3 : i32
    %9 = arith.cmpi eq, %arg1, %c3_i32 : i32
    %10 = arith.extui %9 : i1 to i32
    %c0_i32_8 = arith.constant 0 : i32
    %11 = arith.cmpi ne, %10, %c0_i32_8 : i32
    scf.if %11 {
      %c0_9 = arith.constant 0 : index
      %c0_10 = arith.constant 0 : index
      %12 = vector.load %arg8[%c0_9, %c0_10] : memref<2x128xf32, #tpu.memory_space<vmem>>, vector<2x128xf32>
      %c0_11 = arith.constant 0 : index
      %c0_12 = arith.constant 0 : index
      %13 = vector.load %arg4[%c0_11, %c0_12] : memref<1x128xf32, #tpu.memory_space<vmem>>, vector<1x128xf32>
      %14 = vector.broadcast %13 : vector<1x128xf32> to vector<2x128xf32>
      %15 = arith.addf %12, %14 : vector<2x128xf32>
      %cst_13 = arith.constant 0.000000e+00 : f32
      %16 = vector.broadcast %cst_13 : f32 to vector<2x128xf32>
      %17 = arith.maximumf %15, %16 : vector<2x128xf32>
      %c0_14 = arith.constant 0 : index
      %c0_15 = arith.constant 0 : index
      %18 = vector.load %arg5[%c0_14, %c0_15] : memref<128x10xf32, #tpu.memory_space<vmem>>, vector<128x10xf32>
      %cst_16 = arith.constant dense<0.000000e+00> : vector<2x10xf32>
      %19 = tpu.matmul %17, %18, %cst_16 {dimension_numbers = #tpu.dot_dimension_numbers<[1], [0], [0], [1], [0, 0, 1, 1], [], []>} : vector<2x128xf32>, vector<128x10xf32>, vector<2x10xf32> -> vector<2x10xf32>
      %c0_17 = arith.constant 0 : index
      %c0_18 = arith.constant 0 : index
      %20 = vector.load %arg6[%c0_17, %c0_18] : memref<1x10xf32, #tpu.memory_space<vmem>>, vector<1x10xf32>
      %21 = vector.broadcast %20 : vector<1x10xf32> to vector<2x10xf32>
      %22 = arith.addf %19, %21 : vector<2x10xf32>
      %c0_19 = arith.constant 0 : index
      %c0_20 = arith.constant 0 : index
      %23 = vector.load %arg7[%c0_19, %c0_20] : memref<2x10xf32, #tpu.memory_space<vmem>>, vector<2x10xf32>
      tpu.vector_store %arg7[%c0_19, %c0_20], %22 {strides = array<i32>} : memref<2x10xf32, #tpu.memory_space<vmem>>, vector<2x10xf32>,
    } else {
    }
    return
  }
  func.func @transform_0(%arg0: i32, %arg1: i32) -> (i32, i32) {
    %c0_i32 = arith.constant 0 : i32
    return %arg0, %arg1 : i32, i32
  }
  func.func @transform_1(%arg0: i32, %arg1: i32) -> (i32, i32) {
    %c0_i32 = arith.constant 0 : i32
    %c0_i32_0 = arith.constant 0 : i32
    return %arg1, %c0_i32 : i32, i32
  }
  func.func @transform_2(%arg0: i32, %arg1: i32) -> (i32, i32) {
    %c0_i32 = arith.constant 0 : i32
    %c0_i32_0 = arith.constant 0 : i32
    %c0_i32_1 = arith.constant 0 : i32
    return %c0_i32, %c0_i32_0 : i32, i32
  }
  func.func @transform_3(%arg0: i32, %arg1: i32) -> (i32, i32) {
    %c0_i32 = arith.constant 0 : i32
    %c0_i32_0 = arith.constant 0 : i32
    %c0_i32_1 = arith.constant 0 : i32
    return %c0_i32, %c0_i32_0 : i32, i32
  }
  func.func @transform_4(%arg0: i32, %arg1: i32) -> (i32, i32) {
    %c0_i32 = arith.constant 0 : i32
    %c0_i32_0 = arith.constant 0 : i32
    %c0_i32_1 = arith.constant 0 : i32
    return %c0_i32, %c0_i32_0 : i32, i32
  }
  func.func @transform_5(%arg0: i32, %arg1: i32) -> (i32, i32) {
    %c0_i32 = arith.constant 0 : i32
    %c0_i32_0 = arith.constant 0 : i32
    return %arg0, %c0_i32 : i32, i32
  }
}

</mosaic_0001>

<bundles_post_ra>
// kernel: simple_cifar_cnn_forward.4
= control target key start
LH: loop header
LB: loop body
LE: loop exit
PB: predicated region body
PF: predicated region fallthrough
CT: control target
= control target key end

     0   :  { %8 = vsyncpa [#allocation3], 0  ;;  %s3689_s0 = inlined_call_operand.vmem [shape: bf16[2048,27], index: 0, kind: input, shape index: {}]   ;;  %s3690_s1 = inlined_call_operand.hbm [shape: bf16[27,32], index: 1, kind: input, shape index: {}]   ;;  %s3691_s2 = inlined_call_operand.hbm [shape: f32[1,32], index: 2, kind: input, shape index: {}]   ;;  %s3692_s3 = inlined_call_operand.vmem [shape: bf16[2048,32], index: 3, kind: output, shape index: {}]  }
   0x1   :  { %9 = vsyncpa [#allocation5], 0  ;;  %s3065_s12 = smov 0  }
   0x2 LB: > { %s2265_s13 = sadd.s32 4294967295, %s3038_s12   ;;  %p2267_p0 = scmp.ge.s32.totalorder %s3038_s12, 1  ;;  %s3038_s12 = sphi %s3065_s12, %s15_s12  }
   0x3   : > { %p114_p1 = scmp.lt.s32.totalorder %s3038_s12, 3  ;;  %s3040_s14 = smov [#allocation2]  }
   0x4   : > { %s126_s15 = sshll.u32 %s3040_s14, 4  ;;  %p3079_p3 = scmp.eq.s32.totalorder %s2265_s13, 0  ;;  %s127_s15 = int_to_ptr.vmem [resolvable:$true] %s126_s15 }
   0x5   : > { %p3073_p2 = pnand %p2267_p0, %p114_p1  ;;  %s3041_s18 = smov [#allocation4]  }
   0x6   : > { %s3697_s17 = scalar_select %p3079_p3, 1, 0 }
   0x7   : > { %s3696_s16 = scalar_select %p3073_p2, 1, 0 }
   0x8   : > { %p2877_p4 = pneg %p3073_p2  ;;  %s140_s19 = sshll.u32 %s3041_s18, 4  ;;  %s3091_s19 = int_to_ptr.vmem [resolvable:$true] %s140_s19 }
   0x9   : > { %s2968_s23 = scalar_lea.hbm %s3690_s1, 256 }
   0xa   : > { %p3087_p5 = pnand %p3079_p3, %p2877_p4  ;;  %p2969_p6 = scmp.ne.s32.totalorder %s3690_s1, %s2968_s23 }
   0xb   : > { %p2975_p10 = scmp.lt.u32.totalorder %s2968_s23, %s3690_s1 }
   0xc   : > { %p2970_p7 = pneg %p3087_p5 }
   0xe   : > { %p2971_p8 = pnand %p2970_p7, %p2969_p6 }
  0x10   : > { %p2972_p9 = pneg %p2971_p8 }
  0x12   : > { %p2977_p11 = pnand %p2975_p10, %p2972_p9 }
  0x14   : > { %2980 = shalt.err (!%p2977_p11)
}
  0x15   : > { %s2981_s28 = scalar_lea.vmem %s127_s15, 256  ;;  %p2989_p1 = scmp.lt.s32.totalorder %s127_s15, %s127_s15 }
  0x16   : > { %p2982_p12 = scmp.ne.s32.totalorder %s127_s15, %s2981_s28  ;;  %p2990_p4 = scmp.lt.s32.totalorder %s2981_s28, %s2981_s28 }
  0x18   : > { %p2984_p13 = pnand %p2982_p12, %p2970_p7  ;;  %p2991_p3 = por %p2990_p4, %p2989_p1 }
  0x1a   : > { %p2985_p0 = pneg %p2984_p13 }
  0x1c   : > { %p2992_p2 = pnand %p2991_p3, %p2985_p0 }
  0x1e   : > { %2995 = shalt.err (!%p2992_p2)
}
  0x1f   : > { %s3042_s29 = smov 64   ;;  %s3043_s30 = smov 4  }
  0x20   : > { %2880 = dma.hbm_to_vmem [thread:$0]  (!%p3087_p5), %s3690_s1, 256, %s127_s15, [#allocation3], %s3042_s29, %s3042_s29, %s3043_s30  }
  0x21   : > { %s2996_s8 = scalar_lea.hbm %s3691_s2, 16 }
  0x22   : > { %p2997_p6 = scmp.ne.s32.totalorder %s3691_s2, %s2996_s8  ;;  %p3003_p8 = scmp.lt.u32.totalorder %s2996_s8, %s3691_s2 }
  0x24   : > { %p2999_p2 = pnand %p2997_p6, %p2970_p7 }
  0x26   : > { %p3000_p3 = pneg %p2999_p2 }
  0x28   : > { %p3005_p9 = pnand %p3003_p8, %p3000_p3 }
  0x2a   : > { %3008 = shalt.err (!%p3005_p9)
}
  0x2b   : > { %s3009_s15 = scalar_lea.vmem %s3091_s19, 16  ;;  %s3016_s18 = scalar_lea.vmem %s3091_s19, 32 }
  0x2c   : > { %p3010_p10 = scmp.ne.s32.totalorder %s3091_s19, %s3009_s15  ;;  %p3017_p13 = scmp.lt.s32.totalorder %s3091_s19, %s3091_s19 }
  0x2d   : > { %p3018_p0 = scmp.lt.s32.totalorder %s3016_s18, %s3009_s15 }
  0x2e   : > { %p3012_p11 = pnand %p3010_p10, %p2970_p7 }
  0x2f   : > { %p3019_p1 = por %p3018_p0, %p3017_p13 }
  0x30   : > { %p3013_p12 = pneg %p3012_p11 }
  0x32   : > { %p3020_p4 = pnand %p3019_p1, %p3013_p12 }
  0x34   : > { %3023 = shalt.err (!%p3020_p4)
}
  0x35   : > { %2883 = dma.hbm_to_vmem [thread:$0]  (!%p3087_p5), %s3691_s2, 16, %s3091_s19, [#allocation5]  }
  0x36   : > { %p3699_p6 = scmp.ne.s32.totalorder %s3696_s16, 0 }
  0x37   : > { %p3700_p7 = scmp.ne.s32.totalorder (!%p3699_p6), %s3697_s17, 0 }
  0x38   : > { %162 = sbr.rel (%p3699_p6) target bundleno = 419 (0x1a3), region = 32 }
  0x3f   : > { %3029 = dma.done.wait (%p3700_p7), [#allocation3], 256  }
  0x40   : > { %3031 = vsyncadd (%p3700_p7), [#allocation3], 4294967040 }
  0x41   : > { %3033 = dma.done.wait (%p3700_p7), [#allocation5], 16  }
  0x42   : > { %3035 = vsyncadd (%p3700_p7), [#allocation5], 4294967280  ;;  %s2274_s20 = sshll.u32 %s2265_s13, 7  ;;  %vm866_vm0 = vcmask 1044480   ;;  %vm867_vm1 = vcmask 1045504   ;;  %v3044_v0 = vmov 65535  }
  0x43   : > { %p191_p5 = scmp.lt.s32.totalorder %s2274_s20, 255  ;;  %v868_v1 = vsel %vm866_vm0, 4294967295, %v3044_v0  ;;  %vm673_vm2 = vcmask 220160   ;;  %v2901_v2 = vld [vmem:[#allocation2] sm:$0xff]   ;;  %v2902_v4 = vld [vmem:[#allocation2 + $0x8] sm:$0x3f]  }
  0x44   : > { %v869_v3 = vsel %vm867_vm1, %v868_v1, 0  ;;  %2733 = vmatprep.subr.bf16.mxu0 %v2901_v2  ;;  %2865 = vmatprep.subr.bf16.mxu1 %v2901_v2  ;;  %vm2058_vm3 = vcmask 257024  }
  0x45   : > { %s3702_s20 = smov (!%p191_p5, %s2274_s20), 255  ;;  %2734 = vmatpush3.bf16.msra.mxu0 %v2901_v2  ;;  %2867 = vmatpush3.bf16.msra.mxu1 %v2901_v2  ;;  %v871_v6 = vand.u32 %v2902_v4, %v869_v3 }
  0x46   : > { %s2275_s16 = sshll.u32 %s3702_s20, 2 }
  0x47   : > { %s3161_s24 = scalar_lea.vmem %s3689_s0, %s2275_s16  ;;  %2735 = vmatprep.subr.bf16.mxu0 %v871_v6  ;;  %2866 = vmatprep.subr.bf16.mxu1 %v871_v6  ;;  %s3304_s25 = scalar_lea.vmem %s3692_s3, %s2275_s16 }
  0x48   : > { %v2903_v5 = vld [vmem:[%s3161_s24] sm:$0xff]   ;;  %v2905_v8 = vld [vmem:[%s3161_s24 + $0x8] sm:$0xff]   ;;  %v2907_v10 = vld [vmem:[%s3161_s24 + $0x10] sm:$0xff]  }
  0x49   : > { %v2904_v7 = vld [vmem:[%s3161_s24 + $0x100] sm:$0xff]   ;;  %2737 = vmatprep.mubr.msk.bf16.mxu0 %vm673_vm2, %v2903_v5  ;;  %v2906_v9 = vld [vmem:[%s3161_s24 + $0x108] sm:$0xff]   ;;  %2736 = vmatpush3.bf16.msra.mxu0 %v871_v6  ;;  %v2908_v11 = vld [vmem:[%s3161_s24 + $0x110] sm:$0xff]  }
  0x4a   : > { %2801 = vmatprep.mubr.msk.bf16.mxu1 %vm673_vm2, %v2904_v7  ;;  %2868 = vmatpush3.bf16.msra.mxu1 %v871_v6  ;;  %v2909_v12 = vld [vmem:[%s3161_s24 + $0x18] sm:$0xff]   ;;  %v2911_v14 = vld [vmem:[%s3161_s24 + $0x20] sm:$0xff]   ;;  %v2913_v16 = vld [vmem:[%s3161_s24 + $0x28] sm:$0xff]  }
  0x4b   : > { %v2910_v13 = vld [vmem:[%s3161_s24 + $0x118] sm:$0xff]   ;;  %v2912_v15 = vld [vmem:[%s3161_s24 + $0x120] sm:$0xff]   ;;  %v2914_v17 = vld [vmem:[%s3161_s24 + $0x128] sm:$0xff]  }
  0x4c   : > { %2738 = vmatmul.mubr.msk.bf16.vlgmr.msra.gmra.mrb[0].mxu0 %vm673_vm2, %v2905_v8  ;;  %v2915_v18 = vld [vmem:[%s3161_s24 + $0x30] sm:$0xff]   ;;  %v2917_v20 = vld [vmem:[%s3161_s24 + $0x38] sm:$0xff]   ;;  %v2919_v22 = vld [vmem:[%s3161_s24 + $0x40] sm:$0xff]  }
  0x4d   : > { %2802 = vmatmul.mubr.msk.bf16.vlgmr.msra.gmra.mrb[0].mxu1 %vm673_vm2, %v2906_v9  ;;  %2741 = vmatprep.mubr.msk.bf16.mxu0 %vm673_vm2, %v2907_v10  ;;  %v2916_v19 = vld [vmem:[%s3161_s24 + $0x130] sm:$0xff]   ;;  %v2918_v21 = vld [vmem:[%s3161_s24 + $0x138] sm:$0xff]   ;;  %v2920_v23 = vld [vmem:[%s3161_s24 + $0x140] sm:$0xff]  }
  0x4e   : > { %2805 = vmatprep.mubr.msk.bf16.mxu1 %vm673_vm2, %v2908_v11  ;;  %v2921_v24 = vld [vmem:[%s3161_s24 + $0x48] sm:$0xff]   ;;  %v2923_v26 = vld [vmem:[%s3161_s24 + $0x50] sm:$0xff]   ;;  %v2925_v28 = vld [vmem:[%s3161_s24 + $0x58] sm:$0xff]  }
  0x4f   : > { %v2922_v25 = vld [vmem:[%s3161_s24 + $0x148] sm:$0xff]   ;;  %v2924_v27 = vld [vmem:[%s3161_s24 + $0x150] sm:$0xff]   ;;  %v2926_v29 = vld [vmem:[%s3161_s24 + $0x158] sm:$0xff]  }
  0x50   : > { %v2927_v30 = vld [vmem:[%s3161_s24 + $0x60] sm:$0xff]   ;;  %v2929_v32 = vld [vmem:[%s3161_s24 + $0x68] sm:$0xff]   ;;  %v2931_v34 = vld [vmem:[%s3161_s24 + $0x70] sm:$0xff]  }
  0x51   : > { %v2928_v31 = vld [vmem:[%s3161_s24 + $0x160] sm:$0xff]   ;;  %v2930_v33 = vld [vmem:[%s3161_s24 + $0x168] sm:$0xff]   ;;  %v2932_v35 = vld [vmem:[%s3161_s24 + $0x170] sm:$0xff]  }
  0x52   : > { %v2933_v36 = vld [vmem:[%s3161_s24 + $0x78] sm:$0xff]   ;;  %v2935_v38 = vld [vmem:[%s3161_s24 + $0x80] sm:$0xff]   ;;  %v2937_v40 = vld [vmem:[%s3161_s24 + $0x88] sm:$0xff]  }
  0x53   : > { %v2934_v37 = vld [vmem:[%s3161_s24 + $0x178] sm:$0xff]   ;;  %v2936_v39 = vld [vmem:[%s3161_s24 + $0x180] sm:$0xff]   ;;  %v2938_v41 = vld [vmem:[%s3161_s24 + $0x188] sm:$0xff]  }
  0x54   : > { %2742 = vmatmul.mubr.msk.bf16.gmra.mrb[4].mxu0 %vm673_vm2, %v2909_v12  ;;  %v2939_v42 = vld [vmem:[%s3161_s24 + $0x90] sm:$0xff]   ;;  %v2941_v44 = vld [vmem:[%s3161_s24 + $0x98] sm:$0xff]   ;;  %v2943_v46 = vld [vmem:[%s3161_s24 + $0xa0] sm:$0xff]  }
  0x55   : > { %2806 = vmatmul.mubr.msk.bf16.gmra.mrb[4].mxu1 %vm673_vm2, %v2910_v13  ;;  %2745 = vmatprep.mubr.msk.bf16.mxu0 %vm673_vm2, %v2911_v14  ;;  %v2940_v43 = vld [vmem:[%s3161_s24 + $0x190] sm:$0xff]   ;;  %v2942_v45 = vld [vmem:[%s3161_s24 + $0x198] sm:$0xff]   ;;  %v2944_v47 = vld [vmem:[%s3161_s24 + $0x1a0] sm:$0xff]  }
  0x56   : > { %2809 = vmatprep.mubr.msk.bf16.mxu1 %vm673_vm2, %v2912_v15  ;;  %v2945_v48 = vld [vmem:[%s3161_s24 + $0xa8] sm:$0xff]   ;;  %v2947_v50 = vld [vmem:[%s3161_s24 + $0xb0] sm:$0xff]   ;;  %v2949_v52 = vld [vmem:[%s3161_s24 + $0xb8] sm:$0xff]  }
  0x57   : > { %v2946_v49 = vld [vmem:[%s3161_s24 + $0x1a8] sm:$0xff]   ;;  %v2948_v51 = vld [vmem:[%s3161_s24 + $0x1b0] sm:$0xff]   ;;  %v2950_v53 = vld [vmem:[%s3161_s24 + $0x1b8] sm:$0xff]  }
  0x58   : > { %v2951_v54 = vld [vmem:[%s3161_s24 + $0xc0] sm:$0xff]   ;;  %v2953_v56 = vld [vmem:[%s3161_s24 + $0xc8] sm:$0xff]   ;;  %v2955_v58 = vld [vmem:[%s3161_s24 + $0xd0] sm:$0xff]  }
  0x59   : > { %v2952_v55 = vld [vmem:[%s3161_s24 + $0x1c0] sm:$0xff]   ;;  %v2954_v57 = vld [vmem:[%s3161_s24 + $0x1c8] sm:$0xff]   ;;  %v2956_v59 = vld [vmem:[%s3161_s24 + $0x1d0] sm:$0xff]  }
  0x5a   : > { %v2957_v60 = vld [vmem:[%s3161_s24 + $0xd8] sm:$0xff]   ;;  %v2959_v62 = vld [vmem:[%s3161_s24 + $0xe0] sm:$0xff]   ;;  %v2961_v0 = vld [vmem:[%s3161_s24 + $0xe8] sm:$0xff]  }
  0x5b   : > { %v2958_v61 = vld [vmem:[%s3161_s24 + $0x1d8] sm:$0xff]   ;;  %v2960_v63 = vld [vmem:[%s3161_s24 + $0x1e0] sm:$0xff]   ;;  %v2962_v1 = vld [vmem:[%s3161_s24 + $0x1e8] sm:$0xff]  }
  0x5c   : > { %2746 = vmatmul.mubr.msk.bf16.gmra.mrb[8].mxu0 %vm673_vm2, %v2913_v16  ;;  %v2963_v2 = vld [vmem:[%s3161_s24 + $0xf0] sm:$0xff]   ;;  %v2965_v4 = vld [vmem:[%s3161_s24 + $0xf8] sm:$0xff]  }
  0x5d   : > { %2810 = vmatmul.mubr.msk.bf16.gmra.mrb[8].mxu1 %vm673_vm2, %v2914_v17  ;;  %2749 = vmatprep.mubr.msk.bf16.mxu0 %vm673_vm2, %v2915_v18  ;;  %v2964_v3 = vld [vmem:[%s3161_s24 + $0x1f0] sm:$0xff]   ;;  %v2966_v5 = vld [vmem:[%s3161_s24 + $0x1f8] sm:$0xff]  }
  0x5e   : > { %2813 = vmatprep.mubr.msk.bf16.mxu1 %vm673_vm2, %v2916_v19  ;;  %v3291_v6 = vld [vmem:[#allocation4] ss:$0 sm:$0xff] }
  0x64   : > { %2750 = vmatmul.mubr.msk.bf16.gmra.mrb[12].mxu0 %vm673_vm2, %v2917_v20 }
  0x65   : > { %2814 = vmatmul.mubr.msk.bf16.gmra.mrb[12].mxu1 %vm673_vm2, %v2918_v21  ;;  %2753 = vmatprep.mubr.msk.bf16.mxu0 %vm673_vm2, %v2919_v22 }
  0x66   : > { %2817 = vmatprep.mubr.msk.bf16.mxu1 %vm673_vm2, %v2920_v23 }
  0x6c   : > { %2754 = vmatmul.mubr.msk.bf16.gmra.mrb[16].mxu0 %vm673_vm2, %v2921_v24 }
  0x6d   : > { %2818 = vmatmul.mubr.msk.bf16.gmra.mrb[16].mxu1 %vm673_vm2, %v2922_v25  ;;  %2757 = vmatprep.mubr.msk.bf16.mxu0 %vm673_vm2, %v2923_v26 }
  0x6e   : > { %2821 = vmatprep.mubr.msk.bf16.mxu1 %vm673_vm2, %v2924_v27 }
  0x74   : > { %2758 = vmatmul.mubr.msk.bf16.gmra.mrb[20].mxu0 %vm673_vm2, %v2925_v28 }
  0x75   : > { %2822 = vmatmul.mubr.msk.bf16.gmra.mrb[20].mxu1 %vm673_vm2, %v2926_v29  ;;  %2761 = vmatprep.mubr.msk.bf16.mxu0 %vm673_vm2, %v2927_v30 }
  0x76   : > { %2825 = vmatprep.mubr.msk.bf16.mxu1 %vm673_vm2, %v2928_v31 }
  0x7c   : > { %2762 = vmatmul.mubr.msk.bf16.gmra.mrb[24].mxu0 %vm673_vm2, %v2929_v32 }
  0x7d   : > { %2826 = vmatmul.mubr.msk.bf16.gmra.mrb[24].mxu1 %vm673_vm2, %v2930_v33  ;;  %2765 = vmatprep.mubr.msk.bf16.mxu0 %vm673_vm2, %v2931_v34 }
  0x7e   : > { %2829 = vmatprep.mubr.msk.bf16.mxu1 %vm673_vm2, %v2932_v35 }
  0x84   : > { %2766 = vmatmul.mubr.msk.bf16.gmra.mrb[28].mxu0 %vm673_vm2, %v2933_v36 }
  0x85   : > { %2830 = vmatmul.mubr.msk.bf16.gmra.mrb[28].mxu1 %vm673_vm2, %v2934_v37  ;;  %2769 = vmatprep.mubr.msk.bf16.mxu0 %vm673_vm2, %v2935_v38 }
  0x86   : > { %2833 = vmatprep.mubr.msk.bf16.mxu1 %vm673_vm2, %v2936_v39 }
  0x8c   : > { %2770 = vmatmul.mubr.msk.bf16.gmra.mrb[32].mxu0 %vm673_vm2, %v2937_v40 }
  0x8d   : > { %2834 = vmatmul.mubr.msk.bf16.gmra.mrb[32].mxu1 %vm673_vm2, %v2938_v41  ;;  %2773 = vmatprep.mubr.msk.bf16.mxu0 %vm673_vm2, %v2939_v42 }
  0x8e   : > { %2837 = vmatprep.mubr.msk.bf16.mxu1 %vm673_vm2, %v2940_v43 }
  0x94   : > { %2774 = vmatmul.mubr.msk.bf16.gmra.mrb[36].mxu0 %vm673_vm2, %v2941_v44 }
  0x95   : > { %2838 = vmatmul.mubr.msk.bf16.gmra.mrb[36].mxu1 %vm673_vm2, %v2942_v45  ;;  %2777 = vmatprep.mubr.msk.bf16.mxu0 %vm673_vm2, %v2943_v46 }
  0x96   : > { %2841 = vmatprep.mubr.msk.bf16.mxu1 %vm673_vm2, %v2944_v47 }
  0x9c   : > { %2778 = vmatmul.mubr.msk.bf16.gmra.mrb[40].mxu0 %vm673_vm2, %v2945_v48 }
  0x9d   : > { %2842 = vmatmul.mubr.msk.bf16.gmra.mrb[40].mxu1 %vm673_vm2, %v2946_v49  ;;  %2781 = vmatprep.mubr.msk.bf16.mxu0 %vm673_vm2, %v2947_v50 }
  0x9e   : > { %2845 = vmatprep.mubr.msk.bf16.mxu1 %vm673_vm2, %v2948_v51 }
  0xa4   : > { %2782 = vmatmul.mubr.msk.bf16.gmra.mrb[44].mxu0 %vm673_vm2, %v2949_v52 }
  0xa5   : > { %2846 = vmatmul.mubr.msk.bf16.gmra.mrb[44].mxu1 %vm673_vm2, %v2950_v53  ;;  %2785 = vmatprep.mubr.msk.bf16.mxu0 %vm673_vm2, %v2951_v54 }
  0xa6   : > { %2849 = vmatprep.mubr.msk.bf16.mxu1 %vm673_vm2, %v2952_v55 }
  0xac   : > { %2786 = vmatmul.mubr.msk.bf16.gmra.mrb[48].mxu0 %vm673_vm2, %v2953_v56 }
  0xad   : > { %2850 = vmatmul.mubr.msk.bf16.gmra.mrb[48].mxu1 %vm673_vm2, %v2954_v57  ;;  %2789 = vmatprep.mubr.msk.bf16.mxu0 %vm673_vm2, %v2955_v58 }
  0xae   : > { %2853 = vmatprep.mubr.msk.bf16.mxu1 %vm673_vm2, %v2956_v59 }
  0xb4   : > { %2790 = vmatmul.mubr.msk.bf16.gmra.mrb[52].mxu0 %vm673_vm2, %v2957_v60 }
  0xb5   : > { %2854 = vmatmul.mubr.msk.bf16.gmra.mrb[52].mxu1 %vm673_vm2, %v2958_v61  ;;  %2793 = vmatprep.mubr.msk.bf16.mxu0 %vm673_vm2, %v2959_v62 }
  0xb6   : > { %2857 = vmatprep.mubr.msk.bf16.mxu1 %vm673_vm2, %v2960_v63 }
  0xbc   : > { %2794 = vmatmul.mubr.msk.bf16.gmra.mrb[56].mxu0 %vm673_vm2, %v2961_v0 }
  0xbd   : > { %2858 = vmatmul.mubr.msk.bf16.gmra.mrb[56].mxu1 %vm673_vm2, %v2962_v1  ;;  %2797 = vmatprep.mubr.msk.bf16.mxu0 %vm673_vm2, %v2963_v2 }
  0xbe   : > { %2861 = vmatprep.mubr.msk.bf16.mxu1 %vm673_vm2, %v2964_v3 }
  0xc4   : > { %2798 = vmatmul.mubr.msk.bf16.gmra.mrb[60].mxu0 %vm673_vm2, %v2965_v4 }
  0xc5   : > { %2862 = vmatmul.mubr.msk.bf16.gmra.mrb[60].mxu1 %vm673_vm2, %v2966_v5 }
 0x11f   : > { %v2739_v7 = vpop.f32.mrb[0].mxu0 }
 0x120   : > { %v2803_v8 = vpop.f32.mrb[0].mxu1  ;;  %v916_v9 = vadd.f32 %v2739_v7, %v3291_v6  ;;  %v907_v11 = vpop.f32.mrb[1].mxu0 }
 0x121   : > { %v1172_v10 = vadd.f32 %v2803_v8, %v3291_v6  ;;  %v1163_v12 = vpop.f32.mrb[1].mxu1  ;;  %v908_v13 = vadd.f32 %v3291_v6, %v907_v11  ;;  %v2740_v15 = vpop.f32.mrb[2].mxu0 }
 0x122   : > { %v1164_v14 = vadd.f32 %v3291_v6, %v1163_v12  ;;  %v2804_v16 = vpop.f32.mrb[2].mxu1  ;;  %v1420_v17 = vmax.f32 %v916_v9, 0.0  ;;  %v919_v19 = vadd.f32 %v2740_v15, %v3291_v6  ;;  %v910_v21 = vpop.f32.mrb[3].mxu0 }
 0x123   : > { %v1484_v18 = vmax.f32 %v1172_v10, 0.0  ;;  %v1175_v20 = vadd.f32 %v2804_v16, %v3291_v6  ;;  %v1166_v22 = vpop.f32.mrb[3].mxu1  ;;  %v1418_v23 = vmax.f32 %v908_v13, 0.0  ;;  %v911_v25 = vadd.f32 %v3291_v6, %v910_v21 }
 0x124   : > { %v1482_v24 = vmax.f32 %v1164_v14, 0.0  ;;  %v1167_v26 = vadd.f32 %v3291_v6, %v1166_v22  ;;  %v2541_v27 = vpack.c.bf16 %v1420_v17, %v1420_v17  ;;  %v1421_v29 = vmax.f32 %v919_v19, 0.0 }
 0x125   : > { %v2605_v28 = vpack.c.bf16 %v1484_v18, %v1484_v18  ;;  %v1485_v30 = vmax.f32 %v1175_v20, 0.0  ;;  %v2539_v31 = vpack.c.bf16 %v1418_v23, %v1418_v23  ;;  %v1419_v33 = vmax.f32 %v911_v25, 0.0 }
 0x126   : > { %v2603_v32 = vpack.c.bf16 %v1482_v24, %v1482_v24  ;;  %v1483_v34 = vmax.f32 %v1167_v26, 0.0  ;;  %2061 = vst.msk [vmem:[%s3304_s25 + $0x8] sm:$0xf] %vm2058_vm3, %v2541_v27  ;;  %v2542_v35 = vpack.c.bf16 %v1421_v29, %v1421_v29 }
 0x127   : > { %2125 = vst.msk [vmem:[%s3304_s25 + $0x108] sm:$0xf] %vm2058_vm3, %v2605_v28  ;;  %v2606_v36 = vpack.c.bf16 %v1485_v30, %v1485_v30  ;;  %2059 = vst.msk [vmem:[%s3304_s25] sm:$0xf] %vm2058_vm3, %v2539_v31  ;;  %v2540_v37 = vpack.c.bf16 %v1419_v33, %v1419_v33  ;;  %v2743_v39 = vpop.f32.mrb[4].mxu0 }
 0x128   : > { %2123 = vst.msk [vmem:[%s3304_s25 + $0x100] sm:$0xf] %vm2058_vm3, %v2603_v32  ;;  %v2604_v38 = vpack.c.bf16 %v1483_v34, %v1483_v34  ;;  %v2807_v40 = vpop.f32.mrb[4].mxu1  ;;  %2062 = vst.msk [vmem:[%s3304_s25 + $0xc] sm:$0xf] %vm2058_vm3, %v2542_v35  ;;  %v932_v41 = vadd.f32 %v2743_v39, %v3291_v6  ;;  %v923_v43 = vpop.f32.mrb[5].mxu0 }
 0x129   : > { %2126 = vst.msk [vmem:[%s3304_s25 + $0x10c] sm:$0xf] %vm2058_vm3, %v2606_v36  ;;  %v1188_v42 = vadd.f32 %v2807_v40, %v3291_v6  ;;  %v1179_v44 = vpop.f32.mrb[5].mxu1  ;;  %2060 = vst.msk [vmem:[%s3304_s25 + $0x4] sm:$0xf] %vm2058_vm3, %v2540_v37  ;;  %v924_v45 = vadd.f32 %v3291_v6, %v923_v43  ;;  %v2744_v47 = vpop.f32.mrb[6].mxu0 }
 0x12a   : > { %2124 = vst.msk [vmem:[%s3304_s25 + $0x104] sm:$0xf] %vm2058_vm3, %v2604_v38  ;;  %v1180_v46 = vadd.f32 %v3291_v6, %v1179_v44  ;;  %v2808_v48 = vpop.f32.mrb[6].mxu1  ;;  %v1424_v49 = vmax.f32 %v932_v41, 0.0  ;;  %v935_v51 = vadd.f32 %v2744_v47, %v3291_v6  ;;  %v926_v53 = vpop.f32.mrb[7].mxu0 }
 0x12b   : > { %v1488_v50 = vmax.f32 %v1188_v42, 0.0  ;;  %v1191_v52 = vadd.f32 %v2808_v48, %v3291_v6  ;;  %v1182_v54 = vpop.f32.mrb[7].mxu1  ;;  %v1422_v55 = vmax.f32 %v924_v45, 0.0  ;;  %v927_v57 = vadd.f32 %v3291_v6, %v926_v53 }
 0x12c   : > { %v1486_v56 = vmax.f32 %v1180_v46, 0.0  ;;  %v1183_v58 = vadd.f32 %v3291_v6, %v1182_v54  ;;  %v2545_v59 = vpack.c.bf16 %v1424_v49, %v1424_v49  ;;  %v1425_v61 = vmax.f32 %v935_v51, 0.0 }
 0x12d   : > { %v2609_v60 = vpack.c.bf16 %v1488_v50, %v1488_v50  ;;  %v1489_v62 = vmax.f32 %v1191_v52, 0.0  ;;  %v2543_v63 = vpack.c.bf16 %v1422_v55, %v1422_v55  ;;  %v1423_v1 = vmax.f32 %v927_v57, 0.0 }
 0x12e   : > { %v2607_v0 = vpack.c.bf16 %v1486_v56, %v1486_v56  ;;  %v1487_v2 = vmax.f32 %v1183_v58, 0.0  ;;  %2065 = vst.msk [vmem:[%s3304_s25 + $0x18] sm:$0xf] %vm2058_vm3, %v2545_v59  ;;  %v2546_v3 = vpack.c.bf16 %v1425_v61, %v1425_v61 }
 0x12f   : > { %2129 = vst.msk [vmem:[%s3304_s25 + $0x118] sm:$0xf] %vm2058_vm3, %v2609_v60  ;;  %v2610_v4 = vpack.c.bf16 %v1489_v62, %v1489_v62  ;;  %2063 = vst.msk [vmem:[%s3304_s25 + $0x10] sm:$0xf] %vm2058_vm3, %v2543_v63  ;;  %v2544_v5 = vpack.c.bf16 %v1423_v1, %v1423_v1  ;;  %v2747_v8 = vpop.f32.mrb[8].mxu0 }
 0x130   : > { %2127 = vst.msk [vmem:[%s3304_s25 + $0x110] sm:$0xf] %vm2058_vm3, %v2607_v0  ;;  %v2608_v7 = vpack.c.bf16 %v1487_v2, %v1487_v2  ;;  %v2811_v9 = vpop.f32.mrb[8].mxu1  ;;  %2066 = vst.msk [vmem:[%s3304_s25 + $0x1c] sm:$0xf] %vm2058_vm3, %v2546_v3  ;;  %v948_v10 = vadd.f32 %v2747_v8, %v3291_v6  ;;  %v939_v12 = vpop.f32.mrb[9].mxu0 }
 0x131   : > { %2130 = vst.msk [vmem:[%s3304_s25 + $0x11c] sm:$0xf] %vm2058_vm3, %v2610_v4  ;;  %v1204_v11 = vadd.f32 %v2811_v9, %v3291_v6  ;;  %v1195_v13 = vpop.f32.mrb[9].mxu1  ;;  %2064 = vst.msk [vmem:[%s3304_s25 + $0x14] sm:$0xf] %vm2058_vm3, %v2544_v5  ;;  %v940_v14 = vadd.f32 %v3291_v6, %v939_v12  ;;  %v2748_v16 = vpop.f32.mrb[10].mxu0 }
 0x132   : > { %2128 = vst.msk [vmem:[%s3304_s25 + $0x114] sm:$0xf] %vm2058_vm3, %v2608_v7  ;;  %v1196_v15 = vadd.f32 %v3291_v6, %v1195_v13  ;;  %v2812_v17 = vpop.f32.mrb[10].mxu1  ;;  %v1428_v18 = vmax.f32 %v948_v10, 0.0  ;;  %v951_v20 = vadd.f32 %v2748_v16, %v3291_v6  ;;  %v942_v22 = vpop.f32.mrb[11].mxu0 }
 0x133   : > { %v1492_v19 = vmax.f32 %v1204_v11, 0.0  ;;  %v1207_v21 = vadd.f32 %v2812_v17, %v3291_v6  ;;  %v1198_v23 = vpop.f32.mrb[11].mxu1  ;;  %v1426_v24 = vmax.f32 %v940_v14, 0.0  ;;  %v943_v26 = vadd.f32 %v3291_v6, %v942_v22 }
 0x134   : > { %v1490_v25 = vmax.f32 %v1196_v15, 0.0  ;;  %v1199_v27 = vadd.f32 %v3291_v6, %v1198_v23  ;;  %v2549_v28 = vpack.c.bf16 %v1428_v18, %v1428_v18  ;;  %v1429_v30 = vmax.f32 %v951_v20, 0.0 }
 0x135   : > { %v2613_v29 = vpack.c.bf16 %v1492_v19, %v1492_v19  ;;  %v1493_v31 = vmax.f32 %v1207_v21, 0.0  ;;  %v2547_v32 = vpack.c.bf16 %v1426_v24, %v1426_v24  ;;  %v1427_v34 = vmax.f32 %v943_v26, 0.0 }
 0x136   : > { %v2611_v33 = vpack.c.bf16 %v1490_v25, %v1490_v25  ;;  %v1491_v35 = vmax.f32 %v1199_v27, 0.0  ;;  %2069 = vst.msk [vmem:[%s3304_s25 + $0x28] sm:$0xf] %vm2058_vm3, %v2549_v28  ;;  %v2550_v36 = vpack.c.bf16 %v1429_v30, %v1429_v30 }
 0x137   : > { %2133 = vst.msk [vmem:[%s3304_s25 + $0x128] sm:$0xf] %vm2058_vm3, %v2613_v29  ;;  %v2614_v37 = vpack.c.bf16 %v1493_v31, %v1493_v31  ;;  %2067 = vst.msk [vmem:[%s3304_s25 + $0x20] sm:$0xf] %vm2058_vm3, %v2547_v32  ;;  %v2548_v38 = vpack.c.bf16 %v1427_v34, %v1427_v34  ;;  %v2751_v40 = vpop.f32.mrb[12].mxu0 }
 0x138   : > { %2131 = vst.msk [vmem:[%s3304_s25 + $0x120] sm:$0xf] %vm2058_vm3, %v2611_v33  ;;  %v2612_v39 = vpack.c.bf16 %v1491_v35, %v1491_v35  ;;  %v2815_v41 = vpop.f32.mrb[12].mxu1  ;;  %2070 = vst.msk [vmem:[%s3304_s25 + $0x2c] sm:$0xf] %vm2058_vm3, %v2550_v36  ;;  %v964_v42 = vadd.f32 %v2751_v40, %v3291_v6  ;;  %v955_v44 = vpop.f32.mrb[13].mxu0 }
 0x139   : > { %2134 = vst.msk [vmem:[%s3304_s25 + $0x12c] sm:$0xf] %vm2058_vm3, %v2614_v37  ;;  %v1220_v43 = vadd.f32 %v2815_v41, %v3291_v6  ;;  %v1211_v45 = vpop.f32.mrb[13].mxu1  ;;  %2068 = vst.msk [vmem:[%s3304_s25 + $0x24] sm:$0xf] %vm2058_vm3, %v2548_v38  ;;  %v956_v46 = vadd.f32 %v3291_v6, %v955_v44  ;;  %v2752_v48 = vpop.f32.mrb[14].mxu0 }
 0x13a   : > { %2132 = vst.msk [vmem:[%s3304_s25 + $0x124] sm:$0xf] %vm2058_vm3, %v2612_v39  ;;  %v1212_v47 = vadd.f32 %v3291_v6, %v1211_v45  ;;  %v2816_v49 = vpop.f32.mrb[14].mxu1  ;;  %v1432_v50 = vmax.f32 %v964_v42, 0.0  ;;  %v967_v52 = vadd.f32 %v2752_v48, %v3291_v6  ;;  %v958_v54 = vpop.f32.mrb[15].mxu0 }
 0x13b   : > { %v1496_v51 = vmax.f32 %v1220_v43, 0.0  ;;  %v1223_v53 = vadd.f32 %v2816_v49, %v3291_v6  ;;  %v1214_v55 = vpop.f32.mrb[15].mxu1  ;;  %v1430_v56 = vmax.f32 %v956_v46, 0.0  ;;  %v959_v58 = vadd.f32 %v3291_v6, %v958_v54 }
 0x13c   : > { %v1494_v57 = vmax.f32 %v1212_v47, 0.0  ;;  %v1215_v59 = vadd.f32 %v3291_v6, %v1214_v55  ;;  %v2553_v60 = vpack.c.bf16 %v1432_v50, %v1432_v50  ;;  %v1433_v62 = vmax.f32 %v967_v52, 0.0 }
 0x13d   : > { %v2617_v61 = vpack.c.bf16 %v1496_v51, %v1496_v51  ;;  %v1497_v63 = vmax.f32 %v1223_v53, 0.0  ;;  %v2551_v0 = vpack.c.bf16 %v1430_v56, %v1430_v56  ;;  %v1431_v2 = vmax.f32 %v959_v58, 0.0 }
 0x13e   : > { %v2615_v1 = vpack.c.bf16 %v1494_v57, %v1494_v57  ;;  %v1495_v3 = vmax.f32 %v1215_v59, 0.0  ;;  %2073 = vst.msk [vmem:[%s3304_s25 + $0x38] sm:$0xf] %vm2058_vm3, %v2553_v60  ;;  %v2554_v4 = vpack.c.bf16 %v1433_v62, %v1433_v62 }
 0x13f   : > { %2137 = vst.msk [vmem:[%s3304_s25 + $0x138] sm:$0xf] %vm2058_vm3, %v2617_v61  ;;  %v2618_v5 = vpack.c.bf16 %v1497_v63, %v1497_v63  ;;  %2071 = vst.msk [vmem:[%s3304_s25 + $0x30] sm:$0xf] %vm2058_vm3, %v2551_v0  ;;  %v2552_v7 = vpack.c.bf16 %v1431_v2, %v1431_v2  ;;  %v2755_v9 = vpop.f32.mrb[16].mxu0 }
 0x140   : > { %2135 = vst.msk [vmem:[%s3304_s25 + $0x130] sm:$0xf] %vm2058_vm3, %v2615_v1  ;;  %v2616_v8 = vpack.c.bf16 %v1495_v3, %v1495_v3  ;;  %v2819_v10 = vpop.f32.mrb[16].mxu1  ;;  %2074 = vst.msk [vmem:[%s3304_s25 + $0x3c] sm:$0xf] %vm2058_vm3, %v2554_v4  ;;  %v980_v11 = vadd.f32 %v2755_v9, %v3291_v6  ;;  %v971_v13 = vpop.f32.mrb[17].mxu0 }
 0x141   : > { %2138 = vst.msk [vmem:[%s3304_s25 + $0x13c] sm:$0xf] %vm2058_vm3, %v2618_v5  ;;  %v1236_v12 = vadd.f32 %v2819_v10, %v3291_v6  ;;  %v1227_v14 = vpop.f32.mrb[17].mxu1  ;;  %2072 = vst.msk [vmem:[%s3304_s25 + $0x34] sm:$0xf] %vm2058_vm3, %v2552_v7  ;;  %v972_v15 = vadd.f32 %v3291_v6, %v971_v13  ;;  %v2756_v17 = vpop.f32.mrb[18].mxu0 }
 0x142   : > { %2136 = vst.msk [vmem:[%s3304_s25 + $0x134] sm:$0xf] %vm2058_vm3, %v2616_v8  ;;  %v1228_v16 = vadd.f32 %v3291_v6, %v1227_v14  ;;  %v2820_v18 = vpop.f32.mrb[18].mxu1  ;;  %v1436_v19 = vmax.f32 %v980_v11, 0.0  ;;  %v983_v21 = vadd.f32 %v2756_v17, %v3291_v6  ;;  %v974_v23 = vpop.f32.mrb[19].mxu0 }
 0x143   : > { %v1500_v20 = vmax.f32 %v1236_v12, 0.0  ;;  %v1239_v22 = vadd.f32 %v2820_v18, %v3291_v6  ;;  %v1230_v24 = vpop.f32.mrb[19].mxu1  ;;  %v1434_v25 = vmax.f32 %v972_v15, 0.0  ;;  %v975_v27 = vadd.f32 %v3291_v6, %v974_v23 }
 0x144   : > { %v1498_v26 = vmax.f32 %v1228_v16, 0.0  ;;  %v1231_v28 = vadd.f32 %v3291_v6, %v1230_v24  ;;  %v2557_v29 = vpack.c.bf16 %v1436_v19, %v1436_v19  ;;  %v1437_v31 = vmax.f32 %v983_v21, 0.0 }
 0x145   : > { %v2621_v30 = vpack.c.bf16 %v1500_v20, %v1500_v20  ;;  %v1501_v32 = vmax.f32 %v1239_v22, 0.0  ;;  %v2555_v33 = vpack.c.bf16 %v1434_v25, %v1434_v25  ;;  %v1435_v35 = vmax.f32 %v975_v27, 0.0 }
 0x146   : > { %v2619_v34 = vpack.c.bf16 %v1498_v26, %v1498_v26  ;;  %v1499_v36 = vmax.f32 %v1231_v28, 0.0  ;;  %2077 = vst.msk [vmem:[%s3304_s25 + $0x48] sm:$0xf] %vm2058_vm3, %v2557_v29  ;;  %v2558_v37 = vpack.c.bf16 %v1437_v31, %v1437_v31 }
 0x147   : > { %2141 = vst.msk [vmem:[%s3304_s25 + $0x148] sm:$0xf] %vm2058_vm3, %v2621_v30  ;;  %v2622_v38 = vpack.c.bf16 %v1501_v32, %v1501_v32  ;;  %2075 = vst.msk [vmem:[%s3304_s25 + $0x40] sm:$0xf] %vm2058_vm3, %v2555_v33  ;;  %v2556_v39 = vpack.c.bf16 %v1435_v35, %v1435_v35  ;;  %v2759_v41 = vpop.f32.mrb[20].mxu0 }
 0x148   : > { %2139 = vst.msk [vmem:[%s3304_s25 + $0x140] sm:$0xf] %vm2058_vm3, %v2619_v34  ;;  %v2620_v40 = vpack.c.bf16 %v1499_v36, %v1499_v36  ;;  %v2823_v42 = vpop.f32.mrb[20].mxu1  ;;  %2078 = vst.msk [vmem:[%s3304_s25 + $0x4c] sm:$0xf] %vm2058_vm3, %v2558_v37  ;;  %v996_v43 = vadd.f32 %v2759_v41, %v3291_v6  ;;  %v987_v45 = vpop.f32.mrb[21].mxu0 }
 0x149   : > { %2142 = vst.msk [vmem:[%s3304_s25 + $0x14c] sm:$0xf] %vm2058_vm3, %v2622_v38  ;;  %v1252_v44 = vadd.f32 %v2823_v42, %v3291_v6  ;;  %v1243_v46 = vpop.f32.mrb[21].mxu1  ;;  %2076 = vst.msk [vmem:[%s3304_s25 + $0x44] sm:$0xf] %vm2058_vm3, %v2556_v39  ;;  %v988_v47 = vadd.f32 %v3291_v6, %v987_v45  ;;  %v2760_v49 = vpop.f32.mrb[22].mxu0 }
 0x14a   : > { %2140 = vst.msk [vmem:[%s3304_s25 + $0x144] sm:$0xf] %vm2058_vm3, %v2620_v40  ;;  %v1244_v48 = vadd.f32 %v3291_v6, %v1243_v46  ;;  %v2824_v50 = vpop.f32.mrb[22].mxu1  ;;  %v1440_v51 = vmax.f32 %v996_v43, 0.0  ;;  %v999_v53 = vadd.f32 %v2760_v49, %v3291_v6  ;;  %v990_v55 = vpop.f32.mrb[23].mxu0 }
 0x14b   : > { %v1504_v52 = vmax.f32 %v1252_v44, 0.0  ;;  %v1255_v54 = vadd.f32 %v2824_v50, %v3291_v6  ;;  %v1246_v56 = vpop.f32.mrb[23].mxu1  ;;  %v1438_v57 = vmax.f32 %v988_v47, 0.0  ;;  %v991_v59 = vadd.f32 %v3291_v6, %v990_v55 }
 0x14c   : > { %v1502_v58 = vmax.f32 %v1244_v48, 0.0  ;;  %v1247_v60 = vadd.f32 %v3291_v6, %v1246_v56  ;;  %v2561_v61 = vpack.c.bf16 %v1440_v51, %v1440_v51  ;;  %v1441_v63 = vmax.f32 %v999_v53, 0.0 }
 0x14d   : > { %v2625_v62 = vpack.c.bf16 %v1504_v52, %v1504_v52  ;;  %v1505_v0 = vmax.f32 %v1255_v54, 0.0  ;;  %v2559_v1 = vpack.c.bf16 %v1438_v57, %v1438_v57  ;;  %v1439_v3 = vmax.f32 %v991_v59, 0.0 }
 0x14e   : > { %v2623_v2 = vpack.c.bf16 %v1502_v58, %v1502_v58  ;;  %v1503_v4 = vmax.f32 %v1247_v60, 0.0  ;;  %2081 = vst.msk [vmem:[%s3304_s25 + $0x58] sm:$0xf] %vm2058_vm3, %v2561_v61  ;;  %v2562_v5 = vpack.c.bf16 %v1441_v63, %v1441_v63 }
 0x14f   : > { %2145 = vst.msk [vmem:[%s3304_s25 + $0x158] sm:$0xf] %vm2058_vm3, %v2625_v62  ;;  %v2626_v7 = vpack.c.bf16 %v1505_v0, %v1505_v0  ;;  %2079 = vst.msk [vmem:[%s3304_s25 + $0x50] sm:$0xf] %vm2058_vm3, %v2559_v1  ;;  %v2560_v8 = vpack.c.bf16 %v1439_v3, %v1439_v3  ;;  %v2763_v10 = vpop.f32.mrb[24].mxu0 }
 0x150   : > { %2143 = vst.msk [vmem:[%s3304_s25 + $0x150] sm:$0xf] %vm2058_vm3, %v2623_v2  ;;  %v2624_v9 = vpack.c.bf16 %v1503_v4, %v1503_v4  ;;  %v2827_v11 = vpop.f32.mrb[24].mxu1  ;;  %2082 = vst.msk [vmem:[%s3304_s25 + $0x5c] sm:$0xf] %vm2058_vm3, %v2562_v5  ;;  %v1012_v12 = vadd.f32 %v2763_v10, %v3291_v6  ;;  %v1003_v14 = vpop.f32.mrb[25].mxu0 }
 0x151   : > { %2146 = vst.msk [vmem:[%s3304_s25 + $0x15c] sm:$0xf] %vm2058_vm3, %v2626_v7  ;;  %v1268_v13 = vadd.f32 %v2827_v11, %v3291_v6  ;;  %v1259_v15 = vpop.f32.mrb[25].mxu1  ;;  %2080 = vst.msk [vmem:[%s3304_s25 + $0x54] sm:$0xf] %vm2058_vm3, %v2560_v8  ;;  %v1004_v16 = vadd.f32 %v3291_v6, %v1003_v14  ;;  %v2764_v18 = vpop.f32.mrb[26].mxu0 }
 0x152   : > { %2144 = vst.msk [vmem:[%s3304_s25 + $0x154] sm:$0xf] %vm2058_vm3, %v2624_v9  ;;  %v1260_v17 = vadd.f32 %v3291_v6, %v1259_v15  ;;  %v2828_v19 = vpop.f32.mrb[26].mxu1  ;;  %v1444_v20 = vmax.f32 %v1012_v12, 0.0  ;;  %v1015_v22 = vadd.f32 %v2764_v18, %v3291_v6  ;;  %v1006_v24 = vpop.f32.mrb[27].mxu0 }
 0x153   : > { %v1508_v21 = vmax.f32 %v1268_v13, 0.0  ;;  %v1271_v23 = vadd.f32 %v2828_v19, %v3291_v6  ;;  %v1262_v25 = vpop.f32.mrb[27].mxu1  ;;  %v1442_v26 = vmax.f32 %v1004_v16, 0.0  ;;  %v1007_v28 = vadd.f32 %v3291_v6, %v1006_v24 }
 0x154   : > { %v1506_v27 = vmax.f32 %v1260_v17, 0.0  ;;  %v1263_v29 = vadd.f32 %v3291_v6, %v1262_v25  ;;  %v2565_v30 = vpack.c.bf16 %v1444_v20, %v1444_v20  ;;  %v1445_v32 = vmax.f32 %v1015_v22, 0.0 }
 0x155   : > { %v2629_v31 = vpack.c.bf16 %v1508_v21, %v1508_v21  ;;  %v1509_v33 = vmax.f32 %v1271_v23, 0.0  ;;  %v2563_v34 = vpack.c.bf16 %v1442_v26, %v1442_v26  ;;  %v1443_v36 = vmax.f32 %v1007_v28, 0.0 }
 0x156   : > { %v2627_v35 = vpack.c.bf16 %v1506_v27, %v1506_v27  ;;  %v1507_v37 = vmax.f32 %v1263_v29, 0.0  ;;  %2085 = vst.msk [vmem:[%s3304_s25 + $0x68] sm:$0xf] %vm2058_vm3, %v2565_v30  ;;  %v2566_v38 = vpack.c.bf16 %v1445_v32, %v1445_v32 }
 0x157   : > { %2149 = vst.msk [vmem:[%s3304_s25 + $0x168] sm:$0xf] %vm2058_vm3, %v2629_v31  ;;  %v2630_v39 = vpack.c.bf16 %v1509_v33, %v1509_v33  ;;  %2083 = vst.msk [vmem:[%s3304_s25 + $0x60] sm:$0xf] %vm2058_vm3, %v2563_v34  ;;  %v2564_v40 = vpack.c.bf16 %v1443_v36, %v1443_v36  ;;  %v2767_v42 = vpop.f32.mrb[28].mxu0 }
 0x158   : > { %2147 = vst.msk [vmem:[%s3304_s25 + $0x160] sm:$0xf] %vm2058_vm3, %v2627_v35  ;;  %v2628_v41 = vpack.c.bf16 %v1507_v37, %v1507_v37  ;;  %v2831_v43 = vpop.f32.mrb[28].mxu1  ;;  %2086 = vst.msk [vmem:[%s3304_s25 + $0x6c] sm:$0xf] %vm2058_vm3, %v2566_v38  ;;  %v1028_v44 = vadd.f32 %v2767_v42, %v3291_v6  ;;  %v1019_v46 = vpop.f32.mrb[29].mxu0 }
 0x159   : > { %2150 = vst.msk [vmem:[%s3304_s25 + $0x16c] sm:$0xf] %vm2058_vm3, %v2630_v39  ;;  %v1284_v45 = vadd.f32 %v2831_v43, %v3291_v6  ;;  %v1275_v47 = vpop.f32.mrb[29].mxu1  ;;  %2084 = vst.msk [vmem:[%s3304_s25 + $0x64] sm:$0xf] %vm2058_vm3, %v2564_v40  ;;  %v1020_v48 = vadd.f32 %v3291_v6, %v1019_v46  ;;  %v2768_v50 = vpop.f32.mrb[30].mxu0 }
 0x15a   : > { %2148 = vst.msk [vmem:[%s3304_s25 + $0x164] sm:$0xf] %vm2058_vm3, %v2628_v41  ;;  %v1276_v49 = vadd.f32 %v3291_v6, %v1275_v47  ;;  %v2832_v51 = vpop.f32.mrb[30].mxu1  ;;  %v1448_v52 = vmax.f32 %v1028_v44, 0.0  ;;  %v1031_v54 = vadd.f32 %v2768_v50, %v3291_v6  ;;  %v1022_v56 = vpop.f32.mrb[31].mxu0 }
 0x15b   : > { %v1512_v53 = vmax.f32 %v1284_v45, 0.0  ;;  %v1287_v55 = vadd.f32 %v2832_v51, %v3291_v6  ;;  %v1278_v57 = vpop.f32.mrb[31].mxu1  ;;  %v1446_v58 = vmax.f32 %v1020_v48, 0.0  ;;  %v1023_v60 = vadd.f32 %v3291_v6, %v1022_v56 }
 0x15c   : > { %v1510_v59 = vmax.f32 %v1276_v49, 0.0  ;;  %v1279_v61 = vadd.f32 %v3291_v6, %v1278_v57  ;;  %v2569_v62 = vpack.c.bf16 %v1448_v52, %v1448_v52  ;;  %v1449_v0 = vmax.f32 %v1031_v54, 0.0 }
 0x15d   : > { %v2633_v63 = vpack.c.bf16 %v1512_v53, %v1512_v53  ;;  %v1513_v1 = vmax.f32 %v1287_v55, 0.0  ;;  %v2567_v2 = vpack.c.bf16 %v1446_v58, %v1446_v58  ;;  %v1447_v4 = vmax.f32 %v1023_v60, 0.0 }
 0x15e   : > { %v2631_v3 = vpack.c.bf16 %v1510_v59, %v1510_v59  ;;  %v1511_v5 = vmax.f32 %v1279_v61, 0.0  ;;  %2089 = vst.msk [vmem:[%s3304_s25 + $0x78] sm:$0xf] %vm2058_vm3, %v2569_v62  ;;  %v2570_v7 = vpack.c.bf16 %v1449_v0, %v1449_v0 }
 0x15f   : > { %2153 = vst.msk [vmem:[%s3304_s25 + $0x178] sm:$0xf] %vm2058_vm3, %v2633_v63  ;;  %v2634_v8 = vpack.c.bf16 %v1513_v1, %v1513_v1  ;;  %2087 = vst.msk [vmem:[%s3304_s25 + $0x70] sm:$0xf] %vm2058_vm3, %v2567_v2  ;;  %v2568_v9 = vpack.c.bf16 %v1447_v4, %v1447_v4  ;;  %v2771_v11 = vpop.f32.mrb[32].mxu0 }
 0x160   : > { %2151 = vst.msk [vmem:[%s3304_s25 + $0x170] sm:$0xf] %vm2058_vm3, %v2631_v3  ;;  %v2632_v10 = vpack.c.bf16 %v1511_v5, %v1511_v5  ;;  %v2835_v12 = vpop.f32.mrb[32].mxu1  ;;  %2090 = vst.msk [vmem:[%s3304_s25 + $0x7c] sm:$0xf] %vm2058_vm3, %v2570_v7  ;;  %v1044_v13 = vadd.f32 %v2771_v11, %v3291_v6  ;;  %v1035_v15 = vpop.f32.mrb[33].mxu0 }
 0x161   : > { %2154 = vst.msk [vmem:[%s3304_s25 + $0x17c] sm:$0xf] %vm2058_vm3, %v2634_v8  ;;  %v1300_v14 = vadd.f32 %v2835_v12, %v3291_v6  ;;  %v1291_v16 = vpop.f32.mrb[33].mxu1  ;;  %2088 = vst.msk [vmem:[%s3304_s25 + $0x74] sm:$0xf] %vm2058_vm3, %v2568_v9  ;;  %v1036_v17 = vadd.f32 %v3291_v6, %v1035_v15  ;;  %v2772_v19 = vpop.f32.mrb[34].mxu0 }
 0x162   : > { %2152 = vst.msk [vmem:[%s3304_s25 + $0x174] sm:$0xf] %vm2058_vm3, %v2632_v10  ;;  %v1292_v18 = vadd.f32 %v3291_v6, %v1291_v16  ;;  %v2836_v20 = vpop.f32.mrb[34].mxu1  ;;  %v1452_v21 = vmax.f32 %v1044_v13, 0.0  ;;  %v1047_v23 = vadd.f32 %v2772_v19, %v3291_v6  ;;  %v1038_v25 = vpop.f32.mrb[35].mxu0 }
 0x163   : > { %v1516_v22 = vmax.f32 %v1300_v14, 0.0  ;;  %v1303_v24 = vadd.f32 %v2836_v20, %v3291_v6  ;;  %v1294_v26 = vpop.f32.mrb[35].mxu1  ;;  %v1450_v27 = vmax.f32 %v1036_v17, 0.0  ;;  %v1039_v29 = vadd.f32 %v3291_v6, %v1038_v25 }
 0x164   : > { %v1514_v28 = vmax.f32 %v1292_v18, 0.0  ;;  %v1295_v30 = vadd.f32 %v3291_v6, %v1294_v26  ;;  %v2573_v31 = vpack.c.bf16 %v1452_v21, %v1452_v21  ;;  %v1453_v33 = vmax.f32 %v1047_v23, 0.0 }
 0x165   : > { %v2637_v32 = vpack.c.bf16 %v1516_v22, %v1516_v22  ;;  %v1517_v34 = vmax.f32 %v1303_v24, 0.0  ;;  %v2571_v35 = vpack.c.bf16 %v1450_v27, %v1450_v27  ;;  %v1451_v37 = vmax.f32 %v1039_v29, 0.0 }
 0x166   : > { %v2635_v36 = vpack.c.bf16 %v1514_v28, %v1514_v28  ;;  %v1515_v38 = vmax.f32 %v1295_v30, 0.0  ;;  %2093 = vst.msk [vmem:[%s3304_s25 + $0x88] sm:$0xf] %vm2058_vm3, %v2573_v31  ;;  %v2574_v39 = vpack.c.bf16 %v1453_v33, %v1453_v33 }
 0x167   : > { %2157 = vst.msk [vmem:[%s3304_s25 + $0x188] sm:$0xf] %vm2058_vm3, %v2637_v32  ;;  %v2638_v40 = vpack.c.bf16 %v1517_v34, %v1517_v34  ;;  %2091 = vst.msk [vmem:[%s3304_s25 + $0x80] sm:$0xf] %vm2058_vm3, %v2571_v35  ;;  %v2572_v41 = vpack.c.bf16 %v1451_v37, %v1451_v37  ;;  %v2775_v43 = vpop.f32.mrb[36].mxu0 }
 0x168   : > { %2155 = vst.msk [vmem:[%s3304_s25 + $0x180] sm:$0xf] %vm2058_vm3, %v2635_v36  ;;  %v2636_v42 = vpack.c.bf16 %v1515_v38, %v1515_v38  ;;  %v2839_v44 = vpop.f32.mrb[36].mxu1  ;;  %2094 = vst.msk [vmem:[%s3304_s25 + $0x8c] sm:$0xf] %vm2058_vm3, %v2574_v39  ;;  %v1060_v45 = vadd.f32 %v2775_v43, %v3291_v6  ;;  %v1051_v47 = vpop.f32.mrb[37].mxu0 }
 0x169   : > { %2158 = vst.msk [vmem:[%s3304_s25 + $0x18c] sm:$0xf] %vm2058_vm3, %v2638_v40  ;;  %v1316_v46 = vadd.f32 %v2839_v44, %v3291_v6  ;;  %v1307_v48 = vpop.f32.mrb[37].mxu1  ;;  %2092 = vst.msk [vmem:[%s3304_s25 + $0x84] sm:$0xf] %vm2058_vm3, %v2572_v41  ;;  %v1052_v49 = vadd.f32 %v3291_v6, %v1051_v47  ;;  %v2776_v51 = vpop.f32.mrb[38].mxu0 }
 0x16a   : > { %2156 = vst.msk [vmem:[%s3304_s25 + $0x184] sm:$0xf] %vm2058_vm3, %v2636_v42  ;;  %v1308_v50 = vadd.f32 %v3291_v6, %v1307_v48  ;;  %v2840_v52 = vpop.f32.mrb[38].mxu1  ;;  %v1456_v53 = vmax.f32 %v1060_v45, 0.0  ;;  %v1063_v55 = vadd.f32 %v2776_v51, %v3291_v6  ;;  %v1054_v57 = vpop.f32.mrb[39].mxu0 }
 0x16b   : > { %v1520_v54 = vmax.f32 %v1316_v46, 0.0  ;;  %v1319_v56 = vadd.f32 %v2840_v52, %v3291_v6  ;;  %v1310_v58 = vpop.f32.mrb[39].mxu1  ;;  %v1454_v59 = vmax.f32 %v1052_v49, 0.0  ;;  %v1055_v61 = vadd.f32 %v3291_v6, %v1054_v57 }
 0x16c   : > { %v1518_v60 = vmax.f32 %v1308_v50, 0.0  ;;  %v1311_v62 = vadd.f32 %v3291_v6, %v1310_v58  ;;  %v2577_v63 = vpack.c.bf16 %v1456_v53, %v1456_v53  ;;  %v1457_v1 = vmax.f32 %v1063_v55, 0.0 }
 0x16d   : > { %v2641_v0 = vpack.c.bf16 %v1520_v54, %v1520_v54  ;;  %v1521_v2 = vmax.f32 %v1319_v56, 0.0  ;;  %v2575_v3 = vpack.c.bf16 %v1454_v59, %v1454_v59  ;;  %v1455_v5 = vmax.f32 %v1055_v61, 0.0 }
 0x16e   : > { %v2639_v4 = vpack.c.bf16 %v1518_v60, %v1518_v60  ;;  %v1519_v7 = vmax.f32 %v1311_v62, 0.0  ;;  %2097 = vst.msk [vmem:[%s3304_s25 + $0x98] sm:$0xf] %vm2058_vm3, %v2577_v63  ;;  %v2578_v8 = vpack.c.bf16 %v1457_v1, %v1457_v1 }
 0x16f   : > { %2161 = vst.msk [vmem:[%s3304_s25 + $0x198] sm:$0xf] %vm2058_vm3, %v2641_v0  ;;  %v2642_v9 = vpack.c.bf16 %v1521_v2, %v1521_v2  ;;  %2095 = vst.msk [vmem:[%s3304_s25 + $0x90] sm:$0xf] %vm2058_vm3, %v2575_v3  ;;  %v2576_v10 = vpack.c.bf16 %v1455_v5, %v1455_v5  ;;  %v2779_v12 = vpop.f32.mrb[40].mxu0 }
 0x170   : > { %2159 = vst.msk [vmem:[%s3304_s25 + $0x190] sm:$0xf] %vm2058_vm3, %v2639_v4  ;;  %v2640_v11 = vpack.c.bf16 %v1519_v7, %v1519_v7  ;;  %v2843_v13 = vpop.f32.mrb[40].mxu1  ;;  %2098 = vst.msk [vmem:[%s3304_s25 + $0x9c] sm:$0xf] %vm2058_vm3, %v2578_v8  ;;  %v1076_v14 = vadd.f32 %v2779_v12, %v3291_v6  ;;  %v1067_v16 = vpop.f32.mrb[41].mxu0 }
 0x171   : > { %2162 = vst.msk [vmem:[%s3304_s25 + $0x19c] sm:$0xf] %vm2058_vm3, %v2642_v9  ;;  %v1332_v15 = vadd.f32 %v2843_v13, %v3291_v6  ;;  %v1323_v17 = vpop.f32.mrb[41].mxu1  ;;  %2096 = vst.msk [vmem:[%s3304_s25 + $0x94] sm:$0xf] %vm2058_vm3, %v2576_v10  ;;  %v1068_v18 = vadd.f32 %v3291_v6, %v1067_v16  ;;  %v2780_v20 = vpop.f32.mrb[42].mxu0 }
 0x172   : > { %2160 = vst.msk [vmem:[%s3304_s25 + $0x194] sm:$0xf] %vm2058_vm3, %v2640_v11  ;;  %v1324_v19 = vadd.f32 %v3291_v6, %v1323_v17  ;;  %v2844_v21 = vpop.f32.mrb[42].mxu1  ;;  %v1460_v22 = vmax.f32 %v1076_v14, 0.0  ;;  %v1079_v24 = vadd.f32 %v2780_v20, %v3291_v6  ;;  %v1070_v26 = vpop.f32.mrb[43].mxu0 }
 0x173   : > { %v1524_v23 = vmax.f32 %v1332_v15, 0.0  ;;  %v1335_v25 = vadd.f32 %v2844_v21, %v3291_v6  ;;  %v1326_v27 = vpop.f32.mrb[43].mxu1  ;;  %v1458_v28 = vmax.f32 %v1068_v18, 0.0  ;;  %v1071_v30 = vadd.f32 %v3291_v6, %v1070_v26 }
 0x174   : > { %v1522_v29 = vmax.f32 %v1324_v19, 0.0  ;;  %v1327_v31 = vadd.f32 %v3291_v6, %v1326_v27  ;;  %v2581_v32 = vpack.c.bf16 %v1460_v22, %v1460_v22  ;;  %v1461_v34 = vmax.f32 %v1079_v24, 0.0 }
 0x175   : > { %v2645_v33 = vpack.c.bf16 %v1524_v23, %v1524_v23  ;;  %v1525_v35 = vmax.f32 %v1335_v25, 0.0  ;;  %v2579_v36 = vpack.c.bf16 %v1458_v28, %v1458_v28  ;;  %v1459_v38 = vmax.f32 %v1071_v30, 0.0 }
 0x176   : > { %v2643_v37 = vpack.c.bf16 %v1522_v29, %v1522_v29  ;;  %v1523_v39 = vmax.f32 %v1327_v31, 0.0  ;;  %2101 = vst.msk [vmem:[%s3304_s25 + $0xa8] sm:$0xf] %vm2058_vm3, %v2581_v32  ;;  %v2582_v40 = vpack.c.bf16 %v1461_v34, %v1461_v34 }
 0x177   : > { %2165 = vst.msk [vmem:[%s3304_s25 + $0x1a8] sm:$0xf] %vm2058_vm3, %v2645_v33  ;;  %v2646_v41 = vpack.c.bf16 %v1525_v35, %v1525_v35  ;;  %2099 = vst.msk [vmem:[%s3304_s25 + $0xa0] sm:$0xf] %vm2058_vm3, %v2579_v36  ;;  %v2580_v42 = vpack.c.bf16 %v1459_v38, %v1459_v38  ;;  %v2783_v44 = vpop.f32.mrb[44].mxu0 }
 0x178   : > { %2163 = vst.msk [vmem:[%s3304_s25 + $0x1a0] sm:$0xf] %vm2058_vm3, %v2643_v37  ;;  %v2644_v43 = vpack.c.bf16 %v1523_v39, %v1523_v39  ;;  %v2847_v45 = vpop.f32.mrb[44].mxu1  ;;  %2102 = vst.msk [vmem:[%s3304_s25 + $0xac] sm:$0xf] %vm2058_vm3, %v2582_v40  ;;  %v1092_v46 = vadd.f32 %v2783_v44, %v3291_v6  ;;  %v1083_v48 = vpop.f32.mrb[45].mxu0 }
 0x179   : > { %2166 = vst.msk [vmem:[%s3304_s25 + $0x1ac] sm:$0xf] %vm2058_vm3, %v2646_v41  ;;  %v1348_v47 = vadd.f32 %v2847_v45, %v3291_v6  ;;  %v1339_v49 = vpop.f32.mrb[45].mxu1  ;;  %2100 = vst.msk [vmem:[%s3304_s25 + $0xa4] sm:$0xf] %vm2058_vm3, %v2580_v42  ;;  %v1084_v50 = vadd.f32 %v3291_v6, %v1083_v48  ;;  %v2784_v52 = vpop.f32.mrb[46].mxu0 }
 0x17a   : > { %2164 = vst.msk [vmem:[%s3304_s25 + $0x1a4] sm:$0xf] %vm2058_vm3, %v2644_v43  ;;  %v1340_v51 = vadd.f32 %v3291_v6, %v1339_v49  ;;  %v2848_v53 = vpop.f32.mrb[46].mxu1  ;;  %v1464_v54 = vmax.f32 %v1092_v46, 0.0  ;;  %v1095_v56 = vadd.f32 %v2784_v52, %v3291_v6  ;;  %v1086_v58 = vpop.f32.mrb[47].mxu0 }
 0x17b   : > { %v1528_v55 = vmax.f32 %v1348_v47, 0.0  ;;  %v1351_v57 = vadd.f32 %v2848_v53, %v3291_v6  ;;  %v1342_v59 = vpop.f32.mrb[47].mxu1  ;;  %v1462_v60 = vmax.f32 %v1084_v50, 0.0  ;;  %v1087_v62 = vadd.f32 %v3291_v6, %v1086_v58  ;;  %v3608_v46 = vld [vmem:[#allocation4] ss:$0 sm:$0xff] }
 0x17c   : > { %v1526_v61 = vmax.f32 %v1340_v51, 0.0  ;;  %v1343_v63 = vadd.f32 %v3291_v6, %v1342_v59  ;;  %v2585_v0 = vpack.c.bf16 %v1464_v54, %v1464_v54  ;;  %v1465_v2 = vmax.f32 %v1095_v56, 0.0 }
 0x17d   : > { %v2649_v1 = vpack.c.bf16 %v1528_v55, %v1528_v55  ;;  %v1529_v3 = vmax.f32 %v1351_v57, 0.0  ;;  %v2583_v4 = vpack.c.bf16 %v1462_v60, %v1462_v60  ;;  %v1463_v7 = vmax.f32 %v1087_v62, 0.0 }
 0x17e   : > { %v2647_v5 = vpack.c.bf16 %v1526_v61, %v1526_v61  ;;  %v1527_v8 = vmax.f32 %v1343_v63, 0.0  ;;  %2105 = vst.msk [vmem:[%s3304_s25 + $0xb8] sm:$0xf] %vm2058_vm3, %v2585_v0  ;;  %v2586_v9 = vpack.c.bf16 %v1465_v2, %v1465_v2 }
 0x17f   : > { %2169 = vst.msk [vmem:[%s3304_s25 + $0x1b8] sm:$0xf] %vm2058_vm3, %v2649_v1  ;;  %v2650_v10 = vpack.c.bf16 %v1529_v3, %v1529_v3  ;;  %2103 = vst.msk [vmem:[%s3304_s25 + $0xb0] sm:$0xf] %vm2058_vm3, %v2583_v4  ;;  %v2584_v11 = vpack.c.bf16 %v1463_v7, %v1463_v7  ;;  %v2787_v13 = vpop.f32.mrb[48].mxu0 }
 0x180   : > { %2167 = vst.msk [vmem:[%s3304_s25 + $0x1b0] sm:$0xf] %vm2058_vm3, %v2647_v5  ;;  %v2648_v12 = vpack.c.bf16 %v1527_v8, %v1527_v8  ;;  %v2851_v14 = vpop.f32.mrb[48].mxu1  ;;  %2106 = vst.msk [vmem:[%s3304_s25 + $0xbc] sm:$0xf] %vm2058_vm3, %v2586_v9  ;;  %v1108_v15 = vadd.f32 %v2787_v13, %v3291_v6  ;;  %v1099_v17 = vpop.f32.mrb[49].mxu0 }
 0x181   : > { %2170 = vst.msk [vmem:[%s3304_s25 + $0x1bc] sm:$0xf] %vm2058_vm3, %v2650_v10  ;;  %v1364_v16 = vadd.f32 %v2851_v14, %v3291_v6  ;;  %v1355_v18 = vpop.f32.mrb[49].mxu1  ;;  %2104 = vst.msk [vmem:[%s3304_s25 + $0xb4] sm:$0xf] %vm2058_vm3, %v2584_v11  ;;  %v1100_v19 = vadd.f32 %v3291_v6, %v1099_v17  ;;  %v2788_v21 = vpop.f32.mrb[50].mxu0 }
 0x182   : > { %2168 = vst.msk [vmem:[%s3304_s25 + $0x1b4] sm:$0xf] %vm2058_vm3, %v2648_v12  ;;  %v1356_v20 = vadd.f32 %v3291_v6, %v1355_v18  ;;  %v2852_v22 = vpop.f32.mrb[50].mxu1  ;;  %v1468_v23 = vmax.f32 %v1108_v15, 0.0  ;;  %v1111_v25 = vadd.f32 %v2788_v21, %v3291_v6  ;;  %v1102_v27 = vpop.f32.mrb[51].mxu0 }
 0x183   : > { %v1532_v24 = vmax.f32 %v1364_v16, 0.0  ;;  %v1367_v26 = vadd.f32 %v2852_v22, %v3291_v6  ;;  %v1358_v28 = vpop.f32.mrb[51].mxu1  ;;  %v1466_v29 = vmax.f32 %v1100_v19, 0.0  ;;  %v1103_v31 = vadd.f32 %v3291_v6, %v1102_v27 }
 0x184   : > { %v1530_v30 = vmax.f32 %v1356_v20, 0.0  ;;  %v1359_v32 = vadd.f32 %v3291_v6, %v1358_v28  ;;  %v2589_v33 = vpack.c.bf16 %v1468_v23, %v1468_v23  ;;  %v1469_v35 = vmax.f32 %v1111_v25, 0.0 }
 0x185   : > { %v2653_v34 = vpack.c.bf16 %v1532_v24, %v1532_v24  ;;  %v1533_v36 = vmax.f32 %v1367_v26, 0.0  ;;  %v2587_v37 = vpack.c.bf16 %v1466_v29, %v1466_v29  ;;  %v1467_v39 = vmax.f32 %v1103_v31, 0.0 }
 0x186   : > { %v2651_v38 = vpack.c.bf16 %v1530_v30, %v1530_v30  ;;  %v1531_v40 = vmax.f32 %v1359_v32, 0.0  ;;  %2109 = vst.msk [vmem:[%s3304_s25 + $0xc8] sm:$0xf] %vm2058_vm3, %v2589_v33  ;;  %v2590_v41 = vpack.c.bf16 %v1469_v35, %v1469_v35 }
 0x187   : > { %2173 = vst.msk [vmem:[%s3304_s25 + $0x1c8] sm:$0xf] %vm2058_vm3, %v2653_v34  ;;  %v2654_v42 = vpack.c.bf16 %v1533_v36, %v1533_v36  ;;  %2107 = vst.msk [vmem:[%s3304_s25 + $0xc0] sm:$0xf] %vm2058_vm3, %v2587_v37  ;;  %v2588_v6 = vpack.c.bf16 %v1467_v39, %v1467_v39  ;;  %v2791_v44 = vpop.f32.mrb[52].mxu0 }
 0x188   : > { %2171 = vst.msk [vmem:[%s3304_s25 + $0x1c0] sm:$0xf] %vm2058_vm3, %v2651_v38  ;;  %v2652_v43 = vpack.c.bf16 %v1531_v40, %v1531_v40  ;;  %v2855_v45 = vpop.f32.mrb[52].mxu1  ;;  %2110 = vst.msk [vmem:[%s3304_s25 + $0xcc] sm:$0xf] %vm2058_vm3, %v2590_v41  ;;  %v1124_v47 = vadd.f32 %v3608_v46, %v2791_v44  ;;  %v1115_v49 = vpop.f32.mrb[53].mxu0 }
 0x189   : > { %2174 = vst.msk [vmem:[%s3304_s25 + $0x1cc] sm:$0xf] %vm2058_vm3, %v2654_v42  ;;  %v1380_v48 = vadd.f32 %v3608_v46, %v2855_v45  ;;  %v1371_v50 = vpop.f32.mrb[53].mxu1  ;;  %2108 = vst.msk [vmem:[%s3304_s25 + $0xc4] sm:$0xf] %vm2058_vm3, %v2588_v6  ;;  %v1116_v51 = vadd.f32 %v3608_v46, %v1115_v49  ;;  %v2792_v53 = vpop.f32.mrb[54].mxu0 }
 0x18a   : > { %2172 = vst.msk [vmem:[%s3304_s25 + $0x1c4] sm:$0xf] %vm2058_vm3, %v2652_v43  ;;  %v1372_v52 = vadd.f32 %v3608_v46, %v1371_v50  ;;  %v2856_v54 = vpop.f32.mrb[54].mxu1  ;;  %v1472_v55 = vmax.f32 %v1124_v47, 0.0  ;;  %v1127_v57 = vadd.f32 %v3608_v46, %v2792_v53  ;;  %v1118_v59 = vpop.f32.mrb[55].mxu0 }
 0x18b   : > { %v1536_v56 = vmax.f32 %v1380_v48, 0.0  ;;  %v1383_v58 = vadd.f32 %v3608_v46, %v2856_v54  ;;  %v1374_v60 = vpop.f32.mrb[55].mxu1  ;;  %v1470_v61 = vmax.f32 %v1116_v51, 0.0  ;;  %v1119_v63 = vadd.f32 %v3608_v46, %v1118_v59 }
 0x18c   : > { %v1534_v62 = vmax.f32 %v1372_v52, 0.0  ;;  %v1375_v0 = vadd.f32 %v3608_v46, %v1374_v60  ;;  %v2593_v1 = vpack.c.bf16 %v1472_v55, %v1472_v55  ;;  %v1473_v3 = vmax.f32 %v1127_v57, 0.0 }
 0x18d   : > { %v2657_v2 = vpack.c.bf16 %v1536_v56, %v1536_v56  ;;  %v1537_v4 = vmax.f32 %v1383_v58, 0.0  ;;  %v2591_v5 = vpack.c.bf16 %v1470_v61, %v1470_v61  ;;  %v1471_v8 = vmax.f32 %v1119_v63, 0.0 }
 0x18e   : > { %v2655_v7 = vpack.c.bf16 %v1534_v62, %v1534_v62  ;;  %v1535_v9 = vmax.f32 %v1375_v0, 0.0  ;;  %2113 = vst.msk [vmem:[%s3304_s25 + $0xd8] sm:$0xf] %vm2058_vm3, %v2593_v1  ;;  %v2594_v10 = vpack.c.bf16 %v1473_v3, %v1473_v3 }
 0x18f   : > { %2177 = vst.msk [vmem:[%s3304_s25 + $0x1d8] sm:$0xf] %vm2058_vm3, %v2657_v2  ;;  %v2658_v11 = vpack.c.bf16 %v1537_v4, %v1537_v4  ;;  %2111 = vst.msk [vmem:[%s3304_s25 + $0xd0] sm:$0xf] %vm2058_vm3, %v2591_v5  ;;  %v2592_v12 = vpack.c.bf16 %v1471_v8, %v1471_v8  ;;  %v2795_v14 = vpop.f32.mrb[56].mxu0 }
 0x190   : > { %2175 = vst.msk [vmem:[%s3304_s25 + $0x1d0] sm:$0xf] %vm2058_vm3, %v2655_v7  ;;  %v2656_v13 = vpack.c.bf16 %v1535_v9, %v1535_v9  ;;  %v2859_v15 = vpop.f32.mrb[56].mxu1  ;;  %2114 = vst.msk [vmem:[%s3304_s25 + $0xdc] sm:$0xf] %vm2058_vm3, %v2594_v10  ;;  %v1140_v16 = vadd.f32 %v3608_v46, %v2795_v14  ;;  %v1131_v18 = vpop.f32.mrb[57].mxu0 }
 0x191   : > { %2178 = vst.msk [vmem:[%s3304_s25 + $0x1dc] sm:$0xf] %vm2058_vm3, %v2658_v11  ;;  %v1396_v17 = vadd.f32 %v3608_v46, %v2859_v15  ;;  %v1387_v19 = vpop.f32.mrb[57].mxu1  ;;  %2112 = vst.msk [vmem:[%s3304_s25 + $0xd4] sm:$0xf] %vm2058_vm3, %v2592_v12  ;;  %v1132_v20 = vadd.f32 %v3608_v46, %v1131_v18  ;;  %v2796_v22 = vpop.f32.mrb[58].mxu0 }
 0x192   : > { %2176 = vst.msk [vmem:[%s3304_s25 + $0x1d4] sm:$0xf] %vm2058_vm3, %v2656_v13  ;;  %v1388_v21 = vadd.f32 %v3608_v46, %v1387_v19  ;;  %v2860_v23 = vpop.f32.mrb[58].mxu1  ;;  %v1476_v24 = vmax.f32 %v1140_v16, 0.0  ;;  %v1143_v26 = vadd.f32 %v3608_v46, %v2796_v22  ;;  %v1134_v28 = vpop.f32.mrb[59].mxu0 }
 0x193   : > { %v1540_v25 = vmax.f32 %v1396_v17, 0.0  ;;  %v1399_v27 = vadd.f32 %v3608_v46, %v2860_v23  ;;  %v1390_v29 = vpop.f32.mrb[59].mxu1  ;;  %v1474_v30 = vmax.f32 %v1132_v20, 0.0  ;;  %v1135_v32 = vadd.f32 %v3608_v46, %v1134_v28 }
 0x194   : > { %v1538_v31 = vmax.f32 %v1388_v21, 0.0  ;;  %v1391_v33 = vadd.f32 %v3608_v46, %v1390_v29  ;;  %v2597_v34 = vpack.c.bf16 %v1476_v24, %v1476_v24  ;;  %v1477_v36 = vmax.f32 %v1143_v26, 0.0 }
 0x195   : > { %v2661_v35 = vpack.c.bf16 %v1540_v25, %v1540_v25  ;;  %v1541_v37 = vmax.f32 %v1399_v27, 0.0  ;;  %v2595_v38 = vpack.c.bf16 %v1474_v30, %v1474_v30  ;;  %v1475_v40 = vmax.f32 %v1135_v32, 0.0 }
 0x196   : > { %v2659_v39 = vpack.c.bf16 %v1538_v31, %v1538_v31  ;;  %v1539_v41 = vmax.f32 %v1391_v33, 0.0  ;;  %2117 = vst.msk [vmem:[%s3304_s25 + $0xe8] sm:$0xf] %vm2058_vm3, %v2597_v34  ;;  %v2598_v42 = vpack.c.bf16 %v1477_v36, %v1477_v36 }
 0x197   : > { %2181 = vst.msk [vmem:[%s3304_s25 + $0x1e8] sm:$0xf] %vm2058_vm3, %v2661_v35  ;;  %v2662_v6 = vpack.c.bf16 %v1541_v37, %v1541_v37  ;;  %2115 = vst.msk [vmem:[%s3304_s25 + $0xe0] sm:$0xf] %vm2058_vm3, %v2595_v38  ;;  %v2596_v43 = vpack.c.bf16 %v1475_v40, %v1475_v40  ;;  %v2799_v45 = vpop.f32.mrb[60].mxu0 }
 0x198   : > { %2179 = vst.msk [vmem:[%s3304_s25 + $0x1e0] sm:$0xf] %vm2058_vm3, %v2659_v39  ;;  %v2660_v44 = vpack.c.bf16 %v1539_v41, %v1539_v41  ;;  %v2863_v47 = vpop.f32.mrb[60].mxu1  ;;  %2118 = vst.msk [vmem:[%s3304_s25 + $0xec] sm:$0xf] %vm2058_vm3, %v2598_v42  ;;  %v1156_v48 = vadd.f32 %v3608_v46, %v2799_v45  ;;  %v1147_v50 = vpop.f32.mrb[61].mxu0 }
 0x199   : > { %2182 = vst.msk [vmem:[%s3304_s25 + $0x1ec] sm:$0xf] %vm2058_vm3, %v2662_v6  ;;  %v1412_v49 = vadd.f32 %v3608_v46, %v2863_v47  ;;  %v1403_v51 = vpop.f32.mrb[61].mxu1  ;;  %2116 = vst.msk [vmem:[%s3304_s25 + $0xe4] sm:$0xf] %vm2058_vm3, %v2596_v43  ;;  %v1148_v52 = vadd.f32 %v3608_v46, %v1147_v50  ;;  %v2800_v54 = vpop.f32.mrb[62].mxu0 }
 0x19a   : > { %2180 = vst.msk [vmem:[%s3304_s25 + $0x1e4] sm:$0xf] %vm2058_vm3, %v2660_v44  ;;  %v1404_v53 = vadd.f32 %v3608_v46, %v1403_v51  ;;  %v2864_v55 = vpop.f32.mrb[62].mxu1  ;;  %v1480_v56 = vmax.f32 %v1156_v48, 0.0  ;;  %v1159_v58 = vadd.f32 %v3608_v46, %v2800_v54  ;;  %v1150_v60 = vpop.f32.mrb[63].mxu0 }
 0x19b   : > { %v1544_v57 = vmax.f32 %v1412_v49, 0.0  ;;  %v1415_v59 = vadd.f32 %v3608_v46, %v2864_v55  ;;  %v1406_v61 = vpop.f32.mrb[63].mxu1  ;;  %v1478_v62 = vmax.f32 %v1148_v52, 0.0  ;;  %v1151_v0 = vadd.f32 %v3608_v46, %v1150_v60 }
 0x19c   : > { %v1542_v63 = vmax.f32 %v1404_v53, 0.0  ;;  %v1407_v1 = vadd.f32 %v3608_v46, %v1406_v61  ;;  %v2601_v2 = vpack.c.bf16 %v1480_v56, %v1480_v56  ;;  %v1481_v4 = vmax.f32 %v1159_v58, 0.0 }
 0x19d   : > { %v2665_v3 = vpack.c.bf16 %v1544_v57, %v1544_v57  ;;  %v1545_v5 = vmax.f32 %v1415_v59, 0.0  ;;  %v2599_v7 = vpack.c.bf16 %v1478_v62, %v1478_v62  ;;  %v1479_v9 = vmax.f32 %v1151_v0, 0.0 }
 0x19e   : > { %v2663_v8 = vpack.c.bf16 %v1542_v63, %v1542_v63  ;;  %v1543_v10 = vmax.f32 %v1407_v1, 0.0  ;;  %2121 = vst.msk [vmem:[%s3304_s25 + $0xf8] sm:$0xf] %vm2058_vm3, %v2601_v2  ;;  %v2602_v11 = vpack.c.bf16 %v1481_v4, %v1481_v4 }
 0x19f   : > { %2185 = vst.msk [vmem:[%s3304_s25 + $0x1f8] sm:$0xf] %vm2058_vm3, %v2665_v3  ;;  %v2666_v12 = vpack.c.bf16 %v1545_v5, %v1545_v5  ;;  %2119 = vst.msk [vmem:[%s3304_s25 + $0xf0] sm:$0xf] %vm2058_vm3, %v2599_v7  ;;  %v2600_v46 = vpack.c.bf16 %v1479_v9, %v1479_v9 }
 0x1a0   : > { %2183 = vst.msk [vmem:[%s3304_s25 + $0x1f0] sm:$0xf] %vm2058_vm3, %v2663_v8  ;;  %v2664_v13 = vpack.c.bf16 %v1543_v10, %v1543_v10  ;;  %2122 = vst.msk [vmem:[%s3304_s25 + $0xfc] sm:$0xf] %vm2058_vm3, %v2602_v11 }
 0x1a1   : > { %2186 = vst.msk [vmem:[%s3304_s25 + $0x1fc] sm:$0xf] %vm2058_vm3, %v2666_v12  ;;  %2120 = vst.msk [vmem:[%s3304_s25 + $0xf4] sm:$0xf] %vm2058_vm3, %v2600_v46 }
 0x1a2   : > { %2184 = vst.msk [vmem:[%s3304_s25 + $0x1f4] sm:$0xf] %vm2058_vm3, %v2664_v13 }
 0x1a3 PF: > { %s15_s12 = sadd.s32 1, %s3038_s12  }
 0x1a4   : > { %p12_p2 = scmp.ge.s32.totalorder %s15_s12, 4  }
 0x1a6   :  { %14 = sbr.rel (!%p12_p2) target bundleno = 2 (0x2), region = 71 }
 0x1ad   :  { %2209 = vsyncpa [#allocation3], 1 }
 0x1ae   :  { %2211 = vsyncpa [#allocation3 + $0x1], 1 }
 0x1af   :  { %2212 = vsyncpa [#allocation5], 1 }

// kernel: simple_cifar_cnn_forward.5
= control target key start
LH: loop header
LB: loop body
LE: loop exit
PB: predicated region body
PF: predicated region fallthrough
CT: control target
= control target key end

     0   :  { %s4739_s12 = smov 0   ;;  %s5815_s0 = inlined_call_operand.vmem [shape: bf16[2048,288], index: 0, kind: input, shape index: {}]   ;;  %s5816_s1 = inlined_call_operand.vmem [shape: bf16[288,64], index: 1, kind: input, shape index: {}]   ;;  %s5817_s2 = inlined_call_operand.vmem [shape: f32[1,64], index: 2, kind: input, shape index: {}]   ;;  %s5818_s3 = inlined_call_operand.vmem [shape: bf16[2048,64], index: 3, kind: output, shape index: {}]  }
   0x1 LB: > { %s3653_s13 = sadd.s32 4294967295, %s4716_s12   ;;  %p3657_p0 = scmp.ge.s32.totalorder %s4716_s12, 1  ;;  %s4716_s12 = sphi %s4739_s12, %s13_s12  }
   0x2   : > { %p139_p1 = scmp.lt.s32.totalorder %s4716_s12, 3 }
   0x4   : > { %p140_p2 = pnand %p3657_p0, %p139_p1 }
   0x6   : > { %143 = sbr.rel (%p140_p2) target bundleno = 677 (0x2a5), region = 32 }
   0xd   : > { %v4435_v0 = vld [vmem:[%s5816_s1] sm:$0xff]   ;;  %v4718_v1 = vmov 0   ;;  %s3658_s16 = sshll.u32 %s3653_s13, 7  ;;  %v4436_v2 = vld [vmem:[%s5816_s1 + $0x8] sm:$0xff]   ;;  %v4437_v3 = vld [vmem:[%s5816_s1 + $0x10] sm:$0xff]   ;;  %vm1545_vm0 = vcmask 261120  }
   0xe   : > { %1738 = vmatprep.subr.bf16.mxu0 %v4718_v1  ;;  %4393 = vmatprep.subr.bf16.mxu1 %v4718_v1  ;;  %p165_p3 = scmp.lt.s32.totalorder %s3658_s16, 255  ;;  %v4438_v4 = vld [vmem:[%s5816_s1 + $0x18] sm:$0xff]   ;;  %v4439_v5 = vld [vmem:[%s5816_s1 + $0x20] sm:$0xff]   ;;  %v4440_v7 = vld [vmem:[%s5816_s1 + $0x28] sm:$0xff]   ;;  %vm3468_vm1 = vcmask 519168  }
   0xf   : > { %1739 = vmatpush1.bf16.msra.mxu0 %v4435_v0  ;;  %4409 = vmatpush1.bf16.msra.mxu1 %v4435_v0  ;;  %v4441_v9 = vld [vmem:[%s5816_s1 + $0x30] sm:$0xff]   ;;  %v4442_v10 = vld [vmem:[%s5816_s1 + $0x38] sm:$0xff]   ;;  %v4443_v11 = vld [vmem:[%s5816_s1 + $0x40] sm:$0xff]  }
  0x10   : > { %1740 = vmatprep.subr.bf16.mxu0 %v4718_v1  ;;  %4394 = vmatprep.subr.bf16.mxu1 %v4718_v1  ;;  %s5858_s16 = smov (!%p165_p3, %s3658_s16), 255  ;;  %v4444_v12 = vld [vmem:[%s5816_s1 + $0x48] sm:$0xff]   ;;  %v4445_v13 = vld [vmem:[%s5816_s1 + $0x50] sm:$0xff]   ;;  %v4446_v14 = vld [vmem:[%s5816_s1 + $0x58] sm:$0xff]  }
  0x11   : > { %s4425_s23 = smul.u32 12, %s5858_s16  ;;  %v4447_v15 = vld [vmem:[%s5816_s1 + $0x60] sm:$0xff]   ;;  %v4448_v16 = vld [vmem:[%s5816_s1 + $0x68] sm:$0xff]   ;;  %v4449_v17 = vld [vmem:[%s5816_s1 + $0x70] sm:$0xff]   ;;  %s3661_s6 = sshll.u32 %s5858_s16, 2 }
  0x12   : > { %v4450_v18 = vld [vmem:[%s5816_s1 + $0x78] sm:$0xff]   ;;  %v4457_v19 = vld [vmem:[%s5816_s1 + $0x80] sm:$0xff]   ;;  %v4506_v24 = vld [vmem:[%s5816_s1 + $0x88] sm:$0xff]   ;;  %s5223_s8 = scalar_lea.vmem %s5818_s3, %s3661_s6 }
  0x13   : > { %1741 = vmatpush1.bf16.msra.mxu0 %v4436_v2  ;;  %4410 = vmatpush1.bf16.msra.mxu1 %v4436_v2  ;;  %s4776_s28 = scalar_lea.vmem %s5815_s0, %s4425_s23 }
  0x14   : > { %1742 = vmatprep.subr.bf16.mxu0 %v4718_v1  ;;  %4395 = vmatprep.subr.bf16.mxu1 %v4718_v1  ;;  %v4453_v6 = vld [vmem:[%s4776_s28 + $0x4] ss:$12 sps:$4 sm:$0xff]   ;;  %v4451_v20 = vld [vmem:[%s4776_s28] ss:$12 sps:$4 sm:$0xff]   ;;  %v4458_v22 = vld [vmem:[%s4776_s28 + $0x1c] ss:$12 sps:$4 sm:$0xff]  }
  0x15   : > { %v4456_v8 = vld [vmem:[%s4776_s28 + $0x484] ss:$12 sps:$4 sm:$0xff]   ;;  %1770 = vmatprep.mubr.bf16.mxu0 %v4453_v6  ;;  %v4454_v21 = vld [vmem:[%s4776_s28 + $0x480] ss:$12 sps:$4 sm:$0xff]   ;;  %v4460_v23 = vld [vmem:[%s4776_s28 + $0x49c] ss:$12 sps:$4 sm:$0xff]  }
  0x16   : > { %2154 = vmatprep.mubr.bf16.mxu1 %v4456_v8  ;;  %v4462_v25 = vld [vmem:[%s4776_s28 + $0x18] ss:$12 sps:$4 sm:$0xff]   ;;  %v4464_v27 = vld [vmem:[%s4776_s28 + $0x34] ss:$12 sps:$4 sm:$0xff]   ;;  %v4468_v29 = vld [vmem:[%s4776_s28 + $0x30] ss:$12 sps:$4 sm:$0xff]  }
  0x17   : > { %1743 = vmatpush1.bf16.msra.mxu0 %v4437_v3  ;;  %4411 = vmatpush1.bf16.msra.mxu1 %v4437_v3  ;;  %v4463_v26 = vld [vmem:[%s4776_s28 + $0x498] ss:$12 sps:$4 sm:$0xff]   ;;  %v4466_v28 = vld [vmem:[%s4776_s28 + $0x4b4] ss:$12 sps:$4 sm:$0xff]   ;;  %v4469_v30 = vld [vmem:[%s4776_s28 + $0x4b0] ss:$12 sps:$4 sm:$0xff]  }
  0x18   : > { %1744 = vmatprep.subr.bf16.mxu0 %v4718_v1  ;;  %4396 = vmatprep.subr.bf16.mxu1 %v4718_v1  ;;  %v4470_v31 = vld [vmem:[%s4776_s28 + $0x4c] ss:$12 sps:$4 sm:$0xff]   ;;  %v4474_v33 = vld [vmem:[%s4776_s28 + $0x48] ss:$12 sps:$4 sm:$0xff]   ;;  %v4476_v35 = vld [vmem:[%s4776_s28 + $0x64] ss:$12 sps:$4 sm:$0xff]  }
  0x19   : > { %v4472_v32 = vld [vmem:[%s4776_s28 + $0x4cc] ss:$12 sps:$4 sm:$0xff]   ;;  %v4475_v34 = vld [vmem:[%s4776_s28 + $0x4c8] ss:$12 sps:$4 sm:$0xff]   ;;  %v4478_v36 = vld [vmem:[%s4776_s28 + $0x4e4] ss:$12 sps:$4 sm:$0xff]  }
  0x1a   : > { %v4480_v37 = vld [vmem:[%s4776_s28 + $0x60] ss:$12 sps:$4 sm:$0xff]   ;;  %v4482_v39 = vld [vmem:[%s4776_s28 + $0x7c] ss:$12 sps:$4 sm:$0xff]   ;;  %v4486_v41 = vld [vmem:[%s4776_s28 + $0x78] ss:$12 sps:$4 sm:$0xff]  }
  0x1b   : > { %1745 = vmatpush1.bf16.msra.mxu0 %v4438_v4  ;;  %4412 = vmatpush1.bf16.msra.mxu1 %v4438_v4  ;;  %v4481_v38 = vld [vmem:[%s4776_s28 + $0x4e0] ss:$12 sps:$4 sm:$0xff]   ;;  %v4484_v40 = vld [vmem:[%s4776_s28 + $0x4fc] ss:$12 sps:$4 sm:$0xff]   ;;  %v4487_v42 = vld [vmem:[%s4776_s28 + $0x4f8] ss:$12 sps:$4 sm:$0xff]  }
  0x1c   : > { %1746 = vmatprep.subr.bf16.mxu0 %v4718_v1  ;;  %4397 = vmatprep.subr.bf16.mxu1 %v4718_v1  ;;  %v4488_v43 = vld [vmem:[%s4776_s28 + $0x94] ss:$12 sps:$4 sm:$0xff]   ;;  %v4492_v45 = vld [vmem:[%s4776_s28 + $0x90] ss:$12 sps:$4 sm:$0xff]   ;;  %v4494_v47 = vld [vmem:[%s4776_s28 + $0xac] ss:$12 sps:$4 sm:$0xff]  }
  0x1d   : > { %v4490_v44 = vld [vmem:[%s4776_s28 + $0x514] ss:$12 sps:$4 sm:$0xff]   ;;  %v4493_v46 = vld [vmem:[%s4776_s28 + $0x510] ss:$12 sps:$4 sm:$0xff]   ;;  %v4496_v48 = vld [vmem:[%s4776_s28 + $0x52c] ss:$12 sps:$4 sm:$0xff]  }
  0x1e   : > { %v4498_v49 = vld [vmem:[%s4776_s28 + $0xa8] ss:$12 sps:$4 sm:$0xff]   ;;  %v4500_v51 = vld [vmem:[%s4776_s28 + $0xc4] ss:$12 sps:$4 sm:$0xff]   ;;  %v4504_v53 = vld [vmem:[%s4776_s28 + $0xc0] ss:$12 sps:$4 sm:$0xff]  }
  0x1f   : > { %1747 = vmatpush1.bf16.msra.mxu0 %v4439_v5  ;;  %4413 = vmatpush1.bf16.msra.mxu1 %v4439_v5  ;;  %v4499_v50 = vld [vmem:[%s4776_s28 + $0x528] ss:$12 sps:$4 sm:$0xff]   ;;  %v4502_v52 = vld [vmem:[%s4776_s28 + $0x544] ss:$12 sps:$4 sm:$0xff]   ;;  %v4505_v54 = vld [vmem:[%s4776_s28 + $0x540] ss:$12 sps:$4 sm:$0xff]  }
  0x20   : > { %1748 = vmatprep.subr.bf16.mxu0 %v4718_v1  ;;  %4398 = vmatprep.subr.bf16.mxu1 %v4718_v1  ;;  %v4507_v55 = vld [vmem:[%s4776_s28 + $0xdc] ss:$12 sps:$4 sm:$0xff]   ;;  %v4511_v57 = vld [vmem:[%s4776_s28 + $0xd8] ss:$12 sps:$4 sm:$0xff]   ;;  %v4513_v59 = vld [vmem:[%s4776_s28 + $0xf4] ss:$12 sps:$4 sm:$0xff]  }
  0x21   : > { %v4509_v56 = vld [vmem:[%s4776_s28 + $0x55c] ss:$12 sps:$4 sm:$0xff]   ;;  %v4512_v58 = vld [vmem:[%s4776_s28 + $0x558] ss:$12 sps:$4 sm:$0xff]   ;;  %v4515_v60 = vld [vmem:[%s4776_s28 + $0x574] ss:$12 sps:$4 sm:$0xff]  }
  0x22   : > { %v4517_v61 = vld [vmem:[%s4776_s28 + $0xf0] ss:$12 sps:$4 sm:$0xff]   ;;  %v4519_v63 = vld [vmem:[%s4776_s28 + $0x10c] ss:$12 sps:$4 sm:$0xff]   ;;  %v4524_v2 = vld [vmem:[%s4776_s28 + $0x588] ss:$12 sps:$4 sm:$0xff]  }
  0x23   : > { %1749 = vmatpush1.bf16.msra.mxu0 %v4440_v7  ;;  %4414 = vmatpush1.bf16.msra.mxu1 %v4440_v7  ;;  %v4518_v62 = vld [vmem:[%s4776_s28 + $0x570] ss:$12 sps:$4 sm:$0xff]   ;;  %v4521_v0 = vld [vmem:[%s4776_s28 + $0x58c] ss:$12 sps:$4 sm:$0xff]  }
  0x24   : > { %1750 = vmatprep.subr.bf16.mxu0 %v4718_v1  ;;  %4399 = vmatprep.subr.bf16.mxu1 %v4718_v1  ;;  %v4525_v3 = vld [vmem:[%s4776_s28 + $0x124] ss:$12 sps:$4 sm:$0xff]   ;;  %v4529_v5 = vld [vmem:[%s4776_s28 + $0x120] ss:$12 sps:$4 sm:$0xff]   ;;  %v4531_v7 = vld [vmem:[%s4776_s28 + $0x13c] ss:$12 sps:$4 sm:$0xff]  }
  0x25   : > { %v4527_v4 = vld [vmem:[%s4776_s28 + $0x5a4] ss:$12 sps:$4 sm:$0xff]   ;;  %v4530_v6 = vld [vmem:[%s4776_s28 + $0x5a0] ss:$12 sps:$4 sm:$0xff]   ;;  %v4533_v8 = vld [vmem:[%s4776_s28 + $0x5bc] ss:$12 sps:$4 sm:$0xff]  }
  0x27   : > { %1751 = vmatpush1.bf16.msra.mxu0 %v4441_v9  ;;  %4415 = vmatpush1.bf16.msra.mxu1 %v4441_v9  ;;  %v4535_v9 = vld [vmem:[%s4776_s28 + $0x138] ss:$12 sps:$4 sm:$0xff]  }
  0x28   : > { %1752 = vmatprep.subr.bf16.mxu0 %v4718_v1  ;;  %4400 = vmatprep.subr.bf16.mxu1 %v4718_v1 }
  0x2b   : > { %1753 = vmatpush1.bf16.msra.mxu0 %v4442_v10  ;;  %4416 = vmatpush1.bf16.msra.mxu1 %v4442_v10  ;;  %v4536_v10 = vld [vmem:[%s4776_s28 + $0x5b8] ss:$12 sps:$4 sm:$0xff]  }
  0x2c   : > { %1754 = vmatprep.subr.bf16.mxu0 %v4718_v1  ;;  %4401 = vmatprep.subr.bf16.mxu1 %v4718_v1 }
  0x2f   : > { %1755 = vmatpush1.bf16.msra.mxu0 %v4443_v11  ;;  %4417 = vmatpush1.bf16.msra.mxu1 %v4443_v11  ;;  %v4537_v11 = vld [vmem:[%s4776_s28 + $0x154] ss:$12 sps:$4 sm:$0xff]  }
  0x30   : > { %1756 = vmatprep.subr.bf16.mxu0 %v4718_v1  ;;  %4402 = vmatprep.subr.bf16.mxu1 %v4718_v1 }
  0x33   : > { %1757 = vmatpush1.bf16.msra.mxu0 %v4444_v12  ;;  %4418 = vmatpush1.bf16.msra.mxu1 %v4444_v12  ;;  %v4539_v12 = vld [vmem:[%s4776_s28 + $0x5d4] ss:$12 sps:$4 sm:$0xff]  }
  0x34   : > { %1758 = vmatprep.subr.bf16.mxu0 %v4718_v1  ;;  %4403 = vmatprep.subr.bf16.mxu1 %v4718_v1 }
  0x37   : > { %1759 = vmatpush1.bf16.msra.mxu0 %v4445_v13  ;;  %4419 = vmatpush1.bf16.msra.mxu1 %v4445_v13  ;;  %v4541_v13 = vld [vmem:[%s4776_s28 + $0x150] ss:$12 sps:$4 sm:$0xff]  }
  0x38   : > { %1760 = vmatprep.subr.bf16.mxu0 %v4718_v1  ;;  %4404 = vmatprep.subr.bf16.mxu1 %v4718_v1 }
  0x3b   : > { %1761 = vmatpush1.bf16.msra.mxu0 %v4446_v14  ;;  %4420 = vmatpush1.bf16.msra.mxu1 %v4446_v14  ;;  %v4542_v14 = vld [vmem:[%s4776_s28 + $0x5d0] ss:$12 sps:$4 sm:$0xff]  }
  0x3c   : > { %1762 = vmatprep.subr.bf16.mxu0 %v4718_v1  ;;  %4405 = vmatprep.subr.bf16.mxu1 %v4718_v1 }
  0x3f   : > { %1763 = vmatpush1.bf16.msra.mxu0 %v4447_v15  ;;  %4421 = vmatpush1.bf16.msra.mxu1 %v4447_v15  ;;  %v4543_v15 = vld [vmem:[%s4776_s28 + $0x16c] ss:$12 sps:$4 sm:$0xff]  }
  0x40   : > { %1764 = vmatprep.subr.bf16.mxu0 %v4718_v1  ;;  %4406 = vmatprep.subr.bf16.mxu1 %v4718_v1 }
  0x43   : > { %1765 = vmatpush1.bf16.msra.mxu0 %v4448_v16  ;;  %4422 = vmatpush1.bf16.msra.mxu1 %v4448_v16  ;;  %v4545_v16 = vld [vmem:[%s4776_s28 + $0x5ec] ss:$12 sps:$4 sm:$0xff]  }
  0x44   : > { %1766 = vmatprep.subr.bf16.mxu0 %v4718_v1  ;;  %4407 = vmatprep.subr.bf16.mxu1 %v4718_v1 }
  0x47   : > { %1767 = vmatpush1.bf16.msra.mxu0 %v4449_v17  ;;  %4423 = vmatpush1.bf16.msra.mxu1 %v4449_v17  ;;  %v4547_v17 = vld [vmem:[%s4776_s28 + $0x168] ss:$12 sps:$4 sm:$0xff]  }
  0x48   : > { %1768 = vmatprep.subr.bf16.mxu0 %v4718_v1  ;;  %4408 = vmatprep.subr.bf16.mxu1 %v4718_v1  ;;  %v4523_v1 = vld [vmem:[%s4776_s28 + $0x108] ss:$12 sps:$4 sm:$0xff]  }
  0x4b   : > { %1769 = vmatpush1.bf16.msra.mxu0 %v4450_v18  ;;  %4424 = vmatpush1.bf16.msra.mxu1 %v4450_v18  ;;  %v4548_v18 = vld [vmem:[%s4776_s28 + $0x5e8] ss:$12 sps:$4 sm:$0xff]  }
  0x4c   : > { %4261 = vmatprep.subr.bf16.mxu1 %v4457_v19 }
  0x4e   : > { %1771 = vmatmul.mubr.bf16.vlgmr.msra.gmra.mrb[0].mxu0 %v4451_v20  ;;  %2155 = vmatmul.mubr.bf16.vlgmr.msra.gmra.mrb[0].mxu1 %v4454_v21  ;;  %v4551_v20 = vld [vmem:[%s4776_s28 + $0x8] ss:$12 sps:$4 sm:$0xff]   ;;  %v4552_v21 = vld [vmem:[%s4776_s28 + $0x180] ss:$12 sps:$4 sm:$0xff]  }
  0x4f   : > { %4262 = vmatpush3.bf16.msra.mxu1 %v4457_v19  ;;  %1778 = vmatprep.mubr.bf16.mxu0 %v4458_v22  ;;  %v4549_v19 = vld [vmem:[%s4776_s28 + $0x184] ss:$12 sps:$4 sm:$0xff]   ;;  %v4553_v22 = vld [vmem:[%s4776_s28 + $0x20] ss:$12 sps:$4 sm:$0xff]  }
  0x50   : > { %2162 = vmatprep.mubr.bf16.mxu1 %v4460_v23  ;;  %4263 = vmatprep.subr.bf16.mxu1 %v4506_v24  ;;  %v4554_v23 = vld [vmem:[%s4776_s28 + $0x19c] ss:$12 sps:$4 sm:$0xff]  }
  0x53   : > { %4264 = vmatpush3.bf16.msra.mxu1 %v4506_v24  ;;  %v4556_v24 = vld [vmem:[%s4776_s28 + $0x38] ss:$12 sps:$4 sm:$0xff]  }
  0x56   : > { %1779 = vmatmul.mubr.bf16.gmra.mrb[4].mxu0 %v4462_v25  ;;  %2163 = vmatmul.mubr.bf16.gmra.mrb[4].mxu1 %v4463_v26  ;;  %v4557_v25 = vld [vmem:[%s4776_s28 + $0x198] ss:$12 sps:$4 sm:$0xff]   ;;  %v4558_v26 = vld [vmem:[%s4776_s28 + $0x50] ss:$12 sps:$4 sm:$0xff]  }
  0x57   : > { %1786 = vmatprep.mubr.bf16.mxu0 %v4464_v27  ;;  %2170 = vmatprep.mubr.bf16.mxu1 %v4466_v28  ;;  %v4559_v27 = vld [vmem:[%s4776_s28 + $0x1b4] ss:$12 sps:$4 sm:$0xff]  }
  0x58   : > { %v4561_v28 = vld [vmem:[%s4776_s28 + $0x68] ss:$12 sps:$4 sm:$0xff]  }
  0x5e   : > { %1787 = vmatmul.mubr.bf16.gmra.mrb[8].mxu0 %v4468_v29  ;;  %2171 = vmatmul.mubr.bf16.gmra.mrb[8].mxu1 %v4469_v30  ;;  %v4562_v29 = vld [vmem:[%s4776_s28 + $0x1b0] ss:$12 sps:$4 sm:$0xff]   ;;  %v4563_v30 = vld [vmem:[%s4776_s28 + $0x80] ss:$12 sps:$4 sm:$0xff]  }
  0x5f   : > { %1794 = vmatprep.mubr.bf16.mxu0 %v4470_v31  ;;  %2178 = vmatprep.mubr.bf16.mxu1 %v4472_v32  ;;  %v4564_v31 = vld [vmem:[%s4776_s28 + $0x1cc] ss:$12 sps:$4 sm:$0xff]  }
  0x60   : > { %v4566_v32 = vld [vmem:[%s4776_s28 + $0x98] ss:$12 sps:$4 sm:$0xff]  }
  0x66   : > { %1795 = vmatmul.mubr.bf16.gmra.mrb[12].mxu0 %v4474_v33  ;;  %2179 = vmatmul.mubr.bf16.gmra.mrb[12].mxu1 %v4475_v34  ;;  %v4567_v33 = vld [vmem:[%s4776_s28 + $0x1c8] ss:$12 sps:$4 sm:$0xff]   ;;  %v4568_v34 = vld [vmem:[%s4776_s28 + $0xb0] ss:$12 sps:$4 sm:$0xff]  }
  0x67   : > { %1802 = vmatprep.mubr.bf16.mxu0 %v4476_v35  ;;  %2186 = vmatprep.mubr.bf16.mxu1 %v4478_v36  ;;  %v4569_v35 = vld [vmem:[%s4776_s28 + $0x1e4] ss:$12 sps:$4 sm:$0xff]   ;;  %v4571_v36 = vld [vmem:[%s4776_s28 + $0xc8] ss:$12 sps:$4 sm:$0xff]  }
  0x6e   : > { %1803 = vmatmul.mubr.bf16.gmra.mrb[16].mxu0 %v4480_v37  ;;  %2187 = vmatmul.mubr.bf16.gmra.mrb[16].mxu1 %v4481_v38  ;;  %v4572_v37 = vld [vmem:[%s4776_s28 + $0x1e0] ss:$12 sps:$4 sm:$0xff]  }
  0x6f   : > { %1810 = vmatprep.mubr.bf16.mxu0 %v4482_v39  ;;  %2194 = vmatprep.mubr.bf16.mxu1 %v4484_v40  ;;  %v4573_v38 = vld [vmem:[%s4776_s28 + $0xe0] ss:$12 sps:$4 sm:$0xff]   ;;  %v4574_v39 = vld [vmem:[%s4776_s28 + $0x1fc] ss:$12 sps:$4 sm:$0xff]   ;;  %v4576_v40 = vld [vmem:[%s4776_s28 + $0xf8] ss:$12 sps:$4 sm:$0xff]  }
  0x76   : > { %1811 = vmatmul.mubr.bf16.gmra.mrb[20].mxu0 %v4486_v41  ;;  %2195 = vmatmul.mubr.bf16.gmra.mrb[20].mxu1 %v4487_v42  ;;  %v4577_v41 = vld [vmem:[%s4776_s28 + $0x1f8] ss:$12 sps:$4 sm:$0xff]   ;;  %v4578_v42 = vld [vmem:[%s4776_s28 + $0x110] ss:$12 sps:$4 sm:$0xff]  }
  0x77   : > { %1818 = vmatprep.mubr.bf16.mxu0 %v4488_v43  ;;  %2202 = vmatprep.mubr.bf16.mxu1 %v4490_v44  ;;  %v4579_v43 = vld [vmem:[%s4776_s28 + $0x214] ss:$12 sps:$4 sm:$0xff]  }
  0x78   : > { %v4581_v44 = vld [vmem:[%s4776_s28 + $0x128] ss:$12 sps:$4 sm:$0xff]  }
  0x7e   : > { %1819 = vmatmul.mubr.bf16.gmra.mrb[24].mxu0 %v4492_v45  ;;  %2203 = vmatmul.mubr.bf16.gmra.mrb[24].mxu1 %v4493_v46  ;;  %v4582_v45 = vld [vmem:[%s4776_s28 + $0x210] ss:$12 sps:$4 sm:$0xff]   ;;  %v4583_v46 = vld [vmem:[%s4776_s28 + $0x140] ss:$12 sps:$4 sm:$0xff]  }
  0x7f   : > { %1826 = vmatprep.mubr.bf16.mxu0 %v4494_v47  ;;  %2210 = vmatprep.mubr.bf16.mxu1 %v4496_v48  ;;  %v4584_v47 = vld [vmem:[%s4776_s28 + $0x22c] ss:$12 sps:$4 sm:$0xff]  }
  0x80   : > { %v4586_v48 = vld [vmem:[%s4776_s28 + $0x158] ss:$12 sps:$4 sm:$0xff]  }
  0x86   : > { %1827 = vmatmul.mubr.bf16.gmra.mrb[28].mxu0 %v4498_v49  ;;  %2211 = vmatmul.mubr.bf16.gmra.mrb[28].mxu1 %v4499_v50  ;;  %v4587_v49 = vld [vmem:[%s4776_s28 + $0x228] ss:$12 sps:$4 sm:$0xff]   ;;  %v4588_v50 = vld [vmem:[%s4776_s28 + $0x170] ss:$12 sps:$4 sm:$0xff]  }
  0x87   : > { %1834 = vmatprep.mubr.bf16.mxu0 %v4500_v51  ;;  %2218 = vmatprep.mubr.bf16.mxu1 %v4502_v52  ;;  %v4589_v51 = vld [vmem:[%s4776_s28 + $0x244] ss:$12 sps:$4 sm:$0xff]   ;;  %v4591_v52 = vld [vmem:[%s4776_s28 + $0x188] ss:$12 sps:$4 sm:$0xff]  }
  0x8e   : > { %1835 = vmatmul.mubr.bf16.gmra.mrb[32].mxu0 %v4504_v53  ;;  %2219 = vmatmul.mubr.bf16.gmra.mrb[32].mxu1 %v4505_v54  ;;  %v4592_v53 = vld [vmem:[%s4776_s28 + $0x240] ss:$12 sps:$4 sm:$0xff]  }
  0x8f   : > { %1842 = vmatprep.mubr.bf16.mxu0 %v4507_v55  ;;  %2226 = vmatprep.mubr.bf16.mxu1 %v4509_v56  ;;  %v4593_v54 = vld [vmem:[%s4776_s28 + $0x1a0] ss:$12 sps:$4 sm:$0xff]   ;;  %v4594_v55 = vld [vmem:[%s4776_s28 + $0x25c] ss:$12 sps:$4 sm:$0xff]   ;;  %v4596_v56 = vld [vmem:[%s4776_s28 + $0x1b8] ss:$12 sps:$4 sm:$0xff]  }
  0x96   : > { %1843 = vmatmul.mubr.bf16.gmra.mrb[36].mxu0 %v4511_v57  ;;  %2227 = vmatmul.mubr.bf16.gmra.mrb[36].mxu1 %v4512_v58  ;;  %v4597_v57 = vld [vmem:[%s4776_s28 + $0x258] ss:$12 sps:$4 sm:$0xff]   ;;  %v4598_v58 = vld [vmem:[%s4776_s28 + $0x1d0] ss:$12 sps:$4 sm:$0xff]  }
  0x97   : > { %1850 = vmatprep.mubr.bf16.mxu0 %v4513_v59  ;;  %2234 = vmatprep.mubr.bf16.mxu1 %v4515_v60  ;;  %v4599_v59 = vld [vmem:[%s4776_s28 + $0x274] ss:$12 sps:$4 sm:$0xff]  }
  0x98   : > { %v4601_v60 = vld [vmem:[%s4776_s28 + $0x1e8] ss:$12 sps:$4 sm:$0xff]  }
  0x9e   : > { %1851 = vmatmul.mubr.bf16.gmra.mrb[40].mxu0 %v4517_v61  ;;  %2235 = vmatmul.mubr.bf16.gmra.mrb[40].mxu1 %v4518_v62  ;;  %v4602_v61 = vld [vmem:[%s4776_s28 + $0x270] ss:$12 sps:$4 sm:$0xff]   ;;  %v4603_v62 = vld [vmem:[%s4776_s28 + $0x200] ss:$12 sps:$4 sm:$0xff]  }
  0x9f   : > { %1858 = vmatprep.mubr.bf16.mxu0 %v4519_v63  ;;  %2242 = vmatprep.mubr.bf16.mxu1 %v4521_v0  ;;  %v4604_v63 = vld [vmem:[%s4776_s28 + $0x28c] ss:$12 sps:$4 sm:$0xff]  }
  0xa0   : > { %v4606_v0 = vld [vmem:[%s4776_s28 + $0x218] ss:$12 sps:$4 sm:$0xff]  }
  0xa6   : > { %1859 = vmatmul.mubr.bf16.gmra.mrb[44].mxu0 %v4523_v1  ;;  %2243 = vmatmul.mubr.bf16.gmra.mrb[44].mxu1 %v4524_v2 }
  0xa7   : > { %1866 = vmatprep.mubr.bf16.mxu0 %v4525_v3  ;;  %2250 = vmatprep.mubr.bf16.mxu1 %v4527_v4 }
  0xae   : > { %1867 = vmatmul.mubr.bf16.gmra.mrb[48].mxu0 %v4529_v5  ;;  %2251 = vmatmul.mubr.bf16.gmra.mrb[48].mxu1 %v4530_v6  ;;  %v4607_v5 = vld [vmem:[%s4776_s28 + $0x288] ss:$12 sps:$4 sm:$0xff]   ;;  %v4608_v6 = vld [vmem:[%s4776_s28 + $0x230] ss:$12 sps:$4 sm:$0xff]  }
  0xaf   : > { %1874 = vmatprep.mubr.bf16.mxu0 %v4531_v7  ;;  %2258 = vmatprep.mubr.bf16.mxu1 %v4533_v8 }
  0xb6   : > { %1875 = vmatmul.mubr.bf16.gmra.mrb[52].mxu0 %v4535_v9  ;;  %2259 = vmatmul.mubr.bf16.gmra.mrb[52].mxu1 %v4536_v10  ;;  %v4609_v9 = vld [vmem:[%s4776_s28 + $0x2a4] ss:$12 sps:$4 sm:$0xff]   ;;  %v4611_v10 = vld [vmem:[%s4776_s28 + $0x248] ss:$12 sps:$4 sm:$0xff]  }
  0xb7   : > { %1882 = vmatprep.mubr.bf16.mxu0 %v4537_v11  ;;  %2266 = vmatprep.mubr.bf16.mxu1 %v4539_v12 }
  0xbe   : > { %1883 = vmatmul.mubr.bf16.gmra.mrb[56].mxu0 %v4541_v13  ;;  %2267 = vmatmul.mubr.bf16.gmra.mrb[56].mxu1 %v4542_v14 }
  0xbf   : > { %1890 = vmatprep.mubr.bf16.mxu0 %v4543_v15  ;;  %2274 = vmatprep.mubr.bf16.mxu1 %v4545_v16 }
  0xc6   : > { %1891 = vmatmul.mubr.bf16.gmra.mrb[60].mxu0 %v4547_v17  ;;  %2275 = vmatmul.mubr.bf16.gmra.mrb[60].mxu1 %v4548_v18  ;;  %v4612_v17 = vld [vmem:[%s4776_s28 + $0x2a0] ss:$12 sps:$4 sm:$0xff]  }
  0xc7   : > { %1898 = vmatprep.mubr.bf16.mxu0 %v4549_v19  ;;  %4265 = vmatprep.mubr.msk.bf16.mxu1 %vm1545_vm0, %v4551_v20  ;;  %v4613_v18 = vld [vmem:[%s4776_s28 + $0x260] ss:$12 sps:$4 sm:$0xff]  }
  0xce   : > { %1899 = vmatmul.mubr.bf16.gmra.mrb[64].mxu0 %v4552_v21  ;;  %4266 = vmatmul.mubr.msk.bf16.vlgmr.msra.gmra.mrb[64].mxu1 %vm1545_vm0, %v4553_v22  ;;  %v4614_v21 = vld [vmem:[%s4776_s28 + $0x2bc] ss:$12 sps:$4 sm:$0xff]   ;;  %v4616_v22 = vld [vmem:[%s4776_s28 + $0x278] ss:$12 sps:$4 sm:$0xff]  }
  0xcf   : > { %1906 = vmatprep.mubr.bf16.mxu0 %v4554_v23  ;;  %4269 = vmatprep.mubr.msk.bf16.mxu1 %vm1545_vm0, %v4556_v24 }
  0xd6   : > { %1907 = vmatmul.mubr.bf16.gmra.mrb[68].mxu0 %v4557_v25  ;;  %4270 = vmatmul.mubr.msk.bf16.gmra.mrb[68].mxu1 %vm1545_vm0, %v4558_v26 }
  0xd7   : > { %1914 = vmatprep.mubr.bf16.mxu0 %v4559_v27  ;;  %4273 = vmatprep.mubr.msk.bf16.mxu1 %vm1545_vm0, %v4561_v28 }
  0xde   : > { %1915 = vmatmul.mubr.bf16.gmra.mrb[72].mxu0 %v4562_v29  ;;  %4274 = vmatmul.mubr.msk.bf16.gmra.mrb[72].mxu1 %vm1545_vm0, %v4563_v30  ;;  %v4617_v29 = vld [vmem:[%s4776_s28 + $0x2b8] ss:$12 sps:$4 sm:$0xff]   ;;  %v4618_v30 = vld [vmem:[%s4776_s28 + $0x290] ss:$12 sps:$4 sm:$0xff]  }
  0xdf   : > { %1922 = vmatprep.mubr.bf16.mxu0 %v4564_v31  ;;  %4277 = vmatprep.mubr.msk.bf16.mxu1 %vm1545_vm0, %v4566_v32 }
  0xe6   : > { %1923 = vmatmul.mubr.bf16.gmra.mrb[76].mxu0 %v4567_v33  ;;  %4278 = vmatmul.mubr.msk.bf16.gmra.mrb[76].mxu1 %vm1545_vm0, %v4568_v34  ;;  %v4619_v33 = vld [vmem:[%s4776_s28 + $0x2d4] ss:$12 sps:$4 sm:$0xff]  }
  0xe7   : > { %1930 = vmatprep.mubr.bf16.mxu0 %v4569_v35  ;;  %4281 = vmatprep.mubr.msk.bf16.mxu1 %vm1545_vm0, %v4571_v36  ;;  %v4621_v34 = vld [vmem:[%s4776_s28 + $0x2a8] ss:$12 sps:$4 sm:$0xff]  }
  0xee   : > { %1931 = vmatmul.mubr.bf16.gmra.mrb[80].mxu0 %v4572_v37  ;;  %4282 = vmatmul.mubr.msk.bf16.gmra.mrb[80].mxu1 %vm1545_vm0, %v4573_v38 }
  0xef   : > { %1938 = vmatprep.mubr.bf16.mxu0 %v4574_v39  ;;  %4285 = vmatprep.mubr.msk.bf16.mxu1 %vm1545_vm0, %v4576_v40 }
  0xf6   : > { %1939 = vmatmul.mubr.bf16.gmra.mrb[84].mxu0 %v4577_v41  ;;  %4286 = vmatmul.mubr.msk.bf16.gmra.mrb[84].mxu1 %vm1545_vm0, %v4578_v42  ;;  %v4622_v41 = vld [vmem:[%s4776_s28 + $0x2d0] ss:$12 sps:$4 sm:$0xff]   ;;  %v4623_v42 = vld [vmem:[%s4776_s28 + $0x2c0] ss:$12 sps:$4 sm:$0xff]  }
  0xf7   : > { %1946 = vmatprep.mubr.bf16.mxu0 %v4579_v43  ;;  %4289 = vmatprep.mubr.msk.bf16.mxu1 %vm1545_vm0, %v4581_v44 }
  0xfe   : > { %1947 = vmatmul.mubr.bf16.gmra.mrb[88].mxu0 %v4582_v45  ;;  %4290 = vmatmul.mubr.msk.bf16.gmra.mrb[88].mxu1 %vm1545_vm0, %v4583_v46  ;;  %v4624_v45 = vld [vmem:[%s4776_s28 + $0x2ec] ss:$12 sps:$4 sm:$0xff]  }
  0xff   : > { %1954 = vmatprep.mubr.bf16.mxu0 %v4584_v47  ;;  %4293 = vmatprep.mubr.msk.bf16.mxu1 %vm1545_vm0, %v4586_v48  ;;  %v4626_v46 = vld [vmem:[%s4776_s28 + $0x2d8] ss:$12 sps:$4 sm:$0xff]  }
 0x106   : > { %1955 = vmatmul.mubr.bf16.gmra.mrb[92].mxu0 %v4587_v49  ;;  %4294 = vmatmul.mubr.msk.bf16.gmra.mrb[92].mxu1 %vm1545_vm0, %v4588_v50 }
 0x107   : > { %1962 = vmatprep.mubr.bf16.mxu0 %v4589_v51  ;;  %4297 = vmatprep.mubr.msk.bf16.mxu1 %vm1545_vm0, %v4591_v52 }
 0x10e   : > { %1963 = vmatmul.mubr.bf16.gmra.mrb[96].mxu0 %v4592_v53  ;;  %4298 = vmatmul.mubr.msk.bf16.gmra.mrb[96].mxu1 %vm1545_vm0, %v4593_v54  ;;  %v4627_v53 = vld [vmem:[%s4776_s28 + $0x2e8] ss:$12 sps:$4 sm:$0xff]   ;;  %v4628_v54 = vld [vmem:[%s4776_s28 + $0x2f0] ss:$12 sps:$4 sm:$0xff]  }
 0x10f   : > { %1970 = vmatprep.mubr.bf16.mxu0 %v4594_v55  ;;  %4301 = vmatprep.mubr.msk.bf16.mxu1 %vm1545_vm0, %v4596_v56 }
 0x116   : > { %1971 = vmatmul.mubr.bf16.gmra.mrb[100].mxu0 %v4597_v57  ;;  %4302 = vmatmul.mubr.msk.bf16.gmra.mrb[100].mxu1 %vm1545_vm0, %v4598_v58  ;;  %v4629_v57 = vld [vmem:[%s4776_s28 + $0x304] ss:$12 sps:$4 sm:$0xff]   ;;  %v4631_v58 = vld [vmem:[%s4776_s28 + $0x308] ss:$12 sps:$4 sm:$0xff]  }
 0x117   : > { %1978 = vmatprep.mubr.bf16.mxu0 %v4599_v59  ;;  %4305 = vmatprep.mubr.msk.bf16.mxu1 %vm1545_vm0, %v4601_v60 }
 0x11e   : > { %1979 = vmatmul.mubr.bf16.gmra.mrb[104].mxu0 %v4602_v61  ;;  %4306 = vmatmul.mubr.msk.bf16.gmra.mrb[104].mxu1 %vm1545_vm0, %v4603_v62 }
 0x11f   : > { %1986 = vmatprep.mubr.bf16.mxu0 %v4604_v63  ;;  %4309 = vmatprep.mubr.msk.bf16.mxu1 %vm1545_vm0, %v4606_v0 }
 0x121   : > { %v4974_v1 = vpop.f32.mrb[0].mxu0  ;;  %v4976_v2 = vpop.f32.mrb[0].mxu1 }
 0x122   : > { %v1774_v3 = vpop.f32.mrb[1].mxu0  ;;  %v2158_v4 = vpop.f32.mrb[1].mxu1 }
 0x123   : > { %v4980_v7 = vpop.f32.mrb[2].mxu0  ;;  %v4982_v8 = vpop.f32.mrb[2].mxu1  ;;  %v4632_v3 = vld [vmem:[%s4776_s28 + $0x300] ss:$12 sps:$4 sm:$0xff]  }
 0x124   : > { %v1777_v11 = vpop.f32.mrb[3].mxu0  ;;  %v2161_v12 = vpop.f32.mrb[3].mxu1  ;;  %v4633_v4 = vld [vmem:[%s4776_s28 + $0x320] ss:$12 sps:$4 sm:$0xff]  }
 0x126   : > { %1987 = vmatmul.mubr.bf16.gmra.mrb[108].mxu0 %v4607_v5  ;;  %4310 = vmatmul.mubr.msk.bf16.gmra.mrb[108].mxu1 %vm1545_vm0, %v4608_v6 }
 0x127   : > { %1994 = vmatprep.mubr.bf16.mxu0 %v4609_v9  ;;  %4313 = vmatprep.mubr.msk.bf16.mxu1 %vm1545_vm0, %v4611_v10  ;;  %v4634_v9 = vld [vmem:[%s4776_s28 + $0x31c] ss:$12 sps:$4 sm:$0xff]   ;;  %v4636_v10 = vld [vmem:[%s4776_s28 + $0x338] ss:$12 sps:$4 sm:$0xff]  }
 0x129   : > { %v4988_v13 = vpop.f32.mrb[4].mxu0  ;;  %v4990_v14 = vpop.f32.mrb[4].mxu1 }
 0x12a   : > { %v1782_v15 = vpop.f32.mrb[5].mxu0  ;;  %v2166_v16 = vpop.f32.mrb[5].mxu1 }
 0x12b   : > { %v4994_v19 = vpop.f32.mrb[6].mxu0  ;;  %v4996_v20 = vpop.f32.mrb[6].mxu1 }
 0x12c   : > { %v1785_v23 = vpop.f32.mrb[7].mxu0  ;;  %v2169_v24 = vpop.f32.mrb[7].mxu1 }
 0x12e   : > { %1995 = vmatmul.mubr.bf16.gmra.mrb[112].mxu0 %v4612_v17  ;;  %4314 = vmatmul.mubr.msk.bf16.gmra.mrb[112].mxu1 %vm1545_vm0, %v4613_v18 }
 0x12f   : > { %2002 = vmatprep.mubr.bf16.mxu0 %v4614_v21  ;;  %4317 = vmatprep.mubr.msk.bf16.mxu1 %vm1545_vm0, %v4616_v22  ;;  %v4637_v21 = vld [vmem:[%s4776_s28 + $0x318] ss:$12 sps:$4 sm:$0xff]   ;;  %v4638_v22 = vld [vmem:[%s4776_s28 + $0x350] ss:$12 sps:$4 sm:$0xff]  }
 0x131   : > { %v5002_v25 = vpop.f32.mrb[8].mxu0  ;;  %v5004_v26 = vpop.f32.mrb[8].mxu1 }
 0x132   : > { %v1790_v27 = vpop.f32.mrb[9].mxu0  ;;  %v2174_v28 = vpop.f32.mrb[9].mxu1 }
 0x133   : > { %v5008_v31 = vpop.f32.mrb[10].mxu0  ;;  %v5010_v32 = vpop.f32.mrb[10].mxu1  ;;  %v4639_v27 = vld [vmem:[%s4776_s28 + $0x334] ss:$12 sps:$4 sm:$0xff]  }
 0x134   : > { %v1793_v35 = vpop.f32.mrb[11].mxu0  ;;  %v2177_v36 = vpop.f32.mrb[11].mxu1  ;;  %v4641_v28 = vld [vmem:[%s4776_s28 + $0x368] ss:$12 sps:$4 sm:$0xff]  }
 0x136   : > { %2003 = vmatmul.mubr.bf16.gmra.mrb[116].mxu0 %v4617_v29  ;;  %4318 = vmatmul.mubr.msk.bf16.gmra.mrb[116].mxu1 %vm1545_vm0, %v4618_v30 }
 0x137   : > { %2010 = vmatprep.mubr.bf16.mxu0 %v4619_v33  ;;  %4321 = vmatprep.mubr.msk.bf16.mxu1 %vm1545_vm0, %v4621_v34 }
 0x139   : > { %v5016_v37 = vpop.f32.mrb[12].mxu0  ;;  %v5018_v38 = vpop.f32.mrb[12].mxu1 }
 0x13a   : > { %v1798_v39 = vpop.f32.mrb[13].mxu0  ;;  %v2182_v40 = vpop.f32.mrb[13].mxu1 }
 0x13b   : > { %v5022_v43 = vpop.f32.mrb[14].mxu0  ;;  %v5024_v44 = vpop.f32.mrb[14].mxu1  ;;  %v4642_v39 = vld [vmem:[%s4776_s28 + $0x330] ss:$12 sps:$4 sm:$0xff]   ;;  %v4643_v40 = vld [vmem:[%s4776_s28 + $0x380] ss:$12 sps:$4 sm:$0xff]  }
 0x13c   : > { %v1801_v47 = vpop.f32.mrb[15].mxu0  ;;  %v2185_v48 = vpop.f32.mrb[15].mxu1 }
 0x13e   : > { %2011 = vmatmul.mubr.bf16.gmra.mrb[120].mxu0 %v4622_v41  ;;  %4322 = vmatmul.mubr.msk.bf16.gmra.mrb[120].mxu1 %vm1545_vm0, %v4623_v42 }
 0x13f   : > { %2018 = vmatprep.mubr.bf16.mxu0 %v4624_v45  ;;  %4325 = vmatprep.mubr.msk.bf16.mxu1 %vm1545_vm0, %v4626_v46  ;;  %v4644_v45 = vld [vmem:[%s4776_s28 + $0x34c] ss:$12 sps:$4 sm:$0xff]  }
 0x140   : > { %v4646_v46 = vld [vmem:[%s4776_s28 + $0x398] ss:$12 sps:$4 sm:$0xff]  }
 0x141   : > { %v5030_v49 = vpop.f32.mrb[16].mxu0  ;;  %v5032_v50 = vpop.f32.mrb[16].mxu1 }
 0x142   : > { %v1806_v51 = vpop.f32.mrb[17].mxu0  ;;  %v2190_v52 = vpop.f32.mrb[17].mxu1 }
 0x143   : > { %v5036_v55 = vpop.f32.mrb[18].mxu0  ;;  %v5038_v56 = vpop.f32.mrb[18].mxu1 }
 0x144   : > { %v1809_v59 = vpop.f32.mrb[19].mxu0  ;;  %v2193_v60 = vpop.f32.mrb[19].mxu1 }
 0x146   : > { %2019 = vmatmul.mubr.bf16.gmra.mrb[124].mxu0 %v4627_v53  ;;  %4326 = vmatmul.mubr.msk.bf16.gmra.mrb[124].mxu1 %vm1545_vm0, %v4628_v54 }
 0x147   : > { %2026 = vmatprep.mubr.bf16.mxu0 %v4629_v57  ;;  %4329 = vmatprep.mubr.msk.bf16.mxu1 %vm1545_vm0, %v4631_v58  ;;  %v4647_v57 = vld [vmem:[%s4776_s28 + $0x348] ss:$12 sps:$4 sm:$0xff]   ;;  %v4648_v58 = vld [vmem:[%s4776_s28 + $0x3b0] ss:$12 sps:$4 sm:$0xff]  }
 0x149   : > { %v5044_v61 = vpop.f32.mrb[20].mxu0  ;;  %v5046_v62 = vpop.f32.mrb[20].mxu1 }
 0x14a   : > { %v1814_v63 = vpop.f32.mrb[21].mxu0  ;;  %v2198_v0 = vpop.f32.mrb[21].mxu1 }
 0x14b   : > { %v5050_v5 = vpop.f32.mrb[22].mxu0  ;;  %v5052_v6 = vpop.f32.mrb[22].mxu1  ;;  %v4649_v63 = vld [vmem:[%s4776_s28 + $0x364] ss:$12 sps:$4 sm:$0xff]   ;;  %v4651_v0 = vld [vmem:[%s4776_s28 + $0x3c8] ss:$12 sps:$4 sm:$0xff]  }
 0x14c   : > { %v1817_v11 = vpop.f32.mrb[23].mxu0  ;;  %v2201_v12 = vpop.f32.mrb[23].mxu1 }
 0x14e   : > { %2027 = vmatmul.mubr.bf16.gmra.mrb[128].mxu0 %v4632_v3  ;;  %4330 = vmatmul.mubr.msk.bf16.gmra.mrb[128].mxu1 %vm1545_vm0, %v4633_v4 }
 0x14f   : > { %2034 = vmatprep.mubr.bf16.mxu0 %v4634_v9  ;;  %4333 = vmatprep.mubr.msk.bf16.mxu1 %vm1545_vm0, %v4636_v10 }
 0x151   : > { %v5058_v15 = vpop.f32.mrb[24].mxu0  ;;  %v5060_v16 = vpop.f32.mrb[24].mxu1 }
 0x152   : > { %5819 = vst [vmem:[#allocation2_spill] sm:$0xff] %v5060_v16  ;;  %v1822_v17 = vpop.f32.mrb[25].mxu0  ;;  %v2206_v18 = vpop.f32.mrb[25].mxu1 }
 0x153   : > { %v5064_v23 = vpop.f32.mrb[26].mxu0  ;;  %v5066_v24 = vpop.f32.mrb[26].mxu1  ;;  %v4652_v17 = vld [vmem:[%s4776_s28 + $0x360] ss:$12 sps:$4 sm:$0xff]  }
 0x154   : > { %5820 = vst [vmem:[#allocation3_spill] sm:$0xff] %v5066_v24  ;;  %v1825_v29 = vpop.f32.mrb[27].mxu0  ;;  %v2209_v30 = vpop.f32.mrb[27].mxu1  ;;  %v4653_v18 = vld [vmem:[%s4776_s28 + $0x3e0] ss:$12 sps:$4 sm:$0xff]  }
 0x156   : > { %2035 = vmatmul.mubr.bf16.gmra.mrb[132].mxu0 %v4637_v21  ;;  %4334 = vmatmul.mubr.msk.bf16.gmra.mrb[132].mxu1 %vm1545_vm0, %v4638_v22 }
 0x157   : > { %2042 = vmatprep.mubr.bf16.mxu0 %v4639_v27  ;;  %4337 = vmatprep.mubr.msk.bf16.mxu1 %vm1545_vm0, %v4641_v28  ;;  %v4654_v27 = vld [vmem:[%s4776_s28 + $0x37c] ss:$12 sps:$4 sm:$0xff]   ;;  %v4656_v28 = vld [vmem:[%s4776_s28 + $0x3f8] ss:$12 sps:$4 sm:$0xff]  }
 0x159   : > { %v5072_v33 = vpop.f32.mrb[28].mxu0  ;;  %v5074_v34 = vpop.f32.mrb[28].mxu1 }
 0x15a   : > { %v1830_v35 = vpop.f32.mrb[29].mxu0  ;;  %v2214_v36 = vpop.f32.mrb[29].mxu1 }
 0x15b   : > { %v5078_v41 = vpop.f32.mrb[30].mxu0  ;;  %v5080_v42 = vpop.f32.mrb[30].mxu1 }
 0x15c   : > { %5821 = vst [vmem:[#allocation4_spill] sm:$0xff] %v5080_v42  ;;  %v1833_v47 = vpop.f32.mrb[31].mxu0  ;;  %v2217_v48 = vpop.f32.mrb[31].mxu1 }
 0x15e   : > { %2043 = vmatmul.mubr.bf16.gmra.mrb[136].mxu0 %v4642_v39  ;;  %4338 = vmatmul.mubr.msk.bf16.gmra.mrb[136].mxu1 %vm1545_vm0, %v4643_v40 }
 0x15f   : > { %2050 = vmatprep.mubr.bf16.mxu0 %v4644_v45  ;;  %4341 = vmatprep.mubr.msk.bf16.mxu1 %vm1545_vm0, %v4646_v46  ;;  %v4657_v45 = vld [vmem:[%s4776_s28 + $0x378] ss:$12 sps:$4 sm:$0xff]   ;;  %v4658_v46 = vld [vmem:[%s4776_s28 + $0x410] ss:$12 sps:$4 sm:$0xff]  }
 0x161   : > { %v5086_v51 = vpop.f32.mrb[32].mxu0  ;;  %v5088_v52 = vpop.f32.mrb[32].mxu1 }
 0x162   : > { %5822 = vst [vmem:[#allocation5_spill] sm:$0xff] %v5088_v52  ;;  %v1838_v53 = vpop.f32.mrb[33].mxu0  ;;  %v2222_v54 = vpop.f32.mrb[33].mxu1  ;;  %v4691_v52 = vld [vmem:[%s4776_s28 + $0x548] ss:$12 sps:$4 sm:$0xff]  }
 0x163   : > { %v5092_v59 = vpop.f32.mrb[34].mxu0  ;;  %v5094_v60 = vpop.f32.mrb[34].mxu1  ;;  %v4659_v53 = vld [vmem:[%s4776_s28 + $0x394] ss:$12 sps:$4 sm:$0xff]  }
 0x164   : > { %5823 = vst [vmem:[#allocation6_spill] sm:$0xff] %v5094_v60  ;;  %v1841_v3 = vpop.f32.mrb[35].mxu0  ;;  %v2225_v4 = vpop.f32.mrb[35].mxu1  ;;  %v4661_v54 = vld [vmem:[%s4776_s28 + $0x428] ss:$12 sps:$4 sm:$0xff]  }
 0x166   : > { %2051 = vmatmul.mubr.bf16.gmra.mrb[140].mxu0 %v4647_v57  ;;  %4342 = vmatmul.mubr.msk.bf16.gmra.mrb[140].mxu1 %vm1545_vm0, %v4648_v58 }
 0x167   : > { %2058 = vmatprep.mubr.bf16.mxu0 %v4649_v63  ;;  %4345 = vmatprep.mubr.msk.bf16.mxu1 %vm1545_vm0, %v4651_v0 }
 0x169   : > { %v5100_v9 = vpop.f32.mrb[36].mxu0  ;;  %v5102_v10 = vpop.f32.mrb[36].mxu1 }
 0x16a   : > { %5824 = vst [vmem:[#allocation7_spill] sm:$0xff] %v5102_v10  ;;  %v1846_v11 = vpop.f32.mrb[37].mxu0  ;;  %v2230_v12 = vpop.f32.mrb[37].mxu1 }
 0x16b   : > { %v5106_v21 = vpop.f32.mrb[38].mxu0  ;;  %v5108_v22 = vpop.f32.mrb[38].mxu1  ;;  %v4662_v11 = vld [vmem:[%s4776_s28 + $0x390] ss:$12 sps:$4 sm:$0xff]   ;;  %v4663_v12 = vld [vmem:[%s4776_s28 + $0x440] ss:$12 sps:$4 sm:$0xff]  }
 0x16c   : > { %5825 = vst [vmem:[#allocation8_spill] sm:$0xff] %v5108_v22  ;;  %v1849_v29 = vpop.f32.mrb[39].mxu0  ;;  %v2233_v30 = vpop.f32.mrb[39].mxu1 }
 0x16e   : > { %2059 = vmatmul.mubr.bf16.gmra.mrb[144].mxu0 %v4652_v17  ;;  %4346 = vmatmul.mubr.msk.bf16.gmra.mrb[144].mxu1 %vm1545_vm0, %v4653_v18 }
 0x16f   : > { %2066 = vmatprep.mubr.bf16.mxu0 %v4654_v27  ;;  %4349 = vmatprep.mubr.msk.bf16.mxu1 %vm1545_vm0, %v4656_v28  ;;  %v4664_v27 = vld [vmem:[%s4776_s28 + $0x3ac] ss:$12 sps:$4 sm:$0xff]  }
 0x170   : > { %v4666_v28 = vld [vmem:[%s4776_s28 + $0x458] ss:$12 sps:$4 sm:$0xff]  }
 0x171   : > { %v5114_v35 = vpop.f32.mrb[40].mxu0  ;;  %v5116_v36 = vpop.f32.mrb[40].mxu1 }
 0x172   : > { %5826 = vst [vmem:[#allocation9_spill] sm:$0xff] %v5116_v36  ;;  %v1854_v39 = vpop.f32.mrb[41].mxu0  ;;  %v2238_v40 = vpop.f32.mrb[41].mxu1 }
 0x173   : > { %v5120_v47 = vpop.f32.mrb[42].mxu0  ;;  %v5122_v48 = vpop.f32.mrb[42].mxu1 }
 0x174   : > { %5827 = vst [vmem:[#allocation10_spill] sm:$0xff] %v5122_v48  ;;  %v1857_v57 = vpop.f32.mrb[43].mxu0  ;;  %v2241_v58 = vpop.f32.mrb[43].mxu1 }
 0x176   : > { %2067 = vmatmul.mubr.bf16.gmra.mrb[148].mxu0 %v4657_v45  ;;  %4350 = vmatmul.mubr.msk.bf16.gmra.mrb[148].mxu1 %vm1545_vm0, %v4658_v46 }
 0x177   : > { %2074 = vmatprep.mubr.bf16.mxu0 %v4659_v53  ;;  %4353 = vmatprep.mubr.msk.bf16.mxu1 %vm1545_vm0, %v4661_v54  ;;  %v4667_v53 = vld [vmem:[%s4776_s28 + $0x3a8] ss:$12 sps:$4 sm:$0xff]   ;;  %v4668_v54 = vld [vmem:[%s4776_s28 + $0x470] ss:$12 sps:$4 sm:$0xff]  }
 0x179   : > { %v5128_v63 = vpop.f32.mrb[44].mxu0  ;;  %v5130_v0 = vpop.f32.mrb[44].mxu1 }
 0x17a   : > { %5828 = vst [vmem:[#allocation11_spill] sm:$0xff] %v5130_v0  ;;  %v1862_v3 = vpop.f32.mrb[45].mxu0  ;;  %v2246_v4 = vpop.f32.mrb[45].mxu1 }
 0x17b   : > { %v5134_v17 = vpop.f32.mrb[46].mxu0  ;;  %v5136_v18 = vpop.f32.mrb[46].mxu1  ;;  %v4669_v3 = vld [vmem:[%s4776_s28 + $0x3c4] ss:$12 sps:$4 sm:$0xff]   ;;  %v4671_v4 = vld [vmem:[%s4776_s28 + $0x488] ss:$12 sps:$4 sm:$0xff]  }
 0x17c   : > { %5829 = vst [vmem:[#allocation12_spill] sm:$0xff] %v5136_v18  ;;  %v1865_v29 = vpop.f32.mrb[47].mxu0  ;;  %v2249_v30 = vpop.f32.mrb[47].mxu1  ;;  %v4682_v18 = vld [vmem:[%s4776_s28 + $0x3f0] ss:$12 sps:$4 sm:$0xff]  }
 0x17e   : > { %2075 = vmatmul.mubr.bf16.gmra.mrb[152].mxu0 %v4662_v11  ;;  %4354 = vmatmul.mubr.msk.bf16.gmra.mrb[152].mxu1 %vm1545_vm0, %v4663_v12 }
 0x17f   : > { %2082 = vmatprep.mubr.bf16.mxu0 %v4664_v27  ;;  %4357 = vmatprep.mubr.msk.bf16.mxu1 %vm1545_vm0, %v4666_v28 }
 0x181   : > { %v5142_v39 = vpop.f32.mrb[48].mxu0  ;;  %v5144_v40 = vpop.f32.mrb[48].mxu1 }
 0x182   : > { %5830 = vst [vmem:[#allocation13_spill] sm:$0xff] %v5144_v40  ;;  %v1870_v45 = vpop.f32.mrb[49].mxu0  ;;  %v2254_v46 = vpop.f32.mrb[49].mxu1 }
 0x183   : > { %v5148_v57 = vpop.f32.mrb[50].mxu0  ;;  %v5150_v58 = vpop.f32.mrb[50].mxu1  ;;  %v4672_v45 = vld [vmem:[%s4776_s28 + $0x3c0] ss:$12 sps:$4 sm:$0xff]  }
 0x184   : > { %5831 = vst [vmem:[#allocation14_spill] sm:$0xff] %v5150_v58  ;;  %v1873_v11 = vpop.f32.mrb[51].mxu0  ;;  %v2257_v12 = vpop.f32.mrb[51].mxu1  ;;  %v4673_v46 = vld [vmem:[%s4776_s28 + $0x4a0] ss:$12 sps:$4 sm:$0xff]  }
 0x186   : > { %2083 = vmatmul.mubr.bf16.gmra.mrb[156].mxu0 %v4667_v53  ;;  %4358 = vmatmul.mubr.msk.bf16.gmra.mrb[156].mxu1 %vm1545_vm0, %v4668_v54  ;;  %v4674_v53 = vld [vmem:[%s4776_s28 + $0x3dc] ss:$12 sps:$4 sm:$0xff]   ;;  %v4676_v54 = vld [vmem:[%s4776_s28 + $0x4b8] ss:$12 sps:$4 sm:$0xff]  }
 0x187   : > { %2090 = vmatprep.mubr.bf16.mxu0 %v4669_v3  ;;  %4361 = vmatprep.mubr.msk.bf16.mxu1 %vm1545_vm0, %v4671_v4 }
 0x189   : > { %v5156_v27 = vpop.f32.mrb[52].mxu0  ;;  %v5158_v28 = vpop.f32.mrb[52].mxu1 }
 0x18a   : > { %5832 = vst [vmem:[#allocation15_spill] sm:$0xff] %v5158_v28  ;;  %v1878_v29 = vpop.f32.mrb[53].mxu0  ;;  %v2262_v30 = vpop.f32.mrb[53].mxu1  ;;  %v4677_v28 = vld [vmem:[%s4776_s28 + $0x3d8] ss:$12 sps:$4 sm:$0xff]  }
 0x18b   : > { %v5162_v58 = vpop.f32.mrb[54].mxu0  ;;  %v5164_v11 = vpop.f32.mrb[54].mxu1 }
 0x18c   : > { %5833 = vst [vmem:[#allocation16_spill] sm:$0xff] %v5164_v11  ;;  %v1881_v3 = vpop.f32.mrb[55].mxu0  ;;  %v2265_v4 = vpop.f32.mrb[55].mxu1  ;;  %v4678_v11 = vld [vmem:[%s4776_s28 + $0x4d0] ss:$12 sps:$4 sm:$0xff]  }
 0x18e   : > { %2091 = vmatmul.mubr.bf16.gmra.mrb[160].mxu0 %v4672_v45  ;;  %4362 = vmatmul.mubr.msk.bf16.gmra.mrb[160].mxu1 %vm1545_vm0, %v4673_v46  ;;  %v4679_v45 = vld [vmem:[%s4776_s28 + $0x3f4] ss:$12 sps:$4 sm:$0xff]  }
 0x18f   : > { %2098 = vmatprep.mubr.bf16.mxu0 %v4674_v53  ;;  %4365 = vmatprep.mubr.msk.bf16.mxu1 %vm1545_vm0, %v4676_v54  ;;  %v4681_v46 = vld [vmem:[%s4776_s28 + $0x4e8] ss:$12 sps:$4 sm:$0xff]  }
 0x191   : > { %v5170_v12 = vpop.f32.mrb[56].mxu0  ;;  %v5172_v29 = vpop.f32.mrb[56].mxu1 }
 0x192   : > { %5834 = vst [vmem:[#allocation17_spill] sm:$0xff] %v5172_v29  ;;  %v1886_v30 = vpop.f32.mrb[57].mxu0  ;;  %v2270_v40 = vpop.f32.mrb[57].mxu1 }
 0x193   : > { %v5176_v48 = vpop.f32.mrb[58].mxu0  ;;  %v5178_v3 = vpop.f32.mrb[58].mxu1 }
 0x194   : > { %5835 = vst [vmem:[#allocation18_spill] sm:$0xff] %v5178_v3  ;;  %v1889_v53 = vpop.f32.mrb[59].mxu0  ;;  %v2273_v54 = vpop.f32.mrb[59].mxu1  ;;  %v4683_v3 = vld [vmem:[%s4776_s28 + $0x500] ss:$12 sps:$4 sm:$0xff]  }
 0x195   : > { %v4684_v53 = vld [vmem:[%s4776_s28 + $0x40c] ss:$12 sps:$4 sm:$0xff]  }
 0x196   : > { %2099 = vmatmul.mubr.bf16.gmra.mrb[164].mxu0 %v4677_v28  ;;  %4366 = vmatmul.mubr.msk.bf16.gmra.mrb[164].mxu1 %vm1545_vm0, %v4678_v11  ;;  %v4686_v28 = vld [vmem:[%s4776_s28 + $0x518] ss:$12 sps:$4 sm:$0xff]  }
 0x197   : > { %2106 = vmatprep.mubr.bf16.mxu0 %v4679_v45  ;;  %4369 = vmatprep.mubr.msk.bf16.mxu1 %vm1545_vm0, %v4681_v46  ;;  %v5199_v45 = vld [vmem:[%s5817_s2] ss:$0 sm:$0xff] }
 0x198   : > { %v1773_v46 = vadd.f32 %v5199_v45, %v4974_v1  ;;  %v4689_v1 = vld [vmem:[%s4776_s28 + $0x424] ss:$12 sps:$4 sm:$0xff]  }
 0x199   : > { %v5184_v40 = vpop.f32.mrb[60].mxu0  ;;  %v5186_v4 = vpop.f32.mrb[60].mxu1 }
 0x19a   : > { %5836 = vst [vmem:[#allocation19_spill] sm:$0xff] %v5186_v4  ;;  %v1894_v30 = vpop.f32.mrb[61].mxu0  ;;  %v2278_v29 = vpop.f32.mrb[61].mxu1  ;;  %v1776_v4 = vadd.f32 %v5199_v45, %v4980_v7 }
 0x19b   : > { %v5190_v36 = vpop.f32.mrb[62].mxu0  ;;  %v5192_v0 = vpop.f32.mrb[62].mxu1  ;;  %v1781_v29 = vadd.f32 %v5199_v45, %v4988_v13 }
 0x19c   : > { %5837 = vst [vmem:[#allocation20_spill] sm:$0xff] %v5192_v0  ;;  %v1897_v54 = vpop.f32.mrb[63].mxu0  ;;  %v2281_v11 = vpop.f32.mrb[63].mxu1  ;;  %v4687_v0 = vld [vmem:[%s4776_s28 + $0x408] ss:$12 sps:$4 sm:$0xff]  }
 0x19e   : > { %2107 = vmatmul.mubr.bf16.gmra.mrb[168].mxu0 %v4682_v18  ;;  %4370 = vmatmul.mubr.msk.bf16.gmra.mrb[168].mxu1 %vm1545_vm0, %v4683_v3  ;;  %v1784_v18 = vadd.f32 %v5199_v45, %v4994_v19 }
 0x19f   : > { %2114 = vmatprep.mubr.bf16.mxu0 %v4684_v53  ;;  %4373 = vmatprep.mubr.msk.bf16.mxu1 %vm1545_vm0, %v4686_v28  ;;  %v4688_v28 = vld [vmem:[%s4776_s28 + $0x530] ss:$12 sps:$4 sm:$0xff]  }
 0x1a1   : > { %v5207_v30 = vpop.f32.mrb[64].mxu0  ;;  %v4267_v54 = vpop.f32.mrb[64].mxu1 }
 0x1a2   : > { %v2326_v11 = vadd.f32 %v4267_v54, %v1781_v29  ;;  %v1902_v3 = vpop.f32.mrb[65].mxu0  ;;  %v2317_v53 = vpop.f32.mrb[65].mxu1 }
 0x1a3   : > { %v2318_v13 = vadd.f32 %v2317_v53, %v1773_v46  ;;  %v5216_v60 = vpop.f32.mrb[66].mxu0  ;;  %v4268_v22 = vpop.f32.mrb[66].mxu1  ;;  %v4692_v3 = vld [vmem:[%s4776_s28 + $0x420] ss:$12 sps:$4 sm:$0xff]  }
 0x1a4   : > { %v2830_v10 = vmax.f32 %v2326_v11, 0.0  ;;  %v2329_v24 = vadd.f32 %v4268_v22, %v1784_v18  ;;  %v1905_v42 = vpop.f32.mrb[67].mxu0  ;;  %v2320_v16 = vpop.f32.mrb[67].mxu1  ;;  %v4693_v53 = vld [vmem:[%s4776_s28 + $0x560] ss:$12 sps:$4 sm:$0xff]  }
 0x1a5   : > { %v2828_v19 = vmax.f32 %v2318_v13, 0.0  ;;  %v2321_v7 = vadd.f32 %v2320_v16, %v1776_v4  ;;  %v1797_v42 = vadd.f32 %v5199_v45, %v5016_v37 }
 0x1a6   : > { %v4069_v29 = vpack.c.bf16 %v2830_v10, %v2830_v10  ;;  %v2831_v46 = vmax.f32 %v2329_v24, 0.0  ;;  %2115 = vmatmul.mubr.bf16.gmra.mrb[172].mxu0 %v4687_v0  ;;  %4374 = vmatmul.mubr.msk.bf16.gmra.mrb[172].mxu1 %vm1545_vm0, %v4688_v28  ;;  %v1789_v24 = vadd.f32 %v5199_v45, %v5002_v25  ;;  %v1792_v25 = vadd.f32 %v5199_v45, %v5008_v31 }
 0x1a7   : > { %v4067_v54 = vpack.c.bf16 %v2828_v19, %v2828_v19  ;;  %v2829_v22 = vmax.f32 %v2321_v7, 0.0  ;;  %2122 = vmatprep.mubr.bf16.mxu0 %v4689_v1  ;;  %4377 = vmatprep.mubr.msk.bf16.mxu1 %vm1545_vm0, %v4691_v52  ;;  %v1800_v52 = vadd.f32 %v5199_v45, %v5022_v43  ;;  %v4694_v19 = vld [vmem:[%s4776_s28 + $0x43c] ss:$12 sps:$4 sm:$0xff]   ;;  %v4696_v7 = vld [vmem:[%s4776_s28 + $0x578] ss:$12 sps:$4 sm:$0xff]  }
 0x1a8   : > { %3471 = vst.msk [vmem:[%s5223_s8 + $0x8] sm:$0xf] %vm3468_vm1, %v4069_v29  ;;  %v4070_v16 = vpack.c.bf16 %v2831_v46, %v2831_v46 }
 0x1a9   : > { %3469 = vst.msk [vmem:[%s5223_s8] sm:$0xf] %vm3468_vm1, %v4067_v54  ;;  %v4068_v10 = vpack.c.bf16 %v2829_v22, %v2829_v22  ;;  %v5235_v0 = vpop.f32.mrb[68].mxu0  ;;  %v4271_v4 = vpop.f32.mrb[68].mxu1 }
 0x1aa   : > { %3472 = vst.msk [vmem:[%s5223_s8 + $0xc] sm:$0xf] %vm3468_vm1, %v4070_v16  ;;  %v2342_v37 = vadd.f32 %v4271_v4, %v1797_v42  ;;  %v1910_v18 = vpop.f32.mrb[69].mxu0  ;;  %v2333_v11 = vpop.f32.mrb[69].mxu1 }
 0x1ab   : > { %3470 = vst.msk [vmem:[%s5223_s8 + $0x4] sm:$0xf] %vm3468_vm1, %v4068_v10  ;;  %v2334_v28 = vadd.f32 %v2333_v11, %v1789_v24  ;;  %v5247_v13 = vpop.f32.mrb[70].mxu0  ;;  %v4272_v1 = vpop.f32.mrb[70].mxu1  ;;  %v1813_v10 = vadd.f32 %v5199_v45, %v5044_v61 }
 0x1ac   : > { %v2834_v43 = vmax.f32 %v2342_v37, 0.0  ;;  %v2345_v29 = vadd.f32 %v4272_v1, %v1800_v52  ;;  %v1913_v46 = vpop.f32.mrb[71].mxu0  ;;  %v2336_v54 = vpop.f32.mrb[71].mxu1  ;;  %v1805_v37 = vadd.f32 %v5199_v45, %v5030_v49  ;;  %v4697_v1 = vld [vmem:[%s4776_s28 + $0x438] ss:$12 sps:$4 sm:$0xff]   ;;  %v1808_v49 = vadd.f32 %v5199_v45, %v5036_v55 }
 0x1ad   : > { %v2832_v22 = vmax.f32 %v2334_v28, 0.0  ;;  %v2337_v42 = vadd.f32 %v2336_v54, %v1792_v25  ;;  %v4699_v46 = vld [vmem:[%s4776_s28 + $0x454] ss:$12 sps:$4 sm:$0xff]  }
 0x1ae   : > { %v4073_v16 = vpack.c.bf16 %v2834_v43, %v2834_v43  ;;  %v2835_v4 = vmax.f32 %v2345_v29, 0.0  ;;  %2123 = vmatmul.mubr.bf16.gmra.mrb[176].mxu0 %v4692_v3  ;;  %4378 = vmatmul.mubr.msk.bf16.gmra.mrb[176].mxu1 %vm1545_vm0, %v4693_v53  ;;  %v1816_v53 = vadd.f32 %v5199_v45, %v5050_v5  ;;  %v4701_v54 = vld [vmem:[%s4776_s28 + $0x5a8] ss:$12 sps:$4 sm:$0xff]  }
 0x1af   : > { %v4071_v31 = vpack.c.bf16 %v2832_v22, %v2832_v22  ;;  %v2833_v24 = vmax.f32 %v2337_v42, 0.0  ;;  %2130 = vmatprep.mubr.bf16.mxu0 %v4694_v19  ;;  %4381 = vmatprep.mubr.msk.bf16.mxu1 %vm1545_vm0, %v4696_v7  ;;  %v4698_v19 = vld [vmem:[%s4776_s28 + $0x590] ss:$12 sps:$4 sm:$0xff]  }
 0x1b0   : > { %3475 = vst.msk [vmem:[%s5223_s8 + $0x18] sm:$0xf] %vm3468_vm1, %v4073_v16  ;;  %v4074_v52 = vpack.c.bf16 %v2835_v4, %v2835_v4 }
 0x1b1   : > { %3473 = vst.msk [vmem:[%s5223_s8 + $0x10] sm:$0xf] %vm3468_vm1, %v4071_v31  ;;  %v4072_v18 = vpack.c.bf16 %v2833_v24, %v2833_v24  ;;  %v5261_v11 = vpop.f32.mrb[72].mxu0  ;;  %v4275_v3 = vpop.f32.mrb[72].mxu1 }
 0x1b2   : > { %3476 = vst.msk [vmem:[%s5223_s8 + $0x1c] sm:$0xf] %vm3468_vm1, %v4074_v52  ;;  %v2358_v61 = vadd.f32 %v4275_v3, %v1813_v10  ;;  %v1918_v25 = vpop.f32.mrb[73].mxu0  ;;  %v2349_v28 = vpop.f32.mrb[73].mxu1  ;;  %v1821_v3 = vadd.f32 %v5199_v45, %v5058_v15  ;;  %v1824_v15 = vadd.f32 %v5199_v45, %v5064_v23 }
 0x1b3   : > { %3474 = vst.msk [vmem:[%s5223_s8 + $0x14] sm:$0xf] %vm3468_vm1, %v4072_v18  ;;  %v2350_v7 = vadd.f32 %v2349_v28, %v1805_v37  ;;  %v5273_v43 = vpop.f32.mrb[74].mxu0  ;;  %v4276_v29 = vpop.f32.mrb[74].mxu1  ;;  %v1829_v37 = vadd.f32 %v5199_v45, %v5072_v33  ;;  %v1832_v28 = vadd.f32 %v5199_v45, %v5078_v41 }
 0x1b4   : > { %v2838_v5 = vmax.f32 %v2358_v61, 0.0  ;;  %v2361_v22 = vadd.f32 %v4276_v29, %v1816_v53  ;;  %v1921_v42 = vpop.f32.mrb[75].mxu0  ;;  %v2352_v16 = vpop.f32.mrb[75].mxu1 }
 0x1b5   : > { %v2836_v4 = vmax.f32 %v2350_v7, 0.0  ;;  %v2353_v31 = vadd.f32 %v2352_v16, %v1808_v49  ;;  %v4702_v49 = vld [vmem:[%s4776_s28 + $0x450] ss:$12 sps:$4 sm:$0xff]   ;;  %v4703_v7 = vld [vmem:[%s4776_s28 + $0x5c0] ss:$12 sps:$4 sm:$0xff]  }
 0x1b6   : > { %v4077_v24 = vpack.c.bf16 %v2838_v5, %v2838_v5  ;;  %v2839_v10 = vmax.f32 %v2361_v22, 0.0  ;;  %2131 = vmatmul.mubr.bf16.gmra.mrb[180].mxu0 %v4697_v1  ;;  %4382 = vmatmul.mubr.msk.bf16.gmra.mrb[180].mxu1 %vm1545_vm0, %v4698_v19  ;;  %v4704_v5 = vld [vmem:[%s4776_s28 + $0x46c] ss:$12 sps:$4 sm:$0xff]  }
 0x1b7   : > { %v4075_v55 = vpack.c.bf16 %v2836_v4, %v2836_v4  ;;  %v2837_v52 = vmax.f32 %v2353_v31, 0.0  ;;  %2138 = vmatprep.mubr.bf16.mxu0 %v4699_v46  ;;  %4385 = vmatprep.mubr.msk.bf16.mxu1 %vm1545_vm0, %v4701_v54  ;;  %v4706_v22 = vld [vmem:[%s4776_s28 + $0x5d8] ss:$12 sps:$4 sm:$0xff]  }
 0x1b8   : > { %3479 = vst.msk [vmem:[%s5223_s8 + $0x28] sm:$0xf] %vm3468_vm1, %v4077_v24  ;;  %v4078_v18 = vpack.c.bf16 %v2839_v10, %v2839_v10 }
 0x1b9   : > { %3477 = vst.msk [vmem:[%s5223_s8 + $0x20] sm:$0xf] %vm3468_vm1, %v4075_v55  ;;  %v4076_v53 = vpack.c.bf16 %v2837_v52, %v2837_v52  ;;  %v5287_v61 = vpop.f32.mrb[76].mxu0  ;;  %v4279_v25 = vpop.f32.mrb[76].mxu1 }
 0x1ba   : > { %3480 = vst.msk [vmem:[%s5223_s8 + $0x2c] sm:$0xf] %vm3468_vm1, %v4078_v18  ;;  %v2374_v33 = vadd.f32 %v4279_v25, %v1829_v37  ;;  %v1926_v1 = vpop.f32.mrb[77].mxu0  ;;  %v2365_v19 = vpop.f32.mrb[77].mxu1  ;;  %v1845_v37 = vadd.f32 %v5199_v45, %v5100_v9 }
 0x1bb   : > { %3478 = vst.msk [vmem:[%s5223_s8 + $0x24] sm:$0xf] %vm3468_vm1, %v4076_v53  ;;  %v2366_v29 = vadd.f32 %v2365_v19, %v1821_v3  ;;  %v5299_v46 = vpop.f32.mrb[78].mxu0  ;;  %v4280_v54 = vpop.f32.mrb[78].mxu1  ;;  %v1837_v3 = vadd.f32 %v5199_v45, %v5086_v51 }
 0x1bc   : > { %v2842_v41 = vmax.f32 %v2374_v33, 0.0  ;;  %v2377_v42 = vadd.f32 %v4280_v54, %v1832_v28  ;;  %v1929_v16 = vpop.f32.mrb[79].mxu0  ;;  %v2368_v4 = vpop.f32.mrb[79].mxu1  ;;  %v1848_v33 = vadd.f32 %v5199_v45, %v5106_v21 }
 0x1bd   : > { %v2840_v31 = vmax.f32 %v2366_v29, 0.0  ;;  %v2369_v24 = vadd.f32 %v2368_v4, %v1824_v15  ;;  %v1840_v15 = vadd.f32 %v5199_v45, %v5092_v59 }
 0x1be   : > { %v4081_v10 = vpack.c.bf16 %v2842_v41, %v2842_v41  ;;  %v2843_v55 = vmax.f32 %v2377_v42, 0.0  ;;  %2139 = vmatmul.mubr.bf16.gmra.mrb[184].mxu0 %v4702_v49  ;;  %4386 = vmatmul.mubr.msk.bf16.gmra.mrb[184].mxu1 %vm1545_vm0, %v4703_v7  ;;  %v4707_v49 = vld [vmem:[%s4776_s28 + $0x468] ss:$12 sps:$4 sm:$0xff]   ;;  %v4708_v7 = vld [vmem:[%s4776_s28 + $0x5f0] ss:$12 sps:$4 sm:$0xff]  }
 0x1bf   : > { %v4079_v23 = vpack.c.bf16 %v2840_v31, %v2840_v31  ;;  %v2841_v52 = vmax.f32 %v2369_v24, 0.0  ;;  %2146 = vmatprep.mubr.bf16.mxu0 %v4704_v5  ;;  %4389 = vmatprep.mubr.msk.bf16.mxu1 %vm1545_vm0, %v4706_v22 }
 0x1c0   : > { %3483 = vst.msk [vmem:[%s5223_s8 + $0x38] sm:$0xf] %vm3468_vm1, %v4081_v10  ;;  %v4082_v18 = vpack.c.bf16 %v2843_v55, %v2843_v55  ;;  %v1861_v10 = vadd.f32 %v5199_v45, %v5128_v63 }
 0x1c1   : > { %3481 = vst.msk [vmem:[%s5223_s8 + $0x30] sm:$0xf] %vm3468_vm1, %v4079_v23  ;;  %v4080_v53 = vpack.c.bf16 %v2841_v52, %v2841_v52  ;;  %v5313_v25 = vpop.f32.mrb[80].mxu0  ;;  %v4283_v28 = vpop.f32.mrb[80].mxu1  ;;  %v1853_v23 = vadd.f32 %v5199_v45, %v5114_v35 }
 0x1c2   : > { %3484 = vst.msk [vmem:[%s5223_s8 + $0x3c] sm:$0xf] %vm3468_vm1, %v4082_v18  ;;  %v2390_v1 = vadd.f32 %v4283_v28, %v1845_v37  ;;  %v1934_v9 = vpop.f32.mrb[81].mxu0  ;;  %v2381_v19 = vpop.f32.mrb[81].mxu1 }
 0x1c3   : > { %3482 = vst.msk [vmem:[%s5223_s8 + $0x34] sm:$0xf] %vm3468_vm1, %v4080_v53  ;;  %v2382_v51 = vadd.f32 %v2381_v19, %v1837_v3  ;;  %v5325_v29 = vpop.f32.mrb[82].mxu0  ;;  %v4284_v54 = vpop.f32.mrb[82].mxu1  ;;  %v1864_v3 = vadd.f32 %v5199_v45, %v5134_v17 }
 0x1c4   : > { %v2846_v5 = vmax.f32 %v2390_v1, 0.0  ;;  %v2393_v21 = vadd.f32 %v4284_v54, %v1848_v33  ;;  %v1937_v22 = vpop.f32.mrb[83].mxu0  ;;  %v2384_v41 = vpop.f32.mrb[83].mxu1  ;;  %v1856_v33 = vadd.f32 %v5199_v45, %v5120_v47 }
 0x1c5   : > { %v2844_v42 = vmax.f32 %v2382_v51, 0.0  ;;  %v2385_v16 = vadd.f32 %v2384_v41, %v1840_v15  ;;  %v1877_v22 = vadd.f32 %v5199_v45, %v5156_v27 }
 0x1c6   : > { %v4085_v4 = vpack.c.bf16 %v2846_v5, %v2846_v5  ;;  %v2847_v31 = vmax.f32 %v2393_v21, 0.0  ;;  %2147 = vmatmul.mubr.bf16.gmra.mrb[188].mxu0 %v4707_v49  ;;  %4390 = vmatmul.mubr.msk.bf16.gmra.mrb[188].mxu1 %vm1545_vm0, %v4708_v7 }
 0x1c7   : > { %v4083_v59 = vpack.c.bf16 %v2844_v42, %v2844_v42  ;;  %v2845_v24 = vmax.f32 %v2385_v16, 0.0  ;;  %v1869_v42 = vadd.f32 %v5199_v45, %v5142_v39 }
 0x1c8   : > { %3487 = vst.msk [vmem:[%s5223_s8 + $0x48] sm:$0xf] %vm3468_vm1, %v4085_v4  ;;  %v4086_v55 = vpack.c.bf16 %v2847_v31, %v2847_v31 }
 0x1c9   : > { %3485 = vst.msk [vmem:[%s5223_s8 + $0x40] sm:$0xf] %vm3468_vm1, %v4083_v59  ;;  %v4084_v52 = vpack.c.bf16 %v2845_v24, %v2845_v24  ;;  %v5336_v37 = vpop.f32.mrb[84].mxu0  ;;  %v4287_v18 = vpop.f32.mrb[84].mxu1  ;;  %v1880_v59 = vadd.f32 %v5199_v45, %v5162_v58 }
 0x1ca   : > { %3488 = vst.msk [vmem:[%s5223_s8 + $0x4c] sm:$0xf] %vm3468_vm1, %v4086_v55  ;;  %v2406_v53 = vadd.f32 %v4287_v18, %v1861_v10  ;;  %v1942_v28 = vpop.f32.mrb[85].mxu0  ;;  %v2397_v63 = vpop.f32.mrb[85].mxu1  ;;  %v1872_v55 = vadd.f32 %v5199_v45, %v5148_v57 }
 0x1cb   : > { %3486 = vst.msk [vmem:[%s5223_s8 + $0x44] sm:$0xf] %vm3468_vm1, %v4084_v52  ;;  %v2398_v35 = vadd.f32 %v2397_v63, %v1853_v23  ;;  %v5346_v1 = vpop.f32.mrb[86].mxu0  ;;  %v4288_v9 = vpop.f32.mrb[86].mxu1 }
 0x1cc   : > { %v2850_v19 = vmax.f32 %v2406_v53, 0.0  ;;  %v2409_v49 = vadd.f32 %v4288_v9, %v1864_v3  ;;  %v1945_v7 = vpop.f32.mrb[87].mxu0  ;;  %v2400_v17 = vpop.f32.mrb[87].mxu1 }
 0x1cd   : > { %v2848_v15 = vmax.f32 %v2398_v35, 0.0  ;;  %v2401_v51 = vadd.f32 %v2400_v17, %v1856_v33  ;;  %v1885_v7 = vadd.f32 %v5199_v45, %v5170_v12 }
 0x1ce   : > { %v4089_v54 = vpack.c.bf16 %v2850_v19, %v2850_v19  ;;  %v2851_v5 = vmax.f32 %v2409_v49, 0.0  ;;  %v1893_v19 = vadd.f32 %v5199_v45, %v5184_v40 }
 0x1cf   : > { %v4087_v21 = vpack.c.bf16 %v2848_v15, %v2848_v15  ;;  %v2849_v47 = vmax.f32 %v2401_v51, 0.0 }
 0x1d0   : > { %3491 = vst.msk [vmem:[%s5223_s8 + $0x58] sm:$0xf] %vm3468_vm1, %v4089_v54  ;;  %v4090_v41 = vpack.c.bf16 %v2851_v5, %v2851_v5  ;;  %v1896_v54 = vadd.f32 %v5199_v45, %v5190_v36 }
 0x1d1   : > { %3489 = vst.msk [vmem:[%s5223_s8 + $0x50] sm:$0xf] %vm3468_vm1, %v4087_v21  ;;  %v4088_v16 = vpack.c.bf16 %v2849_v47, %v2849_v47  ;;  %v5356_v4 = vpop.f32.mrb[88].mxu0  ;;  %v4291_v31 = vpop.f32.mrb[88].mxu1  ;;  %v1888_v47 = vadd.f32 %v5199_v45, %v5176_v48 }
 0x1d2   : > { %3492 = vst.msk [vmem:[%s5223_s8 + $0x5c] sm:$0xf] %vm3468_vm1, %v4090_v41  ;;  %v2422_v24 = vadd.f32 %v4291_v31, %v1877_v22  ;;  %v1950_v10 = vpop.f32.mrb[89].mxu0  ;;  %v2413_v27 = vpop.f32.mrb[89].mxu1 }
 0x1d3   : > { %3490 = vst.msk [vmem:[%s5223_s8 + $0x54] sm:$0xf] %vm3468_vm1, %v4088_v16  ;;  %v2414_v39 = vadd.f32 %v2413_v27, %v1869_v42  ;;  %v5366_v23 = vpop.f32.mrb[90].mxu0  ;;  %v4292_v52 = vpop.f32.mrb[90].mxu1 }
 0x1d4   : > { %v2854_v18 = vmax.f32 %v2422_v24, 0.0  ;;  %v2425_v3 = vadd.f32 %v4292_v52, %v1880_v59  ;;  %v1953_v53 = vpop.f32.mrb[91].mxu0  ;;  %v2416_v58 = vpop.f32.mrb[91].mxu1 }
 0x1d5   : > { %v2852_v28 = vmax.f32 %v2414_v39, 0.0  ;;  %v2417_v63 = vadd.f32 %v2416_v58, %v1872_v55  ;;  %v1909_v39 = vadd.f32 %v5199_v45, %v5235_v0 }
 0x1d6   : > { %v4093_v33 = vpack.c.bf16 %v2854_v18, %v2854_v18  ;;  %v2855_v35 = vmax.f32 %v2425_v3, 0.0  ;;  %v1901_v18 = vadd.f32 %v5199_v45, %v5207_v30 }
 0x1d7   : > { %v4091_v9 = vpack.c.bf16 %v2852_v28, %v2852_v28  ;;  %v2853_v57 = vmax.f32 %v2417_v63, 0.0  ;;  %v1912_v28 = vadd.f32 %v5199_v45, %v5247_v13 }
 0x1d8   : > { %3495 = vst.msk [vmem:[%s5223_s8 + $0x68] sm:$0xf] %vm3468_vm1, %v4093_v33  ;;  %v4094_v49 = vpack.c.bf16 %v2855_v35, %v2855_v35  ;;  %v1904_v35 = vadd.f32 %v5199_v45, %v5216_v60 }
 0x1d9   : > { %3493 = vst.msk [vmem:[%s5223_s8 + $0x60] sm:$0xf] %vm3468_vm1, %v4091_v9  ;;  %v4092_v17 = vpack.c.bf16 %v2853_v57, %v2853_v57  ;;  %v5376_v15 = vpop.f32.mrb[92].mxu0  ;;  %v4295_v51 = vpop.f32.mrb[92].mxu1 }
 0x1da   : > { %3496 = vst.msk [vmem:[%s5223_s8 + $0x6c] sm:$0xf] %vm3468_vm1, %v4094_v49  ;;  %v2438_v5 = vadd.f32 %v4295_v51, %v1893_v19  ;;  %v1958_v21 = vpop.f32.mrb[93].mxu0  ;;  %v2429_v40 = vpop.f32.mrb[93].mxu1 }
 0x1db   : > { %3494 = vst.msk [vmem:[%s5223_s8 + $0x64] sm:$0xf] %vm3468_vm1, %v4092_v17  ;;  %v2430_v12 = vadd.f32 %v2429_v40, %v1885_v7  ;;  %v5386_v22 = vpop.f32.mrb[94].mxu0  ;;  %v4296_v41 = vpop.f32.mrb[94].mxu1  ;;  %v1925_v40 = vadd.f32 %v5199_v45, %v5287_v61 }
 0x1dc   : > { %v2858_v42 = vmax.f32 %v2438_v5, 0.0  ;;  %v2441_v16 = vadd.f32 %v4296_v41, %v1896_v54  ;;  %v1961_v31 = vpop.f32.mrb[95].mxu0  ;;  %v2432_v36 = vpop.f32.mrb[95].mxu1 }
 0x1dd   : > { %v2856_v59 = vmax.f32 %v2430_v12, 0.0  ;;  %v2433_v24 = vadd.f32 %v2432_v36, %v1888_v47  ;;  %v1917_v12 = vadd.f32 %v5199_v45, %v5261_v11  ;;  %v1928_v31 = vadd.f32 %v5199_v45, %v5299_v46 }
 0x1de   : > { %v4097_v10 = vpack.c.bf16 %v2858_v42, %v2858_v42  ;;  %v2859_v27 = vmax.f32 %v2441_v16, 0.0 }
 0x1df   : > { %v4095_v55 = vpack.c.bf16 %v2856_v59, %v2856_v59  ;;  %v2857_v48 = vmax.f32 %v2433_v24, 0.0  ;;  %v1920_v24 = vadd.f32 %v5199_v45, %v5273_v43 }
 0x1e0   : > { %3499 = vst.msk [vmem:[%s5223_s8 + $0x78] sm:$0xf] %vm3468_vm1, %v4097_v10  ;;  %v4098_v52 = vpack.c.bf16 %v2859_v27, %v2859_v27 }
 0x1e1   : > { %3497 = vst.msk [vmem:[%s5223_s8 + $0x70] sm:$0xf] %vm3468_vm1, %v4095_v55  ;;  %v4096_v3 = vpack.c.bf16 %v2857_v48, %v2857_v48  ;;  %v5396_v53 = vpop.f32.mrb[96].mxu0  ;;  %v4299_v58 = vpop.f32.mrb[96].mxu1 }
 0x1e2   : > { %3500 = vst.msk [vmem:[%s5223_s8 + $0x7c] sm:$0xf] %vm3468_vm1, %v4098_v52  ;;  %v2454_v63 = vadd.f32 %v4299_v58, %v1909_v39  ;;  %v1966_v33 = vpop.f32.mrb[97].mxu0  ;;  %v2445_v0 = vpop.f32.mrb[97].mxu1 }
 0x1e3   : > { %3498 = vst.msk [vmem:[%s5223_s8 + $0x74] sm:$0xf] %vm3468_vm1, %v4096_v3  ;;  %v2446_v30 = vadd.f32 %v2445_v0, %v1901_v18  ;;  %v5406_v9 = vpop.f32.mrb[98].mxu0  ;;  %v4300_v57 = vpop.f32.mrb[98].mxu1  ;;  %v1933_v0 = vadd.f32 %v5199_v45, %v5313_v25 }
 0x1e4   : > { %v2862_v19 = vmax.f32 %v2454_v63, 0.0  ;;  %v2457_v49 = vadd.f32 %v4300_v57, %v1912_v28  ;;  %v1969_v7 = vpop.f32.mrb[99].mxu0  ;;  %v2448_v13 = vpop.f32.mrb[99].mxu1  ;;  %v1941_v63 = vadd.f32 %v5199_v45, %v5336_v37 }
 0x1e5   : > { %v2860_v17 = vmax.f32 %v2446_v30, 0.0  ;;  %v2449_v51 = vadd.f32 %v2448_v13, %v1904_v35  ;;  %v1936_v13 = vadd.f32 %v5199_v45, %v5325_v29 }
 0x1e6   : > { %v4101_v54 = vpack.c.bf16 %v2862_v19, %v2862_v19  ;;  %v2863_v5 = vmax.f32 %v2457_v49, 0.0  ;;  %v1944_v19 = vadd.f32 %v5199_v45, %v5346_v1 }
 0x1e7   : > { %v4099_v21 = vpack.c.bf16 %v2860_v17, %v2860_v17  ;;  %v2861_v60 = vmax.f32 %v2449_v51, 0.0 }
 0x1e8   : > { %3503 = vst.msk [vmem:[%s5223_s8 + $0x88] sm:$0xf] %vm3468_vm1, %v4101_v54  ;;  %v4102_v47 = vpack.c.bf16 %v2863_v5, %v2863_v5 }
 0x1e9   : > { %3501 = vst.msk [vmem:[%s5223_s8 + $0x80] sm:$0xf] %vm3468_vm1, %v4099_v21  ;;  %v4100_v41 = vpack.c.bf16 %v2861_v60, %v2861_v60  ;;  %v5416_v42 = vpop.f32.mrb[100].mxu0  ;;  %v4303_v16 = vpop.f32.mrb[100].mxu1 }
 0x1ea   : > { %3504 = vst.msk [vmem:[%s5223_s8 + $0x8c] sm:$0xf] %vm3468_vm1, %v4102_v47  ;;  %v2470_v36 = vadd.f32 %v4303_v16, %v1925_v40  ;;  %v1974_v59 = vpop.f32.mrb[101].mxu0  ;;  %v2461_v61 = vpop.f32.mrb[101].mxu1  ;;  %v1957_v16 = vadd.f32 %v5199_v45, %v5376_v15  ;;  %v1952_v15 = vadd.f32 %v5199_v45, %v5366_v23  ;;  %v1973_v23 = vadd.f32 %v5199_v45, %v5416_v42 }
 0x1eb   : > { %3502 = vst.msk [vmem:[%s5223_s8 + $0x84] sm:$0xf] %vm3468_vm1, %v4100_v41  ;;  %v2462_v11 = vadd.f32 %v2461_v61, %v1917_v12  ;;  %v5426_v10 = vpop.f32.mrb[102].mxu0  ;;  %v4304_v27 = vpop.f32.mrb[102].mxu1  ;;  %v1968_v42 = vadd.f32 %v5199_v45, %v5406_v9 }
 0x1ec   : > { %v2866_v55 = vmax.f32 %v2470_v36, 0.0  ;;  %v2473_v48 = vadd.f32 %v4304_v27, %v1928_v31  ;;  %v1977_v39 = vpop.f32.mrb[103].mxu0  ;;  %v2464_v46 = vpop.f32.mrb[103].mxu1  ;;  %v1949_v36 = vadd.f32 %v5199_v45, %v5356_v4 }
 0x1ed   : > { %v2864_v52 = vmax.f32 %v2462_v11, 0.0  ;;  %v2465_v18 = vadd.f32 %v2464_v46, %v1920_v24  ;;  %v1960_v11 = vadd.f32 %v5199_v45, %v5386_v22 }
 0x1ee   : > { %v4105_v3 = vpack.c.bf16 %v2866_v55, %v2866_v55  ;;  %v2867_v58 = vmax.f32 %v2473_v48, 0.0 }
 0x1ef   : > { %v4103_v28 = vpack.c.bf16 %v2864_v52, %v2864_v52  ;;  %v2865_v43 = vmax.f32 %v2465_v18, 0.0 }
 0x1f0   : > { %3507 = vst.msk [vmem:[%s5223_s8 + $0x98] sm:$0xf] %vm3468_vm1, %v4105_v3  ;;  %v4106_v33 = vpack.c.bf16 %v2867_v58, %v2867_v58 }
 0x1f1   : > { %3505 = vst.msk [vmem:[%s5223_s8 + $0x90] sm:$0xf] %vm3468_vm1, %v4103_v28  ;;  %v4104_v35 = vpack.c.bf16 %v2865_v43, %v2865_v43  ;;  %v5436_v30 = vpop.f32.mrb[104].mxu0  ;;  %v4307_v57 = vpop.f32.mrb[104].mxu1 }
 0x1f2   : > { %3508 = vst.msk [vmem:[%s5223_s8 + $0x9c] sm:$0xf] %vm3468_vm1, %v4106_v33  ;;  %v2486_v49 = vadd.f32 %v4307_v57, %v1941_v63  ;;  %v1982_v7 = vpop.f32.mrb[105].mxu0  ;;  %v2477_v37 = vpop.f32.mrb[105].mxu1  ;;  %v1965_v57 = vadd.f32 %v5199_v45, %v5396_v53 }
 0x1f3   : > { %3506 = vst.msk [vmem:[%s5223_s8 + $0x94] sm:$0xf] %vm3468_vm1, %v4104_v35  ;;  %v2478_v25 = vadd.f32 %v2477_v37, %v1933_v0  ;;  %v5446_v17 = vpop.f32.mrb[106].mxu0  ;;  %v4308_v51 = vpop.f32.mrb[106].mxu1  ;;  %v1976_v37 = vadd.f32 %v5199_v45, %v5426_v10 }
 0x1f4   : > { %v2870_v54 = vmax.f32 %v2486_v49, 0.0  ;;  %v2489_v5 = vadd.f32 %v4308_v51, %v1944_v19  ;;  %v1985_v21 = vpop.f32.mrb[107].mxu0  ;;  %v2480_v1 = vpop.f32.mrb[107].mxu1 }
 0x1f5   : > { %v2868_v60 = vmax.f32 %v2478_v25, 0.0  ;;  %v2481_v40 = vadd.f32 %v2480_v1, %v1936_v13 }
 0x1f6   : > { %v4109_v47 = vpack.c.bf16 %v2870_v54, %v2870_v54  ;;  %v2871_v12 = vmax.f32 %v2489_v5, 0.0 }
 0x1f7   : > { %v4107_v41 = vpack.c.bf16 %v2868_v60, %v2868_v60  ;;  %v2869_v29 = vmax.f32 %v2481_v40, 0.0 }
 0x1f8   : > { %3511 = vst.msk [vmem:[%s5223_s8 + $0xa8] sm:$0xf] %vm3468_vm1, %v4109_v47  ;;  %v4110_v31 = vpack.c.bf16 %v2871_v12, %v2871_v12 }
 0x1f9   : > { %3509 = vst.msk [vmem:[%s5223_s8 + $0xa0] sm:$0xf] %vm3468_vm1, %v4107_v41  ;;  %v4108_v59 = vpack.c.bf16 %v2869_v29, %v2869_v29  ;;  %v1988_v61 = vpop.f32.mrb[108].mxu0  ;;  %v4311_v24 = vpop.f32.mrb[108].mxu1 }
 0x1fa   : > { %3512 = vst.msk [vmem:[%s5223_s8 + $0xac] sm:$0xf] %vm3468_vm1, %v4110_v31  ;;  %v2502_v27 = vadd.f32 %v4311_v24, %v1957_v16  ;;  %v1990_v55 = vpop.f32.mrb[109].mxu0  ;;  %v2493_v48 = vpop.f32.mrb[109].mxu1  ;;  %v1989_v9 = vadd.f32 %v5199_v45, %v1988_v61  ;;  %v1984_v61 = vadd.f32 %v5199_v45, %v5446_v17 }
 0x1fb   : > { %3510 = vst.msk [vmem:[%s5223_s8 + $0xa4] sm:$0xf] %vm3468_vm1, %v4108_v59  ;;  %v2494_v4 = vadd.f32 %v2493_v48, %v1949_v36  ;;  %v1991_v39 = vpop.f32.mrb[110].mxu0  ;;  %v4312_v46 = vpop.f32.mrb[110].mxu1  ;;  %v1981_v36 = vadd.f32 %v5199_v45, %v5436_v30 }
 0x1fc   : > { %v2874_v52 = vmax.f32 %v2502_v27, 0.0  ;;  %v2505_v18 = vadd.f32 %v4312_v46, %v1960_v11  ;;  %v1993_v3 = vpop.f32.mrb[111].mxu0  ;;  %v2496_v58 = vpop.f32.mrb[111].mxu1  ;;  %v1992_v27 = vadd.f32 %v5199_v45, %v1991_v39 }
 0x1fd   : > { %v2872_v22 = vmax.f32 %v2494_v4, 0.0  ;;  %v2497_v28 = vadd.f32 %v2496_v58, %v1952_v15 }
 0x1fe   : > { %v4113_v43 = vpack.c.bf16 %v2874_v52, %v2874_v52  ;;  %v2875_v63 = vmax.f32 %v2505_v18, 0.0 }
 0x1ff   : > { %v4111_v33 = vpack.c.bf16 %v2872_v22, %v2872_v22  ;;  %v2873_v0 = vmax.f32 %v2497_v28, 0.0 }
 0x200   : > { %3515 = vst.msk [vmem:[%s5223_s8 + $0xb8] sm:$0xf] %vm3468_vm1, %v4113_v43  ;;  %v4114_v35 = vpack.c.bf16 %v2875_v63, %v2875_v63 }
 0x201   : > { %3513 = vst.msk [vmem:[%s5223_s8 + $0xb0] sm:$0xf] %vm3468_vm1, %v4111_v33  ;;  %v4112_v19 = vpack.c.bf16 %v2873_v0, %v2873_v0  ;;  %v1996_v49 = vpop.f32.mrb[112].mxu0  ;;  %v4315_v7 = vpop.f32.mrb[112].mxu1 }
 0x202   : > { %3516 = vst.msk [vmem:[%s5223_s8 + $0xbc] sm:$0xf] %vm3468_vm1, %v4114_v35  ;;  %v2518_v13 = vadd.f32 %v4315_v7, %v1973_v23  ;;  %v1998_v25 = vpop.f32.mrb[113].mxu0  ;;  %v2509_v51 = vpop.f32.mrb[113].mxu1  ;;  %v1997_v23 = vadd.f32 %v5199_v45, %v1996_v49 }
 0x203   : > { %3514 = vst.msk [vmem:[%s5223_s8 + $0xb4] sm:$0xf] %vm3468_vm1, %v4112_v19  ;;  %v2510_v53 = vadd.f32 %v2509_v51, %v1965_v57  ;;  %v1999_v54 = vpop.f32.mrb[114].mxu0  ;;  %v4316_v5 = vpop.f32.mrb[114].mxu1 }
 0x204   : > { %v2878_v21 = vmax.f32 %v2518_v13, 0.0  ;;  %v2521_v1 = vadd.f32 %v4316_v5, %v1976_v37  ;;  %v2001_v60 = vpop.f32.mrb[115].mxu0  ;;  %v2512_v40 = vpop.f32.mrb[115].mxu1  ;;  %v2000_v51 = vadd.f32 %v5199_v45, %v1999_v54 }
 0x205   : > { %v2876_v10 = vmax.f32 %v2510_v53, 0.0  ;;  %v2513_v47 = vadd.f32 %v2512_v40, %v1968_v42 }
 0x206   : > { %v4117_v12 = vpack.c.bf16 %v2878_v21, %v2878_v21  ;;  %v2879_v41 = vmax.f32 %v2521_v1, 0.0 }
 0x207   : > { %v4115_v29 = vpack.c.bf16 %v2876_v10, %v2876_v10  ;;  %v2877_v16 = vmax.f32 %v2513_v47, 0.0 }
 0x208   : > { %3519 = vst.msk [vmem:[%s5223_s8 + $0xc8] sm:$0xf] %vm3468_vm1, %v4117_v12  ;;  %v4118_v31 = vpack.c.bf16 %v2879_v41, %v2879_v41 }
 0x209   : > { %3517 = vst.msk [vmem:[%s5223_s8 + $0xc0] sm:$0xf] %vm3468_vm1, %v4115_v29  ;;  %v4116_v59 = vpack.c.bf16 %v2877_v16, %v2877_v16  ;;  %v2004_v24 = vpop.f32.mrb[116].mxu0  ;;  %v4319_v11 = vpop.f32.mrb[116].mxu1 }
 0x20a   : > { %3520 = vst.msk [vmem:[%s5223_s8 + $0xcc] sm:$0xf] %vm3468_vm1, %v4118_v31  ;;  %v2534_v55 = vadd.f32 %v4319_v11, %v1989_v9  ;;  %v2006_v48 = vpop.f32.mrb[117].mxu0  ;;  %v2525_v15 = vpop.f32.mrb[117].mxu1  ;;  %v2005_v17 = vadd.f32 %v5199_v45, %v2004_v24 }
 0x20b   : > { %3518 = vst.msk [vmem:[%s5223_s8 + $0xc4] sm:$0xf] %vm3468_vm1, %v4116_v59  ;;  %v2526_v4 = vadd.f32 %v2525_v15, %v1981_v36  ;;  %v2007_v30 = vpop.f32.mrb[118].mxu0  ;;  %v4320_v46 = vpop.f32.mrb[118].mxu1 }
 0x20c   : > { %v2882_v52 = vmax.f32 %v2534_v55, 0.0  ;;  %v2537_v18 = vadd.f32 %v4320_v46, %v1992_v27  ;;  %v2009_v3 = vpop.f32.mrb[119].mxu0  ;;  %v2528_v58 = vpop.f32.mrb[119].mxu1  ;;  %v2008_v7 = vadd.f32 %v5199_v45, %v2007_v30 }
 0x20d   : > { %v2880_v39 = vmax.f32 %v2526_v4, 0.0  ;;  %v2529_v22 = vadd.f32 %v2528_v58, %v1984_v61 }
 0x20e   : > { %v4121_v28 = vpack.c.bf16 %v2882_v52, %v2882_v52  ;;  %v2883_v43 = vmax.f32 %v2537_v18, 0.0 }
 0x20f   : > { %v4119_v63 = vpack.c.bf16 %v2880_v39, %v2880_v39  ;;  %v2881_v33 = vmax.f32 %v2529_v22, 0.0 }
 0x210   : > { %3523 = vst.msk [vmem:[%s5223_s8 + $0xd8] sm:$0xf] %vm3468_vm1, %v4121_v28  ;;  %v4122_v0 = vpack.c.bf16 %v2883_v43, %v2883_v43 }
 0x211   : > { %3521 = vst.msk [vmem:[%s5223_s8 + $0xd0] sm:$0xf] %vm3468_vm1, %v4119_v63  ;;  %v4120_v35 = vpack.c.bf16 %v2881_v33, %v2881_v33  ;;  %v2012_v57 = vpop.f32.mrb[120].mxu0  ;;  %v4323_v19 = vpop.f32.mrb[120].mxu1 }
 0x212   : > { %3524 = vst.msk [vmem:[%s5223_s8 + $0xdc] sm:$0xf] %vm3468_vm1, %v4122_v0  ;;  %v2550_v37 = vadd.f32 %v4323_v19, %v2005_v17  ;;  %v2014_v13 = vpop.f32.mrb[121].mxu0  ;;  %v2541_v25 = vpop.f32.mrb[121].mxu1  ;;  %v2013_v16 = vadd.f32 %v5199_v45, %v2012_v57 }
 0x213   : > { %3522 = vst.msk [vmem:[%s5223_s8 + $0xd4] sm:$0xf] %vm3468_vm1, %v4120_v35  ;;  %v2542_v42 = vadd.f32 %v2541_v25, %v1997_v23  ;;  %v2015_v49 = vpop.f32.mrb[122].mxu0  ;;  %v4324_v53 = vpop.f32.mrb[122].mxu1 }
 0x214   : > { %v2886_v5 = vmax.f32 %v2550_v37, 0.0  ;;  %v2553_v21 = vadd.f32 %v4324_v53, %v2008_v7  ;;  %v2017_v1 = vpop.f32.mrb[123].mxu0  ;;  %v2544_v60 = vpop.f32.mrb[123].mxu1  ;;  %v2016_v27 = vadd.f32 %v5199_v45, %v2015_v49 }
 0x215   : > { %v2884_v40 = vmax.f32 %v2542_v42, 0.0  ;;  %v2545_v10 = vadd.f32 %v2544_v60, %v2000_v51 }
 0x216   : > { %v4125_v47 = vpack.c.bf16 %v2886_v5, %v2886_v5  ;;  %v2887_v12 = vmax.f32 %v2553_v21, 0.0 }
 0x217   : > { %v4123_v41 = vpack.c.bf16 %v2884_v40, %v2884_v40  ;;  %v2885_v29 = vmax.f32 %v2545_v10, 0.0 }
 0x218   : > { %3527 = vst.msk [vmem:[%s5223_s8 + $0xe8] sm:$0xf] %vm3468_vm1, %v4125_v47  ;;  %v4126_v54 = vpack.c.bf16 %v2887_v12, %v2887_v12 }
 0x219   : > { %3525 = vst.msk [vmem:[%s5223_s8 + $0xe0] sm:$0xf] %vm3468_vm1, %v4123_v41  ;;  %v4124_v9 = vpack.c.bf16 %v2885_v29, %v2885_v29  ;;  %v2020_v31 = vpop.f32.mrb[124].mxu0  ;;  %v4327_v36 = vpop.f32.mrb[124].mxu1 }
 0x21a   : > { %3528 = vst.msk [vmem:[%s5223_s8 + $0xec] sm:$0xf] %vm3468_vm1, %v4126_v54  ;;  %v2021_v59 = vadd.f32 %v5199_v45, %v2020_v31  ;;  %v2022_v24 = vpop.f32.mrb[125].mxu0  ;;  %v2557_v11 = vpop.f32.mrb[125].mxu1  ;;  %v5536_v54 = vld [vmem:[%s5817_s2] ss:$0 sm:$0xff] }
 0x21b   : > { %3526 = vst.msk [vmem:[%s5223_s8 + $0xe4] sm:$0xf] %vm3468_vm1, %v4124_v9  ;;  %v2558_v55 = vadd.f32 %v2557_v11, %v2013_v16  ;;  %v2023_v48 = vpop.f32.mrb[126].mxu0  ;;  %v4328_v15 = vpop.f32.mrb[126].mxu1 }
 0x21c   : > { %v2566_v61 = vadd.f32 %v4327_v36, %v2021_v59  ;;  %v2024_v4 = vadd.f32 %v5199_v45, %v2023_v48  ;;  %v2025_v30 = vpop.f32.mrb[127].mxu0  ;;  %v2560_v46 = vpop.f32.mrb[127].mxu1 }
 0x21d   : > { %v2888_v52 = vmax.f32 %v2558_v55, 0.0  ;;  %v2561_v18 = vadd.f32 %v2560_v46, %v2016_v27 }
 0x21e   : > { %v2890_v3 = vmax.f32 %v2566_v61, 0.0  ;;  %v2569_v58 = vadd.f32 %v4328_v15, %v2024_v4 }
 0x21f   : > { %v4127_v39 = vpack.c.bf16 %v2888_v52, %v2888_v52  ;;  %v2889_v22 = vmax.f32 %v2561_v18, 0.0 }
 0x220   : > { %v4129_v28 = vpack.c.bf16 %v2890_v3, %v2890_v3  ;;  %v2891_v43 = vmax.f32 %v2569_v58, 0.0 }
 0x221   : > { %3529 = vst.msk [vmem:[%s5223_s8 + $0xf0] sm:$0xf] %vm3468_vm1, %v4127_v39  ;;  %v4128_v63 = vpack.c.bf16 %v2889_v22, %v2889_v22  ;;  %v2028_v33 = vpop.f32.mrb[128].mxu0  ;;  %v4331_v17 = vpop.f32.mrb[128].mxu1 }
 0x222   : > { %3531 = vst.msk [vmem:[%s5223_s8 + $0xf8] sm:$0xf] %vm3468_vm1, %v4129_v28  ;;  %v4130_v0 = vpack.c.bf16 %v2891_v43, %v2891_v43  ;;  %v2029_v23 = vadd.f32 %v5199_v45, %v2028_v33  ;;  %v2030_v35 = vpop.f32.mrb[129].mxu0  ;;  %v2573_v57 = vpop.f32.mrb[129].mxu1 }
 0x223   : > { %3530 = vst.msk [vmem:[%s5223_s8 + $0xf4] sm:$0xf] %vm3468_vm1, %v4128_v63  ;;  %v2031_v19 = vpop.f32.mrb[130].mxu0  ;;  %v4332_v7 = vpop.f32.mrb[130].mxu1 }
 0x224   : > { %3532 = vst.msk [vmem:[%s5223_s8 + $0xfc] sm:$0xf] %vm3468_vm1, %v4130_v0  ;;  %v2574_v37 = vadd.f32 %v2573_v57, %v2029_v23  ;;  %v2032_v13 = vadd.f32 %v5199_v45, %v2031_v19  ;;  %v2033_v25 = vpop.f32.mrb[131].mxu0  ;;  %v2576_v51 = vpop.f32.mrb[131].mxu1 }
 0x226   : > { %v2892_v42 = vmax.f32 %v2574_v37, 0.0  ;;  %v2577_v49 = vadd.f32 %v2576_v51, %v2032_v13 }
 0x228   : > { %v4131_v53 = vpack.c.bf16 %v2892_v42, %v2892_v42  ;;  %v2893_v5 = vmax.f32 %v2577_v49, 0.0 }
 0x229   : > { %v2036_v21 = vpop.f32.mrb[132].mxu0  ;;  %v4335_v1 = vpop.f32.mrb[132].mxu1 }
 0x22a   : > { %3533 = vst.msk [vmem:[%s5223_s8 + $0x100] sm:$0xf] %vm3468_vm1, %v4131_v53  ;;  %v4132_v60 = vpack.c.bf16 %v2893_v5, %v2893_v5  ;;  %v2037_v40 = vadd.f32 %v5199_v45, %v2036_v21  ;;  %v2038_v10 = vpop.f32.mrb[133].mxu0  ;;  %v2589_v47 = vpop.f32.mrb[133].mxu1 }
 0x22b   : > { %v2039_v12 = vpop.f32.mrb[134].mxu0  ;;  %v4336_v41 = vpop.f32.mrb[134].mxu1 }
 0x22c   : > { %3534 = vst.msk [vmem:[%s5223_s8 + $0x104] sm:$0xf] %vm3468_vm1, %v4132_v60  ;;  %v2582_v29 = vadd.f32 %v4331_v17, %v2037_v40  ;;  %v2040_v16 = vadd.f32 %v5536_v54, %v2039_v12  ;;  %v2041_v9 = vpop.f32.mrb[135].mxu0  ;;  %v2592_v31 = vpop.f32.mrb[135].mxu1 }
 0x22e   : > { %v2894_v36 = vmax.f32 %v2582_v29, 0.0  ;;  %v2585_v45 = vadd.f32 %v4332_v7, %v2040_v16 }
 0x230   : > { %v4133_v59 = vpack.c.bf16 %v2894_v36, %v2894_v36  ;;  %v2895_v24 = vmax.f32 %v2585_v45, 0.0 }
 0x231   : > { %v2044_v11 = vpop.f32.mrb[136].mxu0  ;;  %v5539_v27 = vpop.f32.mrb[136].mxu1 }
 0x232   : > { %3535 = vst.msk [vmem:[%s5223_s8 + $0x108] sm:$0xf] %vm3468_vm1, %v4133_v59  ;;  %v4134_v55 = vpack.c.bf16 %v2895_v24, %v2895_v24  ;;  %v2045_v48 = vadd.f32 %v5536_v54, %v2044_v11  ;;  %v2046_v15 = vpop.f32.mrb[137].mxu0  ;;  %v2605_v61 = vpop.f32.mrb[137].mxu1 }
 0x233   : > { %v2047_v4 = vpop.f32.mrb[138].mxu0  ;;  %v4340_v30 = vpop.f32.mrb[138].mxu1 }
 0x234   : > { %3536 = vst.msk [vmem:[%s5223_s8 + $0x10c] sm:$0xf] %vm3468_vm1, %v4134_v55  ;;  %v2590_v46 = vadd.f32 %v2589_v47, %v2045_v48  ;;  %v2048_v52 = vadd.f32 %v5536_v54, %v2047_v4  ;;  %v2049_v18 = vpop.f32.mrb[139].mxu0  ;;  %v2608_v3 = vpop.f32.mrb[139].mxu1 }
 0x236   : > { %v2896_v58 = vmax.f32 %v2590_v46, 0.0  ;;  %v2593_v39 = vadd.f32 %v2592_v31, %v2048_v52 }
 0x238   : > { %v4135_v22 = vpack.c.bf16 %v2896_v58, %v2896_v58  ;;  %v2897_v28 = vmax.f32 %v2593_v39, 0.0 }
 0x239   : > { %v2052_v43 = vpop.f32.mrb[140].mxu0  ;;  %v5547_v63 = vpop.f32.mrb[140].mxu1 }
 0x23a   : > { %3537 = vst.msk [vmem:[%s5223_s8 + $0x110] sm:$0xf] %vm3468_vm1, %v4135_v22  ;;  %v4136_v33 = vpack.c.bf16 %v2897_v28, %v2897_v28  ;;  %v2053_v17 = vadd.f32 %v5536_v54, %v2052_v43  ;;  %v2054_v0 = vpop.f32.mrb[141].mxu0  ;;  %v2621_v23 = vpop.f32.mrb[141].mxu1 }
 0x23b   : > { %v2055_v35 = vpop.f32.mrb[142].mxu0  ;;  %v5552_v57 = vpop.f32.mrb[142].mxu1 }
 0x23c   : > { %3538 = vst.msk [vmem:[%s5223_s8 + $0x114] sm:$0xf] %vm3468_vm1, %v4136_v33  ;;  %v2598_v19 = vadd.f32 %v4335_v1, %v2053_v17  ;;  %v2056_v7 = vadd.f32 %v5536_v54, %v2055_v35  ;;  %v2057_v37 = vpop.f32.mrb[143].mxu0  ;;  %v2624_v13 = vpop.f32.mrb[143].mxu1 }
 0x23e   : > { %v2898_v25 = vmax.f32 %v2598_v19, 0.0  ;;  %v2601_v51 = vadd.f32 %v4336_v41, %v2056_v7 }
 0x240   : > { %v4137_v42 = vpack.c.bf16 %v2898_v25, %v2898_v25  ;;  %v2899_v49 = vmax.f32 %v2601_v51, 0.0 }
 0x241   : > { %v2060_v53 = vpop.f32.mrb[144].mxu0  ;;  %v5557_v5 = vpop.f32.mrb[144].mxu1 }
 0x242   : > { %3539 = vst.msk [vmem:[%s5223_s8 + $0x118] sm:$0xf] %vm3468_vm1, %v4137_v42  ;;  %v4138_v21 = vpack.c.bf16 %v2899_v49, %v2899_v49  ;;  %v2061_v60 = vadd.f32 %v5536_v54, %v2060_v53  ;;  %v2062_v40 = vpop.f32.mrb[145].mxu0  ;;  %v5562_v1 = vpop.f32.mrb[145].mxu1 }
 0x243   : > { %v2063_v10 = vpop.f32.mrb[146].mxu0  ;;  %v5564_v47 = vpop.f32.mrb[146].mxu1 }
 0x244   : > { %3540 = vst.msk [vmem:[%s5223_s8 + $0x11c] sm:$0xf] %vm3468_vm1, %v4138_v21  ;;  %v2606_v12 = vadd.f32 %v2605_v61, %v2061_v60  ;;  %v2064_v41 = vadd.f32 %v5536_v54, %v2063_v10  ;;  %v2065_v29 = vpop.f32.mrb[147].mxu0  ;;  %v5569_v16 = vpop.f32.mrb[147].mxu1 }
 0x246   : > { %v2900_v9 = vmax.f32 %v2606_v12, 0.0  ;;  %v2609_v31 = vadd.f32 %v2608_v3, %v2064_v41 }
 0x248   : > { %v4139_v36 = vpack.c.bf16 %v2900_v9, %v2900_v9  ;;  %v2901_v45 = vmax.f32 %v2609_v31, 0.0 }
 0x249   : > { %v2068_v59 = vpop.f32.mrb[148].mxu0  ;;  %v5571_v24 = vpop.f32.mrb[148].mxu1 }
 0x24a   : > { %3541 = vst.msk [vmem:[%s5223_s8 + $0x120] sm:$0xf] %vm3468_vm1, %v4139_v36  ;;  %v4140_v11 = vpack.c.bf16 %v2901_v45, %v2901_v45  ;;  %v2069_v55 = vadd.f32 %v5536_v54, %v2068_v59  ;;  %v2070_v48 = vpop.f32.mrb[149].mxu0  ;;  %v5576_v15 = vpop.f32.mrb[149].mxu1 }
 0x24b   : > { %v2071_v61 = vpop.f32.mrb[150].mxu0  ;;  %v5578_v4 = vpop.f32.mrb[150].mxu1 }
 0x24c   : > { %3542 = vst.msk [vmem:[%s5223_s8 + $0x124] sm:$0xf] %vm3468_vm1, %v4140_v11  ;;  %v2614_v46 = vadd.f32 %v5539_v27, %v2069_v55  ;;  %v2072_v52 = vadd.f32 %v5536_v54, %v2071_v61  ;;  %v2073_v18 = vpop.f32.mrb[151].mxu0  ;;  %v5584_v3 = vpop.f32.mrb[151].mxu1  ;;  %v2165_v55 = vadd.f32 %v5536_v54, %v4990_v14  ;;  %v2160_v14 = vadd.f32 %v5536_v54, %v4982_v8 }
 0x24e   : > { %v2902_v58 = vmax.f32 %v2614_v46, 0.0  ;;  %v2617_v39 = vadd.f32 %v4340_v30, %v2072_v52  ;;  %v2157_v46 = vadd.f32 %v5536_v54, %v4976_v2 }
 0x250   : > { %v4141_v22 = vpack.c.bf16 %v2902_v58, %v2902_v58  ;;  %v2903_v28 = vmax.f32 %v2617_v39, 0.0 }
 0x251   : > { %v2076_v43 = vpop.f32.mrb[152].mxu0  ;;  %v5586_v33 = vpop.f32.mrb[152].mxu1 }
 0x252   : > { %3543 = vst.msk [vmem:[%s5223_s8 + $0x128] sm:$0xf] %vm3468_vm1, %v4141_v22  ;;  %v4142_v17 = vpack.c.bf16 %v2903_v28, %v2903_v28  ;;  %v2077_v0 = vadd.f32 %v5536_v54, %v2076_v43  ;;  %v2078_v27 = vpop.f32.mrb[153].mxu0  ;;  %v5591_v35 = vpop.f32.mrb[153].mxu1 }
 0x253   : > { %v2079_v19 = vpop.f32.mrb[154].mxu0  ;;  %v5593_v7 = vpop.f32.mrb[154].mxu1 }
 0x254   : > { %3544 = vst.msk [vmem:[%s5223_s8 + $0x12c] sm:$0xf] %vm3468_vm1, %v4142_v17  ;;  %v2622_v30 = vadd.f32 %v2621_v23, %v2077_v0  ;;  %v2080_v37 = vadd.f32 %v5536_v54, %v2079_v19  ;;  %v2081_v25 = vpop.f32.mrb[155].mxu0  ;;  %v5598_v51 = vpop.f32.mrb[155].mxu1 }
 0x256   : > { %v2904_v42 = vmax.f32 %v2622_v30, 0.0  ;;  %v2625_v49 = vadd.f32 %v2624_v13, %v2080_v37 }
 0x258   : > { %v4143_v53 = vpack.c.bf16 %v2904_v42, %v2904_v42  ;;  %v2905_v21 = vmax.f32 %v2625_v49, 0.0 }
 0x259   : > { %v2084_v60 = vpop.f32.mrb[156].mxu0  ;;  %v5600_v40 = vpop.f32.mrb[156].mxu1 }
 0x25a   : > { %3545 = vst.msk [vmem:[%s5223_s8 + $0x130] sm:$0xf] %vm3468_vm1, %v4143_v53  ;;  %v4144_v10 = vpack.c.bf16 %v2905_v21, %v2905_v21  ;;  %v2085_v12 = vadd.f32 %v5536_v54, %v2084_v60  ;;  %v2086_v41 = vpop.f32.mrb[157].mxu0  ;;  %v5605_v23 = vpop.f32.mrb[157].mxu1 }
 0x25b   : > { %v2087_v29 = vpop.f32.mrb[158].mxu0  ;;  %v5607_v9 = vpop.f32.mrb[158].mxu1 }
 0x25c   : > { %3546 = vst.msk [vmem:[%s5223_s8 + $0x134] sm:$0xf] %vm3468_vm1, %v4144_v10  ;;  %v2630_v13 = vadd.f32 %v5547_v63, %v2085_v12  ;;  %v2088_v31 = vadd.f32 %v5536_v54, %v2087_v29  ;;  %v2089_v36 = vpop.f32.mrb[159].mxu0  ;;  %v5613_v45 = vpop.f32.mrb[159].mxu1  ;;  %v2168_v63 = vadd.f32 %v5536_v54, %v4996_v20 }
 0x25e   : > { %v2906_v59 = vmax.f32 %v2630_v13, 0.0  ;;  %v2633_v11 = vadd.f32 %v5552_v57, %v2088_v31  ;;  %v2173_v13 = vadd.f32 %v5536_v54, %v5004_v26  ;;  %v2176_v26 = vadd.f32 %v5536_v54, %v5010_v32 }
 0x260   : > { %v4145_v48 = vpack.c.bf16 %v2906_v59, %v2906_v59  ;;  %v2907_v61 = vmax.f32 %v2633_v11, 0.0  ;;  %v2184_v59 = vadd.f32 %v5536_v54, %v5024_v44 }
 0x261   : > { %v2092_v52 = vpop.f32.mrb[160].mxu0  ;;  %v4363_v18 = vpop.f32.mrb[160].mxu1 }
 0x262   : > { %3547 = vst.msk [vmem:[%s5223_s8 + $0x138] sm:$0xf] %vm3468_vm1, %v4145_v48  ;;  %v4146_v58 = vpack.c.bf16 %v2907_v61, %v2907_v61  ;;  %v2093_v39 = vadd.f32 %v5536_v54, %v2092_v52  ;;  %v2710_v57 = vadd.f32 %v4363_v18, %v2165_v55  ;;  %v2094_v22 = vpop.f32.mrb[161].mxu0  ;;  %v2701_v28 = vpop.f32.mrb[161].mxu1 }
 0x263   : > { %v2702_v43 = vadd.f32 %v2701_v28, %v2157_v46  ;;  %v2095_v17 = vpop.f32.mrb[162].mxu0  ;;  %v4364_v0 = vpop.f32.mrb[162].mxu1 }
 0x264   : > { %3548 = vst.msk [vmem:[%s5223_s8 + $0x13c] sm:$0xf] %vm3468_vm1, %v4146_v58  ;;  %v2638_v2 = vadd.f32 %v5562_v1, %v2093_v39  ;;  %v2926_v20 = vmax.f32 %v2710_v57, 0.0  ;;  %v2096_v27 = vadd.f32 %v5536_v54, %v2095_v17  ;;  %v2713_v19 = vadd.f32 %v4364_v0, %v2168_v63  ;;  %v2097_v30 = vpop.f32.mrb[163].mxu0  ;;  %v2704_v37 = vpop.f32.mrb[163].mxu1 }
 0x265   : > { %v2924_v25 = vmax.f32 %v2702_v43, 0.0  ;;  %v2705_v42 = vadd.f32 %v2704_v37, %v2160_v14  ;;  %v2181_v1 = vadd.f32 %v5536_v54, %v5018_v38  ;;  %v2189_v37 = vadd.f32 %v5536_v54, %v5032_v50 }
 0x266   : > { %v2908_v49 = vmax.f32 %v2638_v2, 0.0  ;;  %v4165_v53 = vpack.c.bf16 %v2926_v20, %v2926_v20  ;;  %v2641_v8 = vadd.f32 %v5569_v16, %v2096_v27  ;;  %v2927_v21 = vmax.f32 %v2713_v19, 0.0 }
 0x267   : > { %v4163_v60 = vpack.c.bf16 %v2924_v25, %v2924_v25  ;;  %v2925_v10 = vmax.f32 %v2705_v42, 0.0  ;;  %v2192_v50 = vadd.f32 %v5536_v54, %v5038_v56 }
 0x268   : > { %v4147_v12 = vpack.c.bf16 %v2908_v49, %v2908_v49  ;;  %3567 = vst.msk [vmem:[%s5223_s8 + $0x188] sm:$0xf] %vm3468_vm1, %v4165_v53  ;;  %v2909_v41 = vmax.f32 %v2641_v8, 0.0  ;;  %v4166_v29 = vpack.c.bf16 %v2927_v21, %v2927_v21  ;;  %v2200_v49 = vadd.f32 %v5536_v54, %v5052_v6 }
 0x269   : > { %3565 = vst.msk [vmem:[%s5223_s8 + $0x180] sm:$0xf] %vm3468_vm1, %v4163_v60  ;;  %v4164_v31 = vpack.c.bf16 %v2925_v10, %v2925_v10  ;;  %v2100_v16 = vpop.f32.mrb[164].mxu0  ;;  %v4367_v36 = vpop.f32.mrb[164].mxu1 }
 0x26a   : > { %3549 = vst.msk [vmem:[%s5223_s8 + $0x140] sm:$0xf] %vm3468_vm1, %v4147_v12  ;;  %v4148_v38 = vpack.c.bf16 %v2909_v41, %v2909_v41  ;;  %3568 = vst.msk [vmem:[%s5223_s8 + $0x18c] sm:$0xf] %vm3468_vm1, %v4166_v29  ;;  %v2101_v11 = vadd.f32 %v5536_v54, %v2100_v16  ;;  %v2726_v55 = vadd.f32 %v4367_v36, %v2181_v1  ;;  %v2102_v48 = vpop.f32.mrb[165].mxu0  ;;  %v2717_v61 = vpop.f32.mrb[165].mxu1 }
 0x26b   : > { %3566 = vst.msk [vmem:[%s5223_s8 + $0x184] sm:$0xf] %vm3468_vm1, %v4164_v31  ;;  %v2718_v46 = vadd.f32 %v2717_v61, %v2173_v13  ;;  %v2103_v52 = vpop.f32.mrb[166].mxu0  ;;  %v4368_v18 = vpop.f32.mrb[166].mxu1 }
 0x26c   : > { %3550 = vst.msk [vmem:[%s5223_s8 + $0x144] sm:$0xf] %vm3468_vm1, %v4148_v38  ;;  %v2646_v44 = vadd.f32 %v5557_v5, %v2101_v11  ;;  %v2930_v63 = vmax.f32 %v2726_v55, 0.0  ;;  %v2104_v58 = vadd.f32 %v5536_v54, %v2103_v52  ;;  %v2729_v39 = vadd.f32 %v4368_v18, %v2184_v59  ;;  %v2105_v57 = vpop.f32.mrb[167].mxu0  ;;  %v2720_v22 = vpop.f32.mrb[167].mxu1  ;;  %v5838_v18 = vld [vmem:[#allocation2_spill] sm:$0xff] }
 0x26d   : > { %v2928_v28 = vmax.f32 %v2718_v46, 0.0  ;;  %v2721_v14 = vadd.f32 %v2720_v22, %v2176_v26  ;;  %v2197_v5 = vadd.f32 %v5536_v54, %v5046_v62 }
 0x26e   : > { %v2910_v32 = vmax.f32 %v2646_v44, 0.0  ;;  %v4169_v43 = vpack.c.bf16 %v2930_v63, %v2930_v63  ;;  %v2649_v17 = vadd.f32 %v5564_v47, %v2104_v58  ;;  %v2931_v0 = vmax.f32 %v2729_v39, 0.0  ;;  %v5839_v39 = vld [vmem:[#allocation4_spill] sm:$0xff] }
 0x26f   : > { %v4167_v2 = vpack.c.bf16 %v2928_v28, %v2928_v28  ;;  %v2929_v20 = vmax.f32 %v2721_v14, 0.0  ;;  %v2205_v44 = vadd.f32 %v5536_v54, %v5838_v18  ;;  %v2216_v57 = vadd.f32 %v5536_v54, %v5839_v39 }
 0x270   : > { %v4149_v27 = vpack.c.bf16 %v2910_v32, %v2910_v32  ;;  %3571 = vst.msk [vmem:[%s5223_s8 + $0x198] sm:$0xf] %vm3468_vm1, %v4169_v43  ;;  %v2911_v19 = vmax.f32 %v2649_v17, 0.0  ;;  %v4170_v30 = vpack.c.bf16 %v2931_v0, %v2931_v0  ;;  %v5840_v43 = vld [vmem:[#allocation3_spill] sm:$0xff] }
 0x271   : > { %3569 = vst.msk [vmem:[%s5223_s8 + $0x190] sm:$0xf] %vm3468_vm1, %v4167_v2  ;;  %v4168_v25 = vpack.c.bf16 %v2929_v20, %v2929_v20  ;;  %v2108_v47 = vpop.f32.mrb[168].mxu0  ;;  %v4371_v42 = vpop.f32.mrb[168].mxu1  ;;  %v2208_v17 = vadd.f32 %v5536_v54, %v5840_v43 }
 0x272   : > { %3551 = vst.msk [vmem:[%s5223_s8 + $0x148] sm:$0xf] %vm3468_vm1, %v4149_v27  ;;  %v4150_v62 = vpack.c.bf16 %v2911_v19, %v2911_v19  ;;  %3572 = vst.msk [vmem:[%s5223_s8 + $0x19c] sm:$0xf] %vm3468_vm1, %v4170_v30  ;;  %v2109_v53 = vadd.f32 %v5536_v54, %v2108_v47  ;;  %v2742_v8 = vadd.f32 %v4371_v42, %v2197_v5  ;;  %v2110_v21 = vpop.f32.mrb[169].mxu0  ;;  %v2733_v60 = vpop.f32.mrb[169].mxu1 }
 0x273   : > { %3570 = vst.msk [vmem:[%s5223_s8 + $0x194] sm:$0xf] %vm3468_vm1, %v4168_v25  ;;  %v2734_v10 = vadd.f32 %v2733_v60, %v2189_v37  ;;  %v2111_v1 = vpop.f32.mrb[170].mxu0  ;;  %v4372_v12 = vpop.f32.mrb[170].mxu1 }
 0x274   : > { %3552 = vst.msk [vmem:[%s5223_s8 + $0x14c] sm:$0xf] %vm3468_vm1, %v4150_v62  ;;  %v2654_v6 = vadd.f32 %v5576_v15, %v2109_v53  ;;  %v2934_v41 = vmax.f32 %v2742_v8, 0.0  ;;  %v2112_v29 = vadd.f32 %v5536_v54, %v2111_v1  ;;  %v2745_v13 = vadd.f32 %v4372_v12, %v2200_v49  ;;  %v2113_v31 = vpop.f32.mrb[171].mxu0  ;;  %v2736_v16 = vpop.f32.mrb[171].mxu1 }
 0x275   : > { %v2932_v36 = vmax.f32 %v2734_v10, 0.0  ;;  %v2737_v59 = vadd.f32 %v2736_v16, %v2192_v50  ;;  %v2213_v15 = vadd.f32 %v5536_v54, %v5074_v34  ;;  %v5843_v31 = vld [vmem:[#allocation8_spill] sm:$0xff] }
 0x276   : > { %v2912_v56 = vmax.f32 %v2654_v6, 0.0  ;;  %v4173_v38 = vpack.c.bf16 %v2934_v41, %v2934_v41  ;;  %v2657_v11 = vadd.f32 %v5584_v3, %v2112_v29  ;;  %v2935_v55 = vmax.f32 %v2745_v13, 0.0  ;;  %v5842_v6 = vld [vmem:[#allocation5_spill] sm:$0xff] }
 0x277   : > { %v4171_v48 = vpack.c.bf16 %v2932_v36, %v2932_v36  ;;  %v2933_v61 = vmax.f32 %v2737_v59, 0.0  ;;  %v2221_v41 = vadd.f32 %v5536_v54, %v5842_v6  ;;  %v2232_v16 = vadd.f32 %v5536_v54, %v5843_v31 }
 0x278   : > { %v4151_v26 = vpack.c.bf16 %v2912_v56, %v2912_v56  ;;  %3575 = vst.msk [vmem:[%s5223_s8 + $0x1a8] sm:$0xf] %vm3468_vm1, %v4173_v38  ;;  %v2913_v46 = vmax.f32 %v2657_v11, 0.0  ;;  %v4174_v52 = vpack.c.bf16 %v2935_v55, %v2935_v55  ;;  %v5844_v55 = vld [vmem:[#allocation6_spill] sm:$0xff] }
 0x279   : > { %3573 = vst.msk [vmem:[%s5223_s8 + $0x1a0] sm:$0xf] %vm3468_vm1, %v4171_v48  ;;  %v4172_v63 = vpack.c.bf16 %v2933_v61, %v2933_v61  ;;  %v2116_v3 = vpop.f32.mrb[172].mxu0  ;;  %v4375_v58 = vpop.f32.mrb[172].mxu1  ;;  %v2224_v48 = vadd.f32 %v5536_v54, %v5844_v55 }
 0x27a   : > { %3553 = vst.msk [vmem:[%s5223_s8 + $0x150] sm:$0xf] %vm3468_vm1, %v4151_v26  ;;  %v4152_v34 = vpack.c.bf16 %v2913_v46, %v2913_v46  ;;  %3576 = vst.msk [vmem:[%s5223_s8 + $0x1ac] sm:$0xf] %vm3468_vm1, %v4174_v52  ;;  %v2117_v22 = vadd.f32 %v5536_v54, %v2116_v3  ;;  %v2758_v28 = vadd.f32 %v4375_v58, %v2213_v15  ;;  %v2118_v14 = vpop.f32.mrb[173].mxu0  ;;  %v2749_v32 = vpop.f32.mrb[173].mxu1 }
 0x27b   : > { %3574 = vst.msk [vmem:[%s5223_s8 + $0x1a4] sm:$0xf] %vm3468_vm1, %v4172_v63  ;;  %v2750_v0 = vadd.f32 %v2749_v32, %v2205_v44  ;;  %v2119_v2 = vpop.f32.mrb[174].mxu0  ;;  %v4376_v20 = vpop.f32.mrb[174].mxu1 }
 0x27c   : > { %3554 = vst.msk [vmem:[%s5223_s8 + $0x154] sm:$0xf] %vm3468_vm1, %v4152_v34  ;;  %v2662_v5 = vadd.f32 %v5571_v24, %v2117_v22  ;;  %v2938_v27 = vmax.f32 %v2758_v28, 0.0  ;;  %v2120_v19 = vadd.f32 %v5536_v54, %v2119_v2  ;;  %v2761_v30 = vadd.f32 %v4376_v20, %v2216_v57  ;;  %v2121_v37 = vpop.f32.mrb[175].mxu0  ;;  %v2752_v25 = vpop.f32.mrb[175].mxu1  ;;  %v5841_v24 = vld [vmem:[#allocation7_spill] sm:$0xff] }
 0x27d   : > { %v2936_v47 = vmax.f32 %v2750_v0, 0.0  ;;  %v2753_v42 = vadd.f32 %v2752_v25, %v2208_v17  ;;  %v2229_v50 = vadd.f32 %v5536_v54, %v5841_v24  ;;  %v5846_v20 = vld [vmem:[#allocation9_spill] sm:$0xff] }
 0x27e   : > { %v2914_v49 = vmax.f32 %v2662_v5, 0.0  ;;  %v4177_v62 = vpack.c.bf16 %v2938_v27, %v2938_v27  ;;  %v2665_v53 = vadd.f32 %v5578_v4, %v2120_v19  ;;  %v2939_v8 = vmax.f32 %v2761_v30, 0.0  ;;  %v5847_v30 = vld [vmem:[#allocation12_spill] sm:$0xff] }
 0x27f   : > { %v4175_v21 = vpack.c.bf16 %v2936_v47, %v2936_v47  ;;  %v2937_v60 = vmax.f32 %v2753_v42, 0.0  ;;  %v2237_v5 = vadd.f32 %v5536_v54, %v5846_v20  ;;  %v2248_v37 = vadd.f32 %v5536_v54, %v5847_v30 }
 0x280   : > { %v4153_v10 = vpack.c.bf16 %v2914_v49, %v2914_v49  ;;  %3579 = vst.msk [vmem:[%s5223_s8 + $0x1b8] sm:$0xf] %vm3468_vm1, %v4177_v62  ;;  %v2915_v1 = vmax.f32 %v2665_v53, 0.0  ;;  %v4178_v12 = vpack.c.bf16 %v2939_v8, %v2939_v8  ;;  %v5848_v53 = vld [vmem:[#allocation10_spill] sm:$0xff] }
 0x281   : > { %3577 = vst.msk [vmem:[%s5223_s8 + $0x1b0] sm:$0xf] %vm3468_vm1, %v4175_v21  ;;  %v4176_v29 = vpack.c.bf16 %v2937_v60, %v2937_v60  ;;  %v2124_v4 = vpop.f32.mrb[176].mxu0  ;;  %v4379_v13 = vpop.f32.mrb[176].mxu1  ;;  %v2240_v8 = vadd.f32 %v5536_v54, %v5848_v53  ;;  %v5854_v53 = vld [vmem:[#allocation17_spill] sm:$0xff] }
 0x282   : > { %3555 = vst.msk [vmem:[%s5223_s8 + $0x158] sm:$0xf] %vm3468_vm1, %v4153_v10  ;;  %v4154_v36 = vpack.c.bf16 %v2915_v1, %v2915_v1  ;;  %3580 = vst.msk [vmem:[%s5223_s8 + $0x1bc] sm:$0xf] %vm3468_vm1, %v4178_v12  ;;  %v2125_v59 = vadd.f32 %v5536_v54, %v2124_v4  ;;  %v2774_v56 = vadd.f32 %v4379_v13, %v2229_v50  ;;  %v2126_v38 = vpop.f32.mrb[177].mxu0  ;;  %v2765_v11 = vpop.f32.mrb[177].mxu1 }
 0x283   : > { %3578 = vst.msk [vmem:[%s5223_s8 + $0x1b4] sm:$0xf] %vm3468_vm1, %v4176_v29  ;;  %v2766_v61 = vadd.f32 %v2765_v11, %v2221_v41  ;;  %v2127_v15 = vpop.f32.mrb[178].mxu0  ;;  %v4380_v26 = vpop.f32.mrb[178].mxu1 }
 0x284   : > { %3556 = vst.msk [vmem:[%s5223_s8 + $0x15c] sm:$0xf] %vm3468_vm1, %v4154_v36  ;;  %v2670_v46 = vadd.f32 %v5591_v35, %v2125_v59  ;;  %v2942_v52 = vmax.f32 %v2774_v56, 0.0  ;;  %v2128_v18 = vadd.f32 %v5536_v54, %v2127_v15  ;;  %v2777_v44 = vadd.f32 %v4380_v26, %v2232_v16  ;;  %v2129_v63 = vpop.f32.mrb[179].mxu0  ;;  %v2768_v3 = vpop.f32.mrb[179].mxu1  ;;  %v5845_v35 = vld [vmem:[#allocation11_spill] sm:$0xff] }
 0x285   : > { %v2940_v58 = vmax.f32 %v2766_v61, 0.0  ;;  %v2769_v39 = vadd.f32 %v2768_v3, %v2224_v48  ;;  %v2245_v43 = vadd.f32 %v5536_v54, %v5845_v35  ;;  %v5850_v61 = vld [vmem:[#allocation13_spill] sm:$0xff] }
 0x286   : > { %v2916_v57 = vmax.f32 %v2670_v46, 0.0  ;;  %v4181_v34 = vpack.c.bf16 %v2942_v52, %v2942_v52  ;;  %v2673_v22 = vadd.f32 %v5598_v51, %v2128_v18  ;;  %v2943_v28 = vmax.f32 %v2777_v44, 0.0  ;;  %v5851_v52 = vld [vmem:[#allocation16_spill] sm:$0xff] }
 0x287   : > { %v4179_v14 = vpack.c.bf16 %v2940_v58, %v2940_v58  ;;  %v2941_v32 = vmax.f32 %v2769_v39, 0.0  ;;  %v2253_v15 = vadd.f32 %v5536_v54, %v5850_v61  ;;  %v2264_v18 = vadd.f32 %v5536_v54, %v5851_v52 }
 0x288   : > { %v4155_v17 = vpack.c.bf16 %v2916_v57, %v2916_v57  ;;  %3583 = vst.msk [vmem:[%s5223_s8 + $0x1c8] sm:$0xf] %vm3468_vm1, %v4181_v34  ;;  %v2917_v0 = vmax.f32 %v2673_v22, 0.0  ;;  %v4182_v2 = vpack.c.bf16 %v2943_v28, %v2943_v28  ;;  %v5852_v57 = vld [vmem:[#allocation14_spill] sm:$0xff] }
 0x289   : > { %3581 = vst.msk [vmem:[%s5223_s8 + $0x1c0] sm:$0xf] %vm3468_vm1, %v4179_v14  ;;  %v4180_v27 = vpack.c.bf16 %v2941_v32, %v2941_v32  ;;  %v2132_v51 = vpop.f32.mrb[180].mxu0  ;;  %v4383_v19 = vpop.f32.mrb[180].mxu1  ;;  %v2256_v34 = vadd.f32 %v5536_v54, %v5852_v57 }
 0x28a   : > { %3557 = vst.msk [vmem:[%s5223_s8 + $0x160] sm:$0xf] %vm3468_vm1, %v4155_v17  ;;  %v4156_v25 = vpack.c.bf16 %v2917_v0, %v2917_v0  ;;  %3584 = vst.msk [vmem:[%s5223_s8 + $0x1cc] sm:$0xf] %vm3468_vm1, %v4182_v2  ;;  %v2133_v47 = vadd.f32 %v5536_v54, %v2132_v51  ;;  %v2790_v42 = vadd.f32 %v4383_v19, %v2245_v43  ;;  %v2134_v49 = vpop.f32.mrb[181].mxu0  ;;  %v2781_v62 = vpop.f32.mrb[181].mxu1 }
 0x28b   : > { %3582 = vst.msk [vmem:[%s5223_s8 + $0x1c4] sm:$0xf] %vm3468_vm1, %v4180_v27  ;;  %v2782_v21 = vadd.f32 %v2781_v62, %v2237_v5  ;;  %v2135_v60 = vpop.f32.mrb[182].mxu0  ;;  %v4384_v24 = vpop.f32.mrb[182].mxu1 }
 0x28c   : > { %3558 = vst.msk [vmem:[%s5223_s8 + $0x164] sm:$0xf] %vm3468_vm1, %v4156_v25  ;;  %v2678_v50 = vadd.f32 %v5586_v33, %v2133_v47  ;;  %v2946_v10 = vmax.f32 %v2790_v42, 0.0  ;;  %v2136_v1 = vadd.f32 %v5536_v54, %v2135_v60  ;;  %v2793_v12 = vadd.f32 %v4384_v24, %v2248_v37  ;;  %v2137_v6 = vpop.f32.mrb[183].mxu0  ;;  %v2784_v41 = vpop.f32.mrb[183].mxu1  ;;  %v5849_v33 = vld [vmem:[#allocation15_spill] sm:$0xff] }
 0x28d   : > { %v2944_v29 = vmax.f32 %v2782_v21, 0.0  ;;  %v2785_v4 = vadd.f32 %v2784_v41, %v2240_v8  ;;  %v2261_v38 = vadd.f32 %v5536_v54, %v5849_v33  ;;  %v2269_v8 = vadd.f32 %v5536_v54, %v5854_v53  ;;  %v5855_v24 = vld [vmem:[#allocation20_spill] sm:$0xff] }
 0x28e   : > { %v2918_v13 = vmax.f32 %v2678_v50, 0.0  ;;  %v4185_v31 = vpack.c.bf16 %v2946_v10, %v2946_v10  ;;  %v2681_v16 = vadd.f32 %v5593_v7, %v2136_v1  ;;  %v2947_v36 = vmax.f32 %v2793_v12, 0.0 }
 0x28f   : > { %v4183_v59 = vpack.c.bf16 %v2944_v29, %v2944_v29  ;;  %v2945_v56 = vmax.f32 %v2785_v4, 0.0  ;;  %v2280_v50 = vadd.f32 %v5536_v54, %v5855_v24  ;;  %v5856_v29 = vld [vmem:[#allocation18_spill] sm:$0xff] }
 0x290   : > { %v4157_v11 = vpack.c.bf16 %v2918_v13, %v2918_v13  ;;  %3587 = vst.msk [vmem:[%s5223_s8 + $0x1d8] sm:$0xf] %vm3468_vm1, %v4185_v31  ;;  %v2919_v55 = vmax.f32 %v2681_v16, 0.0  ;;  %v4186_v48 = vpack.c.bf16 %v2947_v36, %v2947_v36  ;;  %v2272_v4 = vadd.f32 %v5536_v54, %v5856_v29 }
 0x291   : > { %3585 = vst.msk [vmem:[%s5223_s8 + $0x1d0] sm:$0xf] %vm3468_vm1, %v4183_v59  ;;  %v4184_v26 = vpack.c.bf16 %v2945_v56, %v2945_v56  ;;  %v2140_v7 = vpop.f32.mrb[184].mxu0  ;;  %v4387_v46 = vpop.f32.mrb[184].mxu1 }
 0x292   : > { %3559 = vst.msk [vmem:[%s5223_s8 + $0x168] sm:$0xf] %vm3468_vm1, %v4157_v11  ;;  %v4158_v44 = vpack.c.bf16 %v2919_v55, %v2919_v55  ;;  %3588 = vst.msk [vmem:[%s5223_s8 + $0x1dc] sm:$0xf] %vm3468_vm1, %v4186_v48  ;;  %v2141_v63 = vadd.f32 %v5536_v54, %v2140_v7  ;;  %v2806_v3 = vadd.f32 %v4387_v46, %v2261_v38  ;;  %v2142_v58 = vpop.f32.mrb[185].mxu0  ;;  %v2797_v39 = vpop.f32.mrb[185].mxu1 }
 0x293   : > { %3586 = vst.msk [vmem:[%s5223_s8 + $0x1d4] sm:$0xf] %vm3468_vm1, %v4184_v26  ;;  %v2798_v22 = vadd.f32 %v2797_v39, %v2253_v15  ;;  %v2143_v28 = vpop.f32.mrb[186].mxu0  ;;  %v4388_v14 = vpop.f32.mrb[186].mxu1 }
 0x294   : > { %3560 = vst.msk [vmem:[%s5223_s8 + $0x16c] sm:$0xf] %vm3468_vm1, %v4158_v44  ;;  %v2686_v32 = vadd.f32 %v5605_v23, %v2141_v63  ;;  %v2950_v35 = vmax.f32 %v2806_v3, 0.0  ;;  %v2144_v43 = vadd.f32 %v5536_v54, %v2143_v28  ;;  %v2809_v17 = vadd.f32 %v4388_v14, %v2264_v18  ;;  %v2145_v0 = vpop.f32.mrb[187].mxu0  ;;  %v2800_v2 = vpop.f32.mrb[187].mxu1  ;;  %v5853_v23 = vld [vmem:[#allocation19_spill] sm:$0xff] }
 0x295   : > { %v2948_v20 = vmax.f32 %v2798_v22, 0.0  ;;  %v2801_v5 = vadd.f32 %v2800_v2, %v2256_v34  ;;  %v2277_v47 = vadd.f32 %v5536_v54, %v5853_v23 }
 0x296   : > { %v2920_v27 = vmax.f32 %v2686_v32, 0.0  ;;  %v4189_v51 = vpack.c.bf16 %v2950_v35, %v2950_v35  ;;  %v2689_v19 = vadd.f32 %v5613_v45, %v2144_v43  ;;  %v2951_v30 = vmax.f32 %v2809_v17, 0.0 }
 0x297   : > { %v4187_v37 = vpack.c.bf16 %v2948_v20, %v2948_v20  ;;  %v2949_v25 = vmax.f32 %v2801_v5, 0.0 }
 0x298   : > { %v4159_v42 = vpack.c.bf16 %v2920_v27, %v2920_v27  ;;  %3591 = vst.msk [vmem:[%s5223_s8 + $0x1e8] sm:$0xf] %vm3468_vm1, %v4189_v51  ;;  %v2921_v49 = vmax.f32 %v2689_v19, 0.0  ;;  %v4190_v62 = vpack.c.bf16 %v2951_v30, %v2951_v30 }
 0x299   : > { %3589 = vst.msk [vmem:[%s5223_s8 + $0x1e0] sm:$0xf] %vm3468_vm1, %v4187_v37  ;;  %v4188_v21 = vpack.c.bf16 %v2949_v25, %v2949_v25  ;;  %v2148_v45 = vpop.f32.mrb[188].mxu0  ;;  %v4391_v60 = vpop.f32.mrb[188].mxu1 }
 0x29a   : > { %3561 = vst.msk [vmem:[%s5223_s8 + $0x170] sm:$0xf] %vm3468_vm1, %v4159_v42  ;;  %v4160_v10 = vpack.c.bf16 %v2921_v49, %v2921_v49  ;;  %3592 = vst.msk [vmem:[%s5223_s8 + $0x1ec] sm:$0xf] %vm3468_vm1, %v4190_v62  ;;  %v2149_v1 = vadd.f32 %v5536_v54, %v2148_v45  ;;  %v2822_v12 = vadd.f32 %v4391_v60, %v2277_v47  ;;  %v2150_v6 = vpop.f32.mrb[189].mxu0  ;;  %v2813_v41 = vpop.f32.mrb[189].mxu1 }
 0x29b   : > { %3590 = vst.msk [vmem:[%s5223_s8 + $0x1e4] sm:$0xf] %vm3468_vm1, %v4188_v21  ;;  %v2814_v13 = vadd.f32 %v2813_v41, %v2269_v8  ;;  %v2151_v31 = vpop.f32.mrb[190].mxu0  ;;  %v4392_v16 = vpop.f32.mrb[190].mxu1 }
 0x29c   : > { %3562 = vst.msk [vmem:[%s5223_s8 + $0x174] sm:$0xf] %vm3468_vm1, %v4160_v10  ;;  %v2694_v36 = vadd.f32 %v5600_v40, %v2149_v1  ;;  %v2954_v59 = vmax.f32 %v2822_v12, 0.0  ;;  %v2152_v56 = vadd.f32 %v5536_v54, %v2151_v31  ;;  %v2825_v33 = vadd.f32 %v4392_v16, %v2280_v50  ;;  %v2153_v38 = vpop.f32.mrb[191].mxu0  ;;  %v2816_v11 = vpop.f32.mrb[191].mxu1 }
 0x29d   : > { %v2952_v55 = vmax.f32 %v2814_v13, 0.0  ;;  %v2817_v48 = vadd.f32 %v2816_v11, %v2272_v4 }
 0x29e   : > { %v2922_v61 = vmax.f32 %v2694_v36, 0.0  ;;  %v4193_v15 = vpack.c.bf16 %v2954_v59, %v2954_v59  ;;  %v2697_v26 = vadd.f32 %v5607_v9, %v2152_v56  ;;  %v2955_v7 = vmax.f32 %v2825_v33, 0.0 }
 0x29f   : > { %v4191_v46 = vpack.c.bf16 %v2952_v55, %v2952_v55  ;;  %v2953_v40 = vmax.f32 %v2817_v48, 0.0 }
 0x2a0   : > { %v4161_v52 = vpack.c.bf16 %v2922_v61, %v2922_v61  ;;  %3595 = vst.msk [vmem:[%s5223_s8 + $0x1f8] sm:$0xf] %vm3468_vm1, %v4193_v15  ;;  %v2923_v54 = vmax.f32 %v2697_v26, 0.0  ;;  %v4194_v18 = vpack.c.bf16 %v2955_v7, %v2955_v7 }
 0x2a1   : > { %3593 = vst.msk [vmem:[%s5223_s8 + $0x1f0] sm:$0xf] %vm3468_vm1, %v4191_v46  ;;  %v4192_v44 = vpack.c.bf16 %v2953_v40, %v2953_v40 }
 0x2a2   : > { %3563 = vst.msk [vmem:[%s5223_s8 + $0x178] sm:$0xf] %vm3468_vm1, %v4161_v52  ;;  %v4162_v63 = vpack.c.bf16 %v2923_v54, %v2923_v54  ;;  %3596 = vst.msk [vmem:[%s5223_s8 + $0x1fc] sm:$0xf] %vm3468_vm1, %v4194_v18 }
 0x2a3   : > { %3594 = vst.msk [vmem:[%s5223_s8 + $0x1f4] sm:$0xf] %vm3468_vm1, %v4192_v44 }
 0x2a4   : > { %3564 = vst.msk [vmem:[%s5223_s8 + $0x17c] sm:$0xf] %vm3468_vm1, %v4162_v63 }
 0x2a5 PF: > { %s13_s12 = sadd.s32 1, %s4716_s12  }
 0x2a6   : > { %p10_p4 = scmp.ge.s32.totalorder %s13_s12, 4  }
 0x2a8   :  { %12 = sbr.rel (!%p10_p4) target bundleno = 1 (0x1), region = 62 }

// kernel: simple_cifar_cnn_forward.6
= control target key start
LH: loop header
LB: loop body
LE: loop exit
PB: predicated region body
PF: predicated region fallthrough
CT: control target
= control target key end

     0   :  { %s515_s6 = smov 0   ;;  %s828_s0 = inlined_call_operand.vmem [shape: bf16[32,2,16,128], index: 0, kind: input, shape index: {}]   ;;  %s829_s1 = inlined_call_operand.vmem [shape: bf16[32,16,64], index: 1, kind: output, shape index: {}]  }
   0x1 LB: > { %s472_s7 = sadd.s32 4294967295, %s502_s6   ;;  %p476_p0 = scmp.ge.s32.totalorder %s502_s6, 1  ;;  %s502_s6 = sphi %s515_s6, %s11_s6  }
   0x2   : > { %p89_p1 = scmp.lt.s32.totalorder %s502_s6, 3 }
   0x4   : > { %p90_p2 = pnand %p476_p0, %p89_p1 }
   0x5   : > { %s477_s8 = sshll.u32 (!%p90_p2), %s472_s7, 4  ;;  %s504_s13 = smov (!%p90_p2), 64   ;;  %vm381_vm0 = vcmask (!%p90_p2), 519168  }
   0x6   : > { %93 = sbr.rel (%p90_p2) target bundleno = 198 (0xc6), region = 24  ;;  %p112_p3 = scmp.lt.s32.totalorder (!%p90_p2), %s477_s8, 31 }
   0xd   : > { %s831_s8 = smov (!%p112_p3, %s477_s8), 31 }
   0xe   : > { %s485_s9 = sshll.u32 %s831_s8, 4  ;;  %s486_s14 = sshll.u32 %s831_s8, 3 }
   0xf   : > { %s529_s12 = scalar_lea.vmem %s828_s0, %s485_s9  ;;  %s727_s17 = scalar_lea.vmem %s829_s1, %s486_s14 }
  0x10   : > { %v129_v0 = vld [vmem:[%s529_s12 + $0x10] sm:$0xf]  ;;  %v131_v1 = vld [vmem:[%s529_s12 + $0x18] sm:$0xf]  ;;  %v125_v2 = vld [vmem:[%s529_s12] sm:$0xf] }
  0x11   : > { %v534_v3 = vmax.bf16 %v131_v1, %v129_v0  ;;  %v127_v4 = vld [vmem:[%s529_s12 + $0x8] sm:$0xf]  ;;  %v130_v5 = vld [vmem:[%s529_s12 + $0x14] sm:$0xf]  ;;  %v132_v6 = vld [vmem:[%s529_s12 + $0x1c] sm:$0xf] }
  0x12   : > { %v539_v7 = vmax.bf16 %v127_v4, %v125_v2  ;;  %v126_v8 = vld [vmem:[%s529_s12 + $0x4] sm:$0xf]  ;;  %v128_v9 = vld [vmem:[%s529_s12 + $0xc] sm:$0xf]  ;;  %v545_v10 = vmax.bf16 %v132_v6, %v130_v5  ;;  %v133_v14 = vld [vmem:[%s529_s12 + $0x20] sm:$0xf] }
  0x13   : > { %257 = vrot.lane.b32.xlu1 %v534_v3, %s504_s13  ;;  %v549_v11 = vmax.bf16 %v128_v9, %v126_v8  ;;  %v134_v12 = vld [vmem:[%s529_s12 + $0x24] sm:$0xf]  ;;  %v136_v13 = vld [vmem:[%s529_s12 + $0x2c] sm:$0xf]  ;;  %v135_v15 = vld [vmem:[%s529_s12 + $0x28] sm:$0xf] }
  0x14   : > { %253 = vrot.lane.b32.xlu0 %v539_v7, %s504_s13  ;;  %v557_v16 = vmax.bf16 %v136_v13, %v134_v12  ;;  %v561_v17 = vmax.bf16 %v135_v15, %v133_v14  ;;  %v138_v18 = vld [vmem:[%s529_s12 + $0x34] sm:$0xf]  ;;  %v140_v19 = vld [vmem:[%s529_s12 + $0x3c] sm:$0xf]  ;;  %v137_v20 = vld [vmem:[%s529_s12 + $0x30] sm:$0xf] }
  0x15   : > { %v139_v21 = vld [vmem:[%s529_s12 + $0x38] sm:$0xf]  ;;  %v569_v22 = vmax.bf16 %v140_v19, %v138_v18  ;;  %v142_v24 = vld [vmem:[%s529_s12 + $0x44] sm:$0xf]  ;;  %v144_v25 = vld [vmem:[%s529_s12 + $0x4c] sm:$0xf] }
  0x16   : > { %v573_v23 = vmax.bf16 %v139_v21, %v137_v20  ;;  %v141_v26 = vld [vmem:[%s529_s12 + $0x40] sm:$0xf]  ;;  %v143_v27 = vld [vmem:[%s529_s12 + $0x48] sm:$0xf]  ;;  %v581_v28 = vmax.bf16 %v144_v25, %v142_v24  ;;  %v146_v30 = vld [vmem:[%s529_s12 + $0x54] sm:$0xf] }
  0x17   : > { %259 = vrot.lane.b32.xlu1 %v545_v10, %s504_s13  ;;  %v585_v29 = vmax.bf16 %v143_v27, %v141_v26  ;;  %v148_v31 = vld [vmem:[%s529_s12 + $0x5c] sm:$0xf]  ;;  %v145_v32 = vld [vmem:[%s529_s12 + $0x50] sm:$0xf]  ;;  %v147_v33 = vld [vmem:[%s529_s12 + $0x58] sm:$0xf] }
  0x18   : > { %255 = vrot.lane.b32.xlu0 %v549_v11, %s504_s13  ;;  %v593_v34 = vmax.bf16 %v148_v31, %v146_v30  ;;  %v597_v35 = vmax.bf16 %v147_v33, %v145_v32  ;;  %v150_v36 = vld [vmem:[%s529_s12 + $0x64] sm:$0xf]  ;;  %v152_v37 = vld [vmem:[%s529_s12 + $0x6c] sm:$0xf]  ;;  %v149_v38 = vld [vmem:[%s529_s12 + $0x60] sm:$0xf] }
  0x19   : > { %v151_v39 = vld [vmem:[%s529_s12 + $0x68] sm:$0xf]  ;;  %v605_v40 = vmax.bf16 %v152_v37, %v150_v36  ;;  %v154_v42 = vld [vmem:[%s529_s12 + $0x74] sm:$0xf]  ;;  %v156_v43 = vld [vmem:[%s529_s12 + $0x7c] sm:$0xf] }
  0x1a   : > { %v609_v41 = vmax.bf16 %v151_v39, %v149_v38  ;;  %v153_v44 = vld [vmem:[%s529_s12 + $0x70] sm:$0xf]  ;;  %v155_v45 = vld [vmem:[%s529_s12 + $0x78] sm:$0xf]  ;;  %v617_v46 = vmax.bf16 %v156_v43, %v154_v42  ;;  %v158_v48 = vld [vmem:[%s529_s12 + $0x84] sm:$0xf] }
  0x1b   : > { %263 = vrot.lane.b32.xlu1 %v557_v16, %s504_s13  ;;  %v621_v47 = vmax.bf16 %v155_v45, %v153_v44  ;;  %v160_v49 = vld [vmem:[%s529_s12 + $0x8c] sm:$0xf]  ;;  %v157_v50 = vld [vmem:[%s529_s12 + $0x80] sm:$0xf]  ;;  %v159_v51 = vld [vmem:[%s529_s12 + $0x88] sm:$0xf] }
  0x1c   : > { %261 = vrot.lane.b32.xlu0 %v561_v17, %s504_s13  ;;  %v629_v52 = vmax.bf16 %v160_v49, %v158_v48  ;;  %v633_v53 = vmax.bf16 %v159_v51, %v157_v50  ;;  %v162_v54 = vld [vmem:[%s529_s12 + $0x94] sm:$0xf]  ;;  %v164_v55 = vld [vmem:[%s529_s12 + $0x9c] sm:$0xf]  ;;  %v161_v56 = vld [vmem:[%s529_s12 + $0x90] sm:$0xf] }
  0x1d   : > { %v163_v57 = vld [vmem:[%s529_s12 + $0x98] sm:$0xf]  ;;  %v641_v58 = vmax.bf16 %v164_v55, %v162_v54  ;;  %v166_v60 = vld [vmem:[%s529_s12 + $0xa4] sm:$0xf]  ;;  %v168_v61 = vld [vmem:[%s529_s12 + $0xac] sm:$0xf] }
  0x1e   : > { %v645_v59 = vmax.bf16 %v163_v57, %v161_v56  ;;  %v165_v62 = vld [vmem:[%s529_s12 + $0xa0] sm:$0xf]  ;;  %v167_v63 = vld [vmem:[%s529_s12 + $0xa8] sm:$0xf]  ;;  %v653_v0 = vmax.bf16 %v168_v61, %v166_v60  ;;  %v170_v2 = vld [vmem:[%s529_s12 + $0xb4] sm:$0xf] }
  0x1f   : > { %267 = vrot.lane.b32.xlu1 %v569_v22, %s504_s13  ;;  %v657_v1 = vmax.bf16 %v167_v63, %v165_v62  ;;  %v172_v4 = vld [vmem:[%s529_s12 + $0xbc] sm:$0xf]  ;;  %v169_v5 = vld [vmem:[%s529_s12 + $0xb0] sm:$0xf]  ;;  %v171_v6 = vld [vmem:[%s529_s12 + $0xb8] sm:$0xf] }
  0x20   : > { %265 = vrot.lane.b32.xlu0 %v573_v23, %s504_s13  ;;  %v665_v8 = vmax.bf16 %v172_v4, %v170_v2  ;;  %v669_v9 = vmax.bf16 %v171_v6, %v169_v5  ;;  %v174_v12 = vld [vmem:[%s529_s12 + $0xc4] sm:$0xf]  ;;  %v176_v13 = vld [vmem:[%s529_s12 + $0xcc] sm:$0xf]  ;;  %v173_v14 = vld [vmem:[%s529_s12 + $0xc0] sm:$0xf] }
  0x21   : > { %v175_v15 = vld [vmem:[%s529_s12 + $0xc8] sm:$0xf]  ;;  %v677_v18 = vmax.bf16 %v176_v13, %v174_v12  ;;  %v178_v20 = vld [vmem:[%s529_s12 + $0xd4] sm:$0xf]  ;;  %v180_v21 = vld [vmem:[%s529_s12 + $0xdc] sm:$0xf] }
  0x22   : > { %v681_v19 = vmax.bf16 %v175_v15, %v173_v14  ;;  %v177_v24 = vld [vmem:[%s529_s12 + $0xd0] sm:$0xf]  ;;  %v179_v25 = vld [vmem:[%s529_s12 + $0xd8] sm:$0xf]  ;;  %v689_v26 = vmax.bf16 %v180_v21, %v178_v20  ;;  %v182_v30 = vld [vmem:[%s529_s12 + $0xe4] sm:$0xf] }
  0x23   : > { %271 = vrot.lane.b32.xlu1 %v581_v28, %s504_s13  ;;  %v693_v27 = vmax.bf16 %v179_v25, %v177_v24  ;;  %v184_v31 = vld [vmem:[%s529_s12 + $0xec] sm:$0xf]  ;;  %v181_v32 = vld [vmem:[%s529_s12 + $0xe0] sm:$0xf]  ;;  %v183_v33 = vld [vmem:[%s529_s12 + $0xe8] sm:$0xf] }
  0x24   : > { %269 = vrot.lane.b32.xlu0 %v585_v29, %s504_s13  ;;  %v701_v36 = vmax.bf16 %v184_v31, %v182_v30  ;;  %v705_v37 = vmax.bf16 %v183_v33, %v181_v32  ;;  %v186_v38 = vld [vmem:[%s529_s12 + $0xf4] sm:$0xf]  ;;  %v188_v39 = vld [vmem:[%s529_s12 + $0xfc] sm:$0xf]  ;;  %v185_v42 = vld [vmem:[%s529_s12 + $0xf0] sm:$0xf] }
  0x25   : > { %v187_v43 = vld [vmem:[%s529_s12 + $0xf8] sm:$0xf]  ;;  %v713_v44 = vmax.bf16 %v188_v39, %v186_v38 }
  0x26   : > { %v717_v45 = vmax.bf16 %v187_v43, %v185_v42 }
  0x27   : > { %275 = vrot.lane.b32.xlu1 %v593_v34, %s504_s13 }
  0x28   : > { %273 = vrot.lane.b32.xlu0 %v597_v35, %s504_s13 }
  0x2b   : > { %279 = vrot.lane.b32.xlu1 %v605_v40, %s504_s13 }
  0x2c   : > { %277 = vrot.lane.b32.xlu0 %v609_v41, %s504_s13 }
  0x2f   : > { %283 = vrot.lane.b32.xlu1 %v617_v46, %s504_s13 }
  0x30   : > { %281 = vrot.lane.b32.xlu0 %v621_v47, %s504_s13 }
  0x33   : > { %287 = vrot.lane.b32.xlu1 %v629_v52, %s504_s13 }
  0x34   : > { %285 = vrot.lane.b32.xlu0 %v633_v53, %s504_s13 }
  0x37   : > { %291 = vrot.lane.b32.xlu1 %v641_v58, %s504_s13 }
  0x38   : > { %289 = vrot.lane.b32.xlu0 %v645_v59, %s504_s13 }
  0x3b   : > { %295 = vrot.lane.b32.xlu1 %v653_v0, %s504_s13 }
  0x3c   : > { %293 = vrot.lane.b32.xlu0 %v657_v1, %s504_s13 }
  0x3f   : > { %299 = vrot.lane.b32.xlu1 %v665_v8, %s504_s13 }
  0x40   : > { %297 = vrot.lane.b32.xlu0 %v669_v9, %s504_s13 }
  0x43   : > { %303 = vrot.lane.b32.xlu1 %v677_v18, %s504_s13 }
  0x44   : > { %301 = vrot.lane.b32.xlu0 %v681_v19, %s504_s13 }
  0x47   : > { %307 = vrot.lane.b32.xlu1 %v689_v26, %s504_s13 }
  0x48   : > { %305 = vrot.lane.b32.xlu0 %v693_v27, %s504_s13 }
  0x4b   : > { %311 = vrot.lane.b32.xlu1 %v701_v36, %s504_s13 }
  0x4c   : > { %309 = vrot.lane.b32.xlu0 %v705_v37, %s504_s13 }
  0x4f   : > { %315 = vrot.lane.b32.xlu1 %v713_v44, %s504_s13 }
  0x50   : > { %313 = vrot.lane.b32.xlu0 %v717_v45, %s504_s13 }
  0x85   : > { %v258_v48 = vpop.permute.xlu1 %257 }
  0x86   : > { %v351_v49 = vmax.bf16 %v258_v48, %v534_v3  ;;  %v254_v50 = vpop.permute.xlu0 %253 }
  0x87   : > { %v349_v51 = vmax.bf16 %v254_v50, %v539_v7 }
  0x88   : > { %384 = vst.msk [vmem:[%s727_s17 + $0x8] sm:$0xf] %vm381_vm0, %v351_v49 }
  0x89   : > { %382 = vst.msk [vmem:[%s727_s17] sm:$0xf] %vm381_vm0, %v349_v51  ;;  %v260_v54 = vpop.permute.xlu1 %259 }
  0x8a   : > { %v352_v55 = vmax.bf16 %v260_v54, %v545_v10  ;;  %v256_v56 = vpop.permute.xlu0 %255 }
  0x8b   : > { %v350_v57 = vmax.bf16 %v256_v56, %v549_v11 }
  0x8c   : > { %385 = vst.msk [vmem:[%s727_s17 + $0xc] sm:$0xf] %vm381_vm0, %v352_v55 }
  0x8d   : > { %383 = vst.msk [vmem:[%s727_s17 + $0x4] sm:$0xf] %vm381_vm0, %v350_v57  ;;  %v264_v3 = vpop.permute.xlu1 %263 }
  0x8e   : > { %v354_v7 = vmax.bf16 %v264_v3, %v557_v16  ;;  %v262_v60 = vpop.permute.xlu0 %261 }
  0x8f   : > { %v353_v61 = vmax.bf16 %v262_v60, %v561_v17 }
  0x90   : > { %387 = vst.msk [vmem:[%s727_s17 + $0x14] sm:$0xf] %vm381_vm0, %v354_v7 }
  0x91   : > { %386 = vst.msk [vmem:[%s727_s17 + $0x10] sm:$0xf] %vm381_vm0, %v353_v61  ;;  %v268_v10 = vpop.permute.xlu1 %267 }
  0x92   : > { %v356_v11 = vmax.bf16 %v268_v10, %v569_v22  ;;  %v266_v62 = vpop.permute.xlu0 %265 }
  0x93   : > { %v355_v63 = vmax.bf16 %v266_v62, %v573_v23 }
  0x94   : > { %389 = vst.msk [vmem:[%s727_s17 + $0x1c] sm:$0xf] %vm381_vm0, %v356_v11 }
  0x95   : > { %388 = vst.msk [vmem:[%s727_s17 + $0x18] sm:$0xf] %vm381_vm0, %v355_v63  ;;  %v272_v16 = vpop.permute.xlu1 %271 }
  0x96   : > { %v358_v17 = vmax.bf16 %v272_v16, %v581_v28  ;;  %v270_v2 = vpop.permute.xlu0 %269 }
  0x97   : > { %v357_v4 = vmax.bf16 %v270_v2, %v585_v29 }
  0x98   : > { %391 = vst.msk [vmem:[%s727_s17 + $0x24] sm:$0xf] %vm381_vm0, %v358_v17 }
  0x99   : > { %390 = vst.msk [vmem:[%s727_s17 + $0x20] sm:$0xf] %vm381_vm0, %v357_v4  ;;  %v276_v22 = vpop.permute.xlu1 %275 }
  0x9a   : > { %v360_v23 = vmax.bf16 %v276_v22, %v593_v34  ;;  %v274_v5 = vpop.permute.xlu0 %273 }
  0x9b   : > { %v359_v6 = vmax.bf16 %v274_v5, %v597_v35 }
  0x9c   : > { %393 = vst.msk [vmem:[%s727_s17 + $0x2c] sm:$0xf] %vm381_vm0, %v360_v23 }
  0x9d   : > { %392 = vst.msk [vmem:[%s727_s17 + $0x28] sm:$0xf] %vm381_vm0, %v359_v6  ;;  %v280_v28 = vpop.permute.xlu1 %279 }
  0x9e   : > { %v362_v29 = vmax.bf16 %v280_v28, %v605_v40  ;;  %v278_v12 = vpop.permute.xlu0 %277 }
  0x9f   : > { %v361_v13 = vmax.bf16 %v278_v12, %v609_v41 }
  0xa0   : > { %395 = vst.msk [vmem:[%s727_s17 + $0x34] sm:$0xf] %vm381_vm0, %v362_v29 }
  0xa1   : > { %394 = vst.msk [vmem:[%s727_s17 + $0x30] sm:$0xf] %vm381_vm0, %v361_v13  ;;  %v284_v34 = vpop.permute.xlu1 %283 }
  0xa2   : > { %v364_v35 = vmax.bf16 %v284_v34, %v617_v46  ;;  %v282_v14 = vpop.permute.xlu0 %281 }
  0xa3   : > { %v363_v15 = vmax.bf16 %v282_v14, %v621_v47 }
  0xa4   : > { %397 = vst.msk [vmem:[%s727_s17 + $0x3c] sm:$0xf] %vm381_vm0, %v364_v35 }
  0xa5   : > { %396 = vst.msk [vmem:[%s727_s17 + $0x38] sm:$0xf] %vm381_vm0, %v363_v15  ;;  %v288_v40 = vpop.permute.xlu1 %287 }
  0xa6   : > { %v366_v41 = vmax.bf16 %v288_v40, %v629_v52  ;;  %v286_v20 = vpop.permute.xlu0 %285 }
  0xa7   : > { %v365_v21 = vmax.bf16 %v286_v20, %v633_v53 }
  0xa8   : > { %399 = vst.msk [vmem:[%s727_s17 + $0x44] sm:$0xf] %vm381_vm0, %v366_v41 }
  0xa9   : > { %398 = vst.msk [vmem:[%s727_s17 + $0x40] sm:$0xf] %vm381_vm0, %v365_v21  ;;  %v292_v46 = vpop.permute.xlu1 %291 }
  0xaa   : > { %v368_v47 = vmax.bf16 %v292_v46, %v641_v58  ;;  %v290_v24 = vpop.permute.xlu0 %289 }
  0xab   : > { %v367_v25 = vmax.bf16 %v290_v24, %v645_v59 }
  0xac   : > { %401 = vst.msk [vmem:[%s727_s17 + $0x4c] sm:$0xf] %vm381_vm0, %v368_v47 }
  0xad   : > { %400 = vst.msk [vmem:[%s727_s17 + $0x48] sm:$0xf] %vm381_vm0, %v367_v25  ;;  %v296_v52 = vpop.permute.xlu1 %295 }
  0xae   : > { %v370_v53 = vmax.bf16 %v296_v52, %v653_v0  ;;  %v294_v30 = vpop.permute.xlu0 %293 }
  0xaf   : > { %v369_v31 = vmax.bf16 %v294_v30, %v657_v1 }
  0xb0   : > { %403 = vst.msk [vmem:[%s727_s17 + $0x54] sm:$0xf] %vm381_vm0, %v370_v53 }
  0xb1   : > { %402 = vst.msk [vmem:[%s727_s17 + $0x50] sm:$0xf] %vm381_vm0, %v369_v31  ;;  %v300_v58 = vpop.permute.xlu1 %299 }
  0xb2   : > { %v372_v59 = vmax.bf16 %v300_v58, %v665_v8  ;;  %v298_v32 = vpop.permute.xlu0 %297 }
  0xb3   : > { %v371_v33 = vmax.bf16 %v298_v32, %v669_v9 }
  0xb4   : > { %405 = vst.msk [vmem:[%s727_s17 + $0x5c] sm:$0xf] %vm381_vm0, %v372_v59 }
  0xb5   : > { %404 = vst.msk [vmem:[%s727_s17 + $0x58] sm:$0xf] %vm381_vm0, %v371_v33  ;;  %v304_v0 = vpop.permute.xlu1 %303 }
  0xb6   : > { %v374_v1 = vmax.bf16 %v304_v0, %v677_v18  ;;  %v302_v38 = vpop.permute.xlu0 %301 }
  0xb7   : > { %v373_v39 = vmax.bf16 %v302_v38, %v681_v19 }
  0xb8   : > { %407 = vst.msk [vmem:[%s727_s17 + $0x64] sm:$0xf] %vm381_vm0, %v374_v1 }
  0xb9   : > { %406 = vst.msk [vmem:[%s727_s17 + $0x60] sm:$0xf] %vm381_vm0, %v373_v39  ;;  %v308_v8 = vpop.permute.xlu1 %307 }
  0xba   : > { %v376_v9 = vmax.bf16 %v308_v8, %v689_v26  ;;  %v306_v42 = vpop.permute.xlu0 %305 }
  0xbb   : > { %v375_v43 = vmax.bf16 %v306_v42, %v693_v27 }
  0xbc   : > { %409 = vst.msk [vmem:[%s727_s17 + $0x6c] sm:$0xf] %vm381_vm0, %v376_v9 }
  0xbd   : > { %408 = vst.msk [vmem:[%s727_s17 + $0x68] sm:$0xf] %vm381_vm0, %v375_v43  ;;  %v312_v18 = vpop.permute.xlu1 %311 }
  0xbe   : > { %v378_v48 = vmax.bf16 %v312_v18, %v701_v36  ;;  %v310_v19 = vpop.permute.xlu0 %309 }
  0xbf   : > { %v377_v49 = vmax.bf16 %v310_v19, %v705_v37 }
  0xc0   : > { %411 = vst.msk [vmem:[%s727_s17 + $0x74] sm:$0xf] %vm381_vm0, %v378_v48 }
  0xc1   : > { %410 = vst.msk [vmem:[%s727_s17 + $0x70] sm:$0xf] %vm381_vm0, %v377_v49  ;;  %v316_v50 = vpop.permute.xlu1 %315 }
  0xc2   : > { %v380_v26 = vmax.bf16 %v316_v50, %v713_v44  ;;  %v314_v51 = vpop.permute.xlu0 %313 }
  0xc3   : > { %v379_v27 = vmax.bf16 %v314_v51, %v717_v45 }
  0xc4   : > { %413 = vst.msk [vmem:[%s727_s17 + $0x7c] sm:$0xf] %vm381_vm0, %v380_v26 }
  0xc5   : > { %412 = vst.msk [vmem:[%s727_s17 + $0x78] sm:$0xf] %vm381_vm0, %v379_v27 }
  0xc6 PF: > { %s11_s6 = sadd.s32 1, %s502_s6  }
  0xc7   : > { %p8_p4 = scmp.ge.s32.totalorder %s11_s6, 4  }
  0xc9   :  { %10 = sbr.rel (!%p8_p4) target bundleno = 1 (0x1), region = 54 }

// kernel: simple_cifar_cnn_forward.7
= control target key start
LH: loop header
LB: loop body
LE: loop exit
PB: predicated region body
PF: predicated region fallthrough
CT: control target
= control target key end

     0   :  { %10 = vsyncpa [#allocation4], 0  ;;  %s4464_s18 = smov 0   ;;  %s4466_s19 = smov 0   ;;  %s4896_s0 = inlined_call_operand.vmem [shape: bf16[2,16384], index: 0, kind: input, shape index: {}]   ;;  %s4897_s1 = inlined_call_operand.vmem [shape: bf16[16384,128], index: 1, kind: input, shape index: {}]   ;;  %s4898_s2 = inlined_call_operand.vmem [shape: f32[1,128], index: 2, kind: input, shape index: {}]   ;;  %s4899_s3 = inlined_call_operand.vmem [shape: f32[128,10], index: 3, kind: input, shape index: {}]   ;;  %s4900_s4 = inlined_call_operand.vmem [shape: f32[1,10], index: 4, kind: input, shape index: {}]   ;;  %s4901_s5 = inlined_call_operand.hbm [shape: f32[2,10], index: 5, kind: output, shape index: {}]  }
   0x1   :  { %s4468_s20 = smov 0  }
   0x2 LB: > { %s3379_s21 = sadd.s32 4294967295, %s4426_s20   ;;  %s25_s22 = sadd.s32 1, %s4422_s19  ;;  %s4426_s20 = sphi %s4468_s20, %s16_s20   ;;  %s4422_s19 = sphi %s4466_s19, %s4904_s19   ;;  %s4418_s18 = sphi %s4464_s18, %s4903_s18  }
   0x3   : > { %p26_p0 = scmp.ge.s32.totalorder %s25_s22, 4  ;;  %p3382_p1 = scmp.ge.s32.totalorder %s4426_s20, 1 }
   0x4   : > { %p217_p2 = scmp.lt.s32.totalorder %s4426_s20, 5 }
   0x5   : > { %s4906_s22 = smov (%p26_p0, %s25_s22), 0 }
   0x6   : > { %p218_p3 = pnand %p3382_p1, %p217_p2 }
   0x7   : > { %s3383_s23 = sshll.u32 (!%p218_p3), %s4418_s18, 5  ;;  %s3384_s24 = sshll.u32 (!%p218_p3), %s4418_s18, 9 }
   0x8   : > { %221 = sbr.rel (%p218_p3) target bundleno = 755 (0x2f3), region = 40  ;;  %p251_p4 = scmp.lt.s32.totalorder (!%p218_p3), %s3383_s23, 127 }
   0x9   : > { %p258_p5 = scmp.lt.s32.totalorder (!%p218_p3), %s3384_s24, 2047  ;;  %p3386_p6 = scmp.ne.s32.totalorder (!%p218_p3), %s4418_s18, 0 }
   0xf   : > { %s4908_s23 = smov (!%p251_p4, %s3383_s23), 127  ;;  %s4910_s24 = smov (!%p258_p5, %s3384_s24), 2047 }
  0x10   : > { %s4490_s27 = scalar_lea.vmem %s4896_s0, %s4908_s23  ;;  %s3385_s28 = sshll.u32 %s4910_s24, 2  ;;  %v4428_v0 = vmov (!%p3386_p6), 0.0  }
  0x11   : > { %s4495_s6 = scalar_lea.vmem %s4897_s1, %s3385_s28  ;;  %267 = sbr.rel (%p3386_p6) target bundleno = 24 (0x18), region = 44  ;;  %268 = vst [vmem:[#allocation2] sm:$0x3] (!%p3386_p6), %v4428_v0 }
  0x18 PF: > { %v4114_v1 = vld [vmem:[%s4495_s6 + $0x40] sm:$0xff]   ;;  %v4118_v5 = vld [vmem:[%s4495_s6 + $0x48] sm:$0xff]   ;;  %v4122_v9 = vld [vmem:[%s4495_s6 + $0x50] sm:$0xff]   ;;  %v794_v29 = vlaneseq  ;;  %v4429_v37 = vmov 1966171168   ;;  %p3643_p7 = scmp.ne.s32.totalorder %s4418_s18, 3 }
  0x19   : > { %v4115_v2 = vld [vmem:[%s4495_s6 + $0xc0] sm:$0xff]   ;;  %3650 = vmatprep.subr.bf16.mxu0 %v4114_v1  ;;  %v4119_v6 = vld [vmem:[%s4495_s6 + $0xc8] sm:$0xff]   ;;  %v4123_v10 = vld [vmem:[%s4495_s6 + $0xd0] sm:$0xff]   ;;  %v792_v38 = vunpack.c.l.s4 %v4429_v37  ;;  %vm4431_vm0 = vmmov (!%p3643_p7), 0   ;;  %vm3303_vm1 = vcmask (!%p3643_p7), 74752  }
  0x1a   : > { %v4116_v3 = vld [vmem:[%s4495_s6] sm:$0xff]   ;;  %3672 = vmatprep.subr.bf16.mxu1 %v4115_v2  ;;  %v4120_v7 = vld [vmem:[%s4495_s6 + $0x8] sm:$0xff]   ;;  %v4124_v11 = vld [vmem:[%s4495_s6 + $0x10] sm:$0xff]   ;;  %v795_v34 = vshrl.u32 %v794_v29, 7 }
  0x1b   : > { %v4117_v4 = vld [vmem:[%s4495_s6 + $0x80] sm:$0xff]   ;;  %3651 = vmatpush3.bf16.msra.mxu0 %v4116_v3  ;;  %v4121_v8 = vld [vmem:[%s4495_s6 + $0x88] sm:$0xff]   ;;  %v4125_v12 = vld [vmem:[%s4495_s6 + $0x90] sm:$0xff]   ;;  %v793_v41 = vunpack.c.0.s8 %v792_v38 }
  0x1c   : > { %3673 = vmatpush3.bf16.msra.mxu1 %v4117_v4  ;;  %3652 = vmatprep.subr.bf16.mxu0 %v4118_v5  ;;  %v4126_v13 = vld [vmem:[%s4495_s6 + $0x58] sm:$0xff]   ;;  %v4130_v17 = vld [vmem:[%s4495_s6 + $0x60] sm:$0xff]   ;;  %v4134_v21 = vld [vmem:[%s4495_s6 + $0x68] sm:$0xff]  }
  0x1d   : > { %3674 = vmatprep.subr.bf16.mxu1 %v4119_v6  ;;  %v4127_v14 = vld [vmem:[%s4495_s6 + $0xd8] sm:$0xff]   ;;  %v4131_v18 = vld [vmem:[%s4495_s6 + $0xe0] sm:$0xff]   ;;  %v4135_v22 = vld [vmem:[%s4495_s6 + $0xe8] sm:$0xff]   ;;  %v4533_v42 = vsub.s32 %v793_v41, %v795_v34 }
  0x1e   : > { %v4128_v15 = vld [vmem:[%s4495_s6 + $0x18] sm:$0xff]   ;;  %v4132_v19 = vld [vmem:[%s4495_s6 + $0x20] sm:$0xff]   ;;  %v4136_v23 = vld [vmem:[%s4495_s6 + $0x28] sm:$0xff]  }
  0x1f   : > { %3653 = vmatpush3.bf16.msra.mxu0 %v4120_v7  ;;  %v4129_v16 = vld [vmem:[%s4495_s6 + $0x98] sm:$0xff]   ;;  %v4133_v20 = vld [vmem:[%s4495_s6 + $0xa0] sm:$0xff]   ;;  %v4137_v24 = vld [vmem:[%s4495_s6 + $0xa8] sm:$0xff]  }
  0x20   : > { %3675 = vmatpush3.bf16.msra.mxu1 %v4121_v8  ;;  %3654 = vmatprep.subr.bf16.mxu0 %v4122_v9  ;;  %v4138_v25 = vld [vmem:[%s4495_s6 + $0x70] sm:$0xff]   ;;  %v4142_v30 = vld [vmem:[%s4495_s6 + $0x78] sm:$0xff]   ;;  %v270_v35 = vld [vmem:[%s4490_s27] sm:$0xff] }
  0x21   : > { %3676 = vmatprep.subr.bf16.mxu1 %v4123_v10  ;;  %v4139_v26 = vld [vmem:[%s4495_s6 + $0xf0] sm:$0xff]   ;;  %v4143_v31 = vld [vmem:[%s4495_s6 + $0xf8] sm:$0xff]   ;;  %v4147_v36 = vld [vmem:[%s4495_s6 + $0x140] sm:$0xff]   ;;  %v790_v40 = vcombine.high %v270_v35, %v270_v35  ;;  %v797_v43 = vrot.slane %v270_v35, %v4533_v42 }
  0x22   : > { %v4140_v27 = vld [vmem:[%s4495_s6 + $0x30] sm:$0xff]   ;;  %v4144_v32 = vld [vmem:[%s4495_s6 + $0x38] sm:$0xff]   ;;  %v4148_v39 = vld [vmem:[%s4495_s6 + $0x1c0] sm:$0xff]  }
  0x23   : > { %3655 = vmatpush3.bf16.msra.mxu0 %v4124_v11  ;;  %v4141_v28 = vld [vmem:[%s4495_s6 + $0xb0] sm:$0xff]   ;;  %v4145_v33 = vld [vmem:[%s4495_s6 + $0xb8] sm:$0xff]   ;;  %v4537_v44 = vrot.slane %v790_v40, %v4533_v42  ;;  %v805_v45 = vcombine.high %v797_v43, %v797_v43  ;;  %v813_v46 = vrot.slane %v797_v43, %v4533_v42  ;;  %v4149_v48 = vld [vmem:[%s4495_s6 + $0x100] sm:$0xff]  }
  0x24   : > { %3677 = vmatpush3.bf16.msra.mxu1 %v4125_v12  ;;  %3656 = vmatprep.subr.bf16.mxu0 %v4126_v13  ;;  %v4150_v50 = vld [vmem:[%s4495_s6 + $0x180] sm:$0xff]   ;;  %v4151_v53 = vld [vmem:[%s4495_s6 + $0x148] sm:$0xff]   ;;  %v4155_v59 = vld [vmem:[%s4495_s6 + $0x150] sm:$0xff]  }
  0x25   : > { %3678 = vmatprep.subr.bf16.mxu1 %v4127_v14  ;;  %v806_v47 = vcombine.high %v4537_v44, %v4537_v44  ;;  %v827_v49 = vrot.slane %v805_v45, %v4533_v42  ;;  %v835_v52 = vcombine.high %v813_v46, %v813_v46  ;;  %v4152_v55 = vld [vmem:[%s4495_s6 + $0x1c8] sm:$0xff]   ;;  %v4156_v60 = vld [vmem:[%s4495_s6 + $0x1d0] sm:$0xff]   ;;  %v4159_v63 = vld [vmem:[%s4495_s6 + $0x158] sm:$0xff]  }
  0x26   : > { %v4153_v56 = vld [vmem:[%s4495_s6 + $0x108] sm:$0xff]   ;;  %v4157_v61 = vld [vmem:[%s4495_s6 + $0x110] sm:$0xff]   ;;  %v4160_v0 = vld [vmem:[%s4495_s6 + $0x1d8] sm:$0xff]  }
  0x27   : > { %3657 = vmatpush3.bf16.msra.mxu0 %v4128_v15  ;;  %v834_v51 = vrot.slane %v806_v47, %v4533_v42  ;;  %2586 = vmatprep.mubr.bf16.mxu0 %v827_v49  ;;  %v837_v54 = vcombine.high %v827_v49, %v827_v49  ;;  %v4154_v58 = vld [vmem:[%s4495_s6 + $0x188] sm:$0xff]   ;;  %v4158_v62 = vld [vmem:[%s4495_s6 + $0x190] sm:$0xff]   ;;  %v4161_v1 = vld [vmem:[%s4495_s6 + $0x118] sm:$0xff]  }
  0x28   : > { %3679 = vmatpush3.bf16.msra.mxu1 %v4129_v16  ;;  %3658 = vmatprep.subr.bf16.mxu0 %v4130_v17  ;;  %v4162_v2 = vld [vmem:[%s4495_s6 + $0x198] sm:$0xff]   ;;  %v4163_v3 = vld [vmem:[%s4495_s6 + $0x160] sm:$0xff]   ;;  %v4167_v7 = vld [vmem:[%s4495_s6 + $0x168] sm:$0xff]  }
  0x29   : > { %3680 = vmatprep.subr.bf16.mxu1 %v4131_v18  ;;  %v838_v57 = vcombine.high %v834_v51, %v834_v51  ;;  %2626 = vmatprep.mubr.bf16.mxu1 %v837_v54  ;;  %v4164_v4 = vld [vmem:[%s4495_s6 + $0x1e0] sm:$0xff]   ;;  %v4168_v8 = vld [vmem:[%s4495_s6 + $0x1e8] sm:$0xff]   ;;  %v4171_v11 = vld [vmem:[%s4495_s6 + $0x170] sm:$0xff]  }
  0x2a   : > { %v4165_v5 = vld [vmem:[%s4495_s6 + $0x120] sm:$0xff]   ;;  %v4169_v9 = vld [vmem:[%s4495_s6 + $0x128] sm:$0xff]   ;;  %v4172_v12 = vld [vmem:[%s4495_s6 + $0x1f0] sm:$0xff]  }
  0x2b   : > { %3659 = vmatpush3.bf16.msra.mxu0 %v4132_v19  ;;  %v4166_v6 = vld [vmem:[%s4495_s6 + $0x1a0] sm:$0xff]   ;;  %v4170_v10 = vld [vmem:[%s4495_s6 + $0x1a8] sm:$0xff]   ;;  %v4173_v13 = vld [vmem:[%s4495_s6 + $0x130] sm:$0xff]   ;;  %v820_v19 = vrot.slane %v4537_v44, %v4533_v42 }
  0x2c   : > { %3681 = vmatpush3.bf16.msra.mxu1 %v4133_v20  ;;  %3660 = vmatprep.subr.bf16.mxu0 %v4134_v21  ;;  %v4174_v14 = vld [vmem:[%s4495_s6 + $0x1b0] sm:$0xff]   ;;  %v4175_v15 = vld [vmem:[%s4495_s6 + $0x178] sm:$0xff]   ;;  %v4179_v20 = vld [vmem:[%s4495_s6 + $0x240] sm:$0xff]  }
  0x2d   : > { %3682 = vmatprep.subr.bf16.mxu1 %v4135_v22  ;;  %v4176_v16 = vld [vmem:[%s4495_s6 + $0x1f8] sm:$0xff]   ;;  %v4180_v21 = vld [vmem:[%s4495_s6 + $0x2c0] sm:$0xff]   ;;  %v4187_v29 = vld [vmem:[%s4495_s6 + $0x250] sm:$0xff]  }
  0x2e   : > { %v4177_v17 = vld [vmem:[%s4495_s6 + $0x138] sm:$0xff]   ;;  %v4181_v22 = vld [vmem:[%s4495_s6 + $0x200] sm:$0xff]   ;;  %v4199_v41 = vld [vmem:[%s4495_s6 + $0x268] sm:$0xff]  }
  0x2f   : > { %3661 = vmatpush3.bf16.msra.mxu0 %v4136_v23  ;;  %v4178_v18 = vld [vmem:[%s4495_s6 + $0x1b8] sm:$0xff]   ;;  %v4182_v23 = vld [vmem:[%s4495_s6 + $0x280] sm:$0xff]   ;;  %v4200_v43 = vld [vmem:[%s4495_s6 + $0x2e8] sm:$0xff]  }
  0x30   : > { %3683 = vmatpush3.bf16.msra.mxu1 %v4137_v24  ;;  %3662 = vmatprep.subr.bf16.mxu0 %v4138_v25  ;;  %v836_v24 = vcombine.high %v820_v19, %v820_v19  ;;  %v4183_v25 = vld [vmem:[%s4495_s6 + $0x248] sm:$0xff]   ;;  %v4192_v34 = vld [vmem:[%s4495_s6 + $0x2d8] sm:$0xff]   ;;  %v4195_v37 = vld [vmem:[%s4495_s6 + $0x260] sm:$0xff]  }
  0x31   : > { %3684 = vmatprep.subr.bf16.mxu1 %v4139_v26  ;;  %v4184_v26 = vld [vmem:[%s4495_s6 + $0x2c8] sm:$0xff]   ;;  %v4193_v35 = vld [vmem:[%s4495_s6 + $0x218] sm:$0xff]   ;;  %v4196_v38 = vld [vmem:[%s4495_s6 + $0x2e0] sm:$0xff]  }
  0x32   : > { %v4198_v40 = vld [vmem:[%s4495_s6 + $0x2a0] sm:$0xff]   ;;  %v4201_v44 = vld [vmem:[%s4495_s6 + $0x228] sm:$0xff]  }
  0x33   : > { %3663 = vmatpush3.bf16.msra.mxu0 %v4140_v27  ;;  %v4185_v27 = vld [vmem:[%s4495_s6 + $0x208] sm:$0xff]  }
  0x34   : > { %3685 = vmatpush3.bf16.msra.mxu1 %v4141_v28  ;;  %3664 = vmatprep.subr.bf16.mxu0 %v4142_v30  ;;  %v4186_v28 = vld [vmem:[%s4495_s6 + $0x288] sm:$0xff]   ;;  %v4188_v30 = vld [vmem:[%s4495_s6 + $0x2d0] sm:$0xff]  }
  0x35   : > { %3686 = vmatprep.subr.bf16.mxu1 %v4143_v31  ;;  %v4189_v31 = vld [vmem:[%s4495_s6 + $0x210] sm:$0xff]   ;;  %v4202_v45 = vld [vmem:[%s4495_s6 + $0x2a8] sm:$0xff]  }
  0x36   : > { %v271_v47 = vld [vmem:[%s4490_s27 + $0x8] sm:$0xff] }
  0x37   : > { %3665 = vmatpush3.bf16.msra.mxu0 %v4144_v32  ;;  %v4190_v32 = vld [vmem:[%s4495_s6 + $0x290] sm:$0xff]   ;;  %v846_v49 = vrot.slane %v271_v47, %v4533_v42 }
  0x38   : > { %3687 = vmatpush3.bf16.msra.mxu1 %v4145_v33  ;;  %3694 = vmatprep.subr.bf16.mxu0 %v4147_v36  ;;  %v4191_v33 = vld [vmem:[%s4495_s6 + $0x258] sm:$0xff]  }
  0x39   : > { %3716 = vmatprep.subr.bf16.mxu1 %v4148_v39  ;;  %v4194_v36 = vld [vmem:[%s4495_s6 + $0x298] sm:$0xff]   ;;  %v4197_v39 = vld [vmem:[%s4495_s6 + $0x220] sm:$0xff]  }
  0x3a   : > { %2587 = vmatmul.mubr.bf16.vlgmr.msra.gmra.mrb[0].mxu0 %v813_v46  ;;  %v4203_v46 = vld [vmem:[%s4495_s6 + $0x270] sm:$0xff]  }
  0x3b   : > { %3695 = vmatpush3.bf16.msra.mxu0 %v4149_v48  ;;  %2627 = vmatmul.mubr.bf16.vlgmr.msra.gmra.mrb[0].mxu1 %v835_v52  ;;  %v4204_v48 = vld [vmem:[%s4495_s6 + $0x2f0] sm:$0xff]  }
  0x3c   : > { %3696 = vmatprep.subr.bf16.mxu0 %v4151_v53  ;;  %3717 = vmatpush3.bf16.msra.mxu1 %v4150_v50  ;;  %v839_v50 = vcombine.high %v271_v47, %v271_v47  ;;  %v4206_v52 = vld [vmem:[%s4495_s6 + $0x2b0] sm:$0xff]   ;;  %v854_v53 = vcombine.high %v846_v49, %v846_v49 }
  0x3d   : > { %2666 = vmatprep.mubr.bf16.mxu0 %v834_v51  ;;  %3718 = vmatprep.subr.bf16.mxu1 %v4152_v55  ;;  %v4205_v51 = vld [vmem:[%s4495_s6 + $0x230] sm:$0xff]   ;;  %v4207_v55 = vld [vmem:[%s4495_s6 + $0x278] sm:$0xff]  }
  0x3e   : > { %2706 = vmatprep.mubr.bf16.mxu1 %v838_v57  ;;  %v4607_v54 = vrot.slane %v839_v50, %v4533_v42  ;;  %v876_v57 = vrot.slane %v854_v53, %v4533_v42  ;;  %v4254_v47 = vld [vmem:[%s4495_s6 + $0x410] sm:$0xff]   ;;  %v4257_v50 = vld [vmem:[%s4495_s6 + $0x4d8] sm:$0xff]   ;;  %v4260_v53 = vld [vmem:[%s4495_s6 + $0x460] sm:$0xff]  }
  0x3f   : > { %3697 = vmatpush3.bf16.msra.mxu0 %v4153_v56  ;;  %v4208_v56 = vld [vmem:[%s4495_s6 + $0x2f8] sm:$0xff]  }
  0x40   : > { %3698 = vmatprep.subr.bf16.mxu0 %v4155_v59  ;;  %3719 = vmatpush3.bf16.msra.mxu1 %v4154_v58  ;;  %v855_v58 = vcombine.high %v4607_v54, %v4607_v54  ;;  %v4209_v59 = vld [vmem:[%s4495_s6 + $0x238] sm:$0xff]  }
  0x41   : > { %3720 = vmatprep.subr.bf16.mxu1 %v4156_v60  ;;  %v4210_v60 = vld [vmem:[%s4495_s6 + $0x2b8] sm:$0xff]  }
  0x43   : > { %3699 = vmatpush3.bf16.msra.mxu0 %v4157_v61  ;;  %v886_v61 = vcombine.high %v876_v57, %v876_v57 }
  0x44   : > { %3700 = vmatprep.subr.bf16.mxu0 %v4159_v63  ;;  %3721 = vmatpush3.bf16.msra.mxu1 %v4158_v62  ;;  %v862_v62 = vrot.slane %v846_v49, %v4533_v42  ;;  %v4211_v63 = vld [vmem:[%s4495_s6 + $0x340] sm:$0xff]   ;;  %v4256_v49 = vld [vmem:[%s4495_s6 + $0x458] sm:$0xff]  }
  0x45   : > { %3722 = vmatprep.subr.bf16.mxu1 %v4160_v0  ;;  %v4212_v0 = vld [vmem:[%s4495_s6 + $0x3c0] sm:$0xff]  }
  0x47   : > { %3701 = vmatpush3.bf16.msra.mxu0 %v4161_v1  ;;  %v883_v1 = vrot.slane %v855_v58, %v4533_v42  ;;  %v4265_v58 = vld [vmem:[%s4495_s6 + $0x4e8] sm:$0xff]  }
  0x48   : > { %3702 = vmatprep.subr.bf16.mxu0 %v4163_v3  ;;  %3723 = vmatpush3.bf16.msra.mxu1 %v4162_v2  ;;  %v4213_v2 = vld [vmem:[%s4495_s6 + $0x300] sm:$0xff]  }
  0x49   : > { %3724 = vmatprep.subr.bf16.mxu1 %v4164_v4  ;;  %v4214_v3 = vld [vmem:[%s4495_s6 + $0x380] sm:$0xff]   ;;  %v884_v4 = vcombine.high %v862_v62, %v862_v62 }
  0x4b   : > { %3703 = vmatpush3.bf16.msra.mxu0 %v4165_v5  ;;  %v4215_v5 = vld [vmem:[%s4495_s6 + $0x348] sm:$0xff]  }
  0x4c   : > { %3704 = vmatprep.subr.bf16.mxu0 %v4167_v7  ;;  %3725 = vmatpush3.bf16.msra.mxu1 %v4166_v6  ;;  %v4216_v6 = vld [vmem:[%s4495_s6 + $0x3c8] sm:$0xff]   ;;  %v887_v7 = vcombine.high %v883_v1, %v883_v1 }
  0x4d   : > { %3726 = vmatprep.subr.bf16.mxu1 %v4168_v8  ;;  %v4217_v8 = vld [vmem:[%s4495_s6 + $0x308] sm:$0xff]  }
  0x4f   : > { %3705 = vmatpush3.bf16.msra.mxu0 %v4169_v9  ;;  %v4218_v9 = vld [vmem:[%s4495_s6 + $0x388] sm:$0xff]  }
  0x50   : > { %3706 = vmatprep.subr.bf16.mxu0 %v4171_v11  ;;  %3727 = vmatpush3.bf16.msra.mxu1 %v4170_v10  ;;  %v4219_v10 = vld [vmem:[%s4495_s6 + $0x350] sm:$0xff]  }
  0x51   : > { %3728 = vmatprep.subr.bf16.mxu1 %v4172_v12  ;;  %v4220_v11 = vld [vmem:[%s4495_s6 + $0x3d0] sm:$0xff]  }
  0x52   : > { %v4221_v12 = vld [vmem:[%s4495_s6 + $0x310] sm:$0xff]  }
  0x53   : > { %3707 = vmatpush3.bf16.msra.mxu0 %v4173_v13  ;;  %v4222_v13 = vld [vmem:[%s4495_s6 + $0x390] sm:$0xff]  }
  0x54   : > { %3708 = vmatprep.subr.bf16.mxu0 %v4175_v15  ;;  %3729 = vmatpush3.bf16.msra.mxu1 %v4174_v14  ;;  %v4223_v14 = vld [vmem:[%s4495_s6 + $0x358] sm:$0xff]  }
  0x55   : > { %3730 = vmatprep.subr.bf16.mxu1 %v4176_v16  ;;  %v4224_v15 = vld [vmem:[%s4495_s6 + $0x3d8] sm:$0xff]  }
  0x56   : > { %v4225_v16 = vld [vmem:[%s4495_s6 + $0x318] sm:$0xff]  }
  0x57   : > { %3709 = vmatpush3.bf16.msra.mxu0 %v4177_v17  ;;  %v4226_v17 = vld [vmem:[%s4495_s6 + $0x398] sm:$0xff]  }
  0x58   : > { %3738 = vmatprep.subr.bf16.mxu0 %v4179_v20  ;;  %3731 = vmatpush3.bf16.msra.mxu1 %v4178_v18  ;;  %v4227_v18 = vld [vmem:[%s4495_s6 + $0x360] sm:$0xff]  }
  0x59   : > { %3760 = vmatprep.subr.bf16.mxu1 %v4180_v21  ;;  %v4229_v20 = vld [vmem:[%s4495_s6 + $0x320] sm:$0xff]  }
  0x5a   : > { %2667 = vmatmul.mubr.bf16.vlgmr.msra.gmra.mrb[4].mxu0 %v820_v19  ;;  %v4228_v19 = vld [vmem:[%s4495_s6 + $0x3e0] sm:$0xff]  }
  0x5b   : > { %3739 = vmatpush3.bf16.msra.mxu0 %v4181_v22  ;;  %2707 = vmatmul.mubr.bf16.vlgmr.msra.gmra.mrb[4].mxu1 %v836_v24  ;;  %v4230_v21 = vld [vmem:[%s4495_s6 + $0x3a0] sm:$0xff]   ;;  %v4231_v22 = vld [vmem:[%s4495_s6 + $0x368] sm:$0xff]  }
  0x5c   : > { %3740 = vmatprep.subr.bf16.mxu0 %v4183_v25  ;;  %3761 = vmatpush3.bf16.msra.mxu1 %v4182_v23  ;;  %v4232_v23 = vld [vmem:[%s4495_s6 + $0x3e8] sm:$0xff]  }
  0x5d   : > { %3762 = vmatprep.subr.bf16.mxu1 %v4184_v26  ;;  %2746 = vmatprep.mubr.bf16.mxu0 %v876_v57  ;;  %v4233_v24 = vld [vmem:[%s4495_s6 + $0x328] sm:$0xff]   ;;  %v4235_v26 = vld [vmem:[%s4495_s6 + $0x370] sm:$0xff]  }
  0x5e   : > { %2786 = vmatprep.mubr.bf16.mxu1 %v886_v61  ;;  %v4234_v25 = vld [vmem:[%s4495_s6 + $0x3a8] sm:$0xff]   ;;  %v4268_v61 = vld [vmem:[%s4495_s6 + $0x470] sm:$0xff]  }
  0x5f   : > { %3741 = vmatpush3.bf16.msra.mxu0 %v4185_v27  ;;  %v4236_v27 = vld [vmem:[%s4495_s6 + $0x3f0] sm:$0xff]   ;;  %v4264_v57 = vld [vmem:[%s4495_s6 + $0x468] sm:$0xff]  }
  0x60   : > { %3742 = vmatprep.subr.bf16.mxu0 %v4187_v29  ;;  %3763 = vmatpush3.bf16.msra.mxu1 %v4186_v28  ;;  %v4237_v28 = vld [vmem:[%s4495_s6 + $0x330] sm:$0xff]  }
  0x61   : > { %3764 = vmatprep.subr.bf16.mxu1 %v4188_v30  ;;  %v4238_v29 = vld [vmem:[%s4495_s6 + $0x3b0] sm:$0xff]   ;;  %v4239_v30 = vld [vmem:[%s4495_s6 + $0x378] sm:$0xff]  }
  0x63   : > { %3743 = vmatpush3.bf16.msra.mxu0 %v4189_v31  ;;  %v4240_v31 = vld [vmem:[%s4495_s6 + $0x3f8] sm:$0xff]  }
  0x64   : > { %3744 = vmatprep.subr.bf16.mxu0 %v4191_v33  ;;  %3765 = vmatpush3.bf16.msra.mxu1 %v4190_v32  ;;  %v4241_v32 = vld [vmem:[%s4495_s6 + $0x338] sm:$0xff]  }
  0x65   : > { %3766 = vmatprep.subr.bf16.mxu1 %v4192_v34  ;;  %v4242_v33 = vld [vmem:[%s4495_s6 + $0x3b8] sm:$0xff]   ;;  %v869_v34 = vrot.slane %v4607_v54, %v4533_v42  ;;  %v4261_v54 = vld [vmem:[%s4495_s6 + $0x4e0] sm:$0xff]  }
  0x67   : > { %3745 = vmatpush3.bf16.msra.mxu0 %v4193_v35  ;;  %v4244_v35 = vld [vmem:[%s4495_s6 + $0x440] sm:$0xff]  }
  0x68   : > { %3746 = vmatprep.subr.bf16.mxu0 %v4195_v37  ;;  %3767 = vmatpush3.bf16.msra.mxu1 %v4194_v36  ;;  %v4245_v36 = vld [vmem:[%s4495_s6 + $0x4c0] sm:$0xff]  }
  0x69   : > { %3768 = vmatprep.subr.bf16.mxu1 %v4196_v38  ;;  %v4246_v37 = vld [vmem:[%s4495_s6 + $0x400] sm:$0xff]  }
  0x6a   : > { %v4247_v38 = vld [vmem:[%s4495_s6 + $0x480] sm:$0xff]  }
  0x6b   : > { %3747 = vmatpush3.bf16.msra.mxu0 %v4197_v39  ;;  %v885_v39 = vcombine.high %v869_v34, %v869_v34 }
  0x6c   : > { %3748 = vmatprep.subr.bf16.mxu0 %v4199_v41  ;;  %3769 = vmatpush3.bf16.msra.mxu1 %v4198_v40  ;;  %v4248_v40 = vld [vmem:[%s4495_s6 + $0x448] sm:$0xff]  }
  0x6d   : > { %3770 = vmatprep.subr.bf16.mxu1 %v4200_v43  ;;  %v4249_v41 = vld [vmem:[%s4495_s6 + $0x4c8] sm:$0xff]  }
  0x6e   : > { %v4250_v43 = vld [vmem:[%s4495_s6 + $0x408] sm:$0xff]  }
  0x6f   : > { %3749 = vmatpush3.bf16.msra.mxu0 %v4201_v44  ;;  %v4251_v44 = vld [vmem:[%s4495_s6 + $0x488] sm:$0xff]  }
  0x70   : > { %3750 = vmatprep.subr.bf16.mxu0 %v4203_v46  ;;  %3771 = vmatpush3.bf16.msra.mxu1 %v4202_v45  ;;  %v4252_v45 = vld [vmem:[%s4495_s6 + $0x450] sm:$0xff]  }
  0x71   : > { %3772 = vmatprep.subr.bf16.mxu1 %v4204_v48  ;;  %v4253_v46 = vld [vmem:[%s4495_s6 + $0x4d0] sm:$0xff]  }
  0x72   : > { %v4255_v48 = vld [vmem:[%s4495_s6 + $0x490] sm:$0xff]  }
  0x73   : > { %3751 = vmatpush3.bf16.msra.mxu0 %v4205_v51  ;;  %v4258_v51 = vld [vmem:[%s4495_s6 + $0x418] sm:$0xff]  }
  0x74   : > { %3752 = vmatprep.subr.bf16.mxu0 %v4207_v55  ;;  %3773 = vmatpush3.bf16.msra.mxu1 %v4206_v52  ;;  %v4259_v52 = vld [vmem:[%s4495_s6 + $0x498] sm:$0xff]   ;;  %v4262_v55 = vld [vmem:[%s4495_s6 + $0x420] sm:$0xff]  }
  0x75   : > { %3774 = vmatprep.subr.bf16.mxu1 %v4208_v56  ;;  %v4263_v56 = vld [vmem:[%s4495_s6 + $0x4a0] sm:$0xff]  }
  0x77   : > { %3753 = vmatpush3.bf16.msra.mxu0 %v4209_v59  ;;  %v4266_v59 = vld [vmem:[%s4495_s6 + $0x428] sm:$0xff]  }
  0x78   : > { %3782 = vmatprep.subr.bf16.mxu0 %v4211_v63  ;;  %3775 = vmatpush3.bf16.msra.mxu1 %v4210_v60  ;;  %v4267_v60 = vld [vmem:[%s4495_s6 + $0x4a8] sm:$0xff]   ;;  %v4269_v63 = vld [vmem:[%s4495_s6 + $0x4f0] sm:$0xff]  }
  0x79   : > { %3804 = vmatprep.subr.bf16.mxu1 %v4212_v0 }
  0x7a   : > { %2747 = vmatmul.mubr.bf16.vlgmr.msra.gmra.mrb[8].mxu0 %v862_v62  ;;  %v272_v62 = vld [vmem:[%s4490_s27 + $0x10] sm:$0xff] }
  0x7b   : > { %3783 = vmatpush3.bf16.msra.mxu0 %v4213_v2  ;;  %2826 = vmatprep.mubr.bf16.mxu0 %v883_v1  ;;  %v895_v0 = vrot.slane %v272_v62, %v4533_v42  ;;  %v888_v1 = vcombine.high %v272_v62, %v272_v62  ;;  %v4270_v2 = vld [vmem:[%s4495_s6 + $0x430] sm:$0xff]  }
  0x7c   : > { %2787 = vmatmul.mubr.bf16.vlgmr.msra.gmra.mrb[8].mxu1 %v884_v4  ;;  %3784 = vmatprep.subr.bf16.mxu0 %v4215_v5  ;;  %v4319_v62 = vld [vmem:[%s4495_s6 + $0x610] sm:$0xff]  }
  0x7d   : > { %3805 = vmatpush3.bf16.msra.mxu1 %v4214_v3  ;;  %2866 = vmatprep.mubr.bf16.mxu1 %v887_v7  ;;  %v4271_v3 = vld [vmem:[%s4495_s6 + $0x4b0] sm:$0xff]   ;;  %v903_v4 = vcombine.high %v895_v0, %v895_v0  ;;  %v4683_v5 = vrot.slane %v888_v1, %v4533_v42  ;;  %v4273_v7 = vld [vmem:[%s4495_s6 + $0x4f8] sm:$0xff]  }
  0x7e   : > { %3806 = vmatprep.subr.bf16.mxu1 %v4216_v6  ;;  %v4272_v6 = vld [vmem:[%s4495_s6 + $0x478] sm:$0xff]  }
  0x7f   : > { %3785 = vmatpush3.bf16.msra.mxu0 %v4217_v8  ;;  %v925_v8 = vrot.slane %v903_v4, %v4533_v42  ;;  %v4322_v1 = vld [vmem:[%s4495_s6 + $0x6d8] sm:$0xff]   ;;  %v4325_v4 = vld [vmem:[%s4495_s6 + $0x660] sm:$0xff]  }
  0x80   : > { %3786 = vmatprep.subr.bf16.mxu0 %v4219_v10  ;;  %v4274_v10 = vld [vmem:[%s4495_s6 + $0x438] sm:$0xff]  }
  0x81   : > { %3807 = vmatpush3.bf16.msra.mxu1 %v4218_v9  ;;  %v904_v9 = vcombine.high %v4683_v5, %v4683_v5 }
  0x82   : > { %3808 = vmatprep.subr.bf16.mxu1 %v4220_v11  ;;  %v4275_v11 = vld [vmem:[%s4495_s6 + $0x4b8] sm:$0xff]  }
  0x83   : > { %3787 = vmatpush3.bf16.msra.mxu0 %v4221_v12  ;;  %v935_v12 = vcombine.high %v925_v8, %v925_v8 }
  0x84   : > { %3788 = vmatprep.subr.bf16.mxu0 %v4223_v14  ;;  %v4276_v14 = vld [vmem:[%s4495_s6 + $0x540] sm:$0xff]  }
  0x85   : > { %3809 = vmatpush3.bf16.msra.mxu1 %v4222_v13  ;;  %v911_v13 = vrot.slane %v895_v0, %v4533_v42  ;;  %v4321_v0 = vld [vmem:[%s4495_s6 + $0x658] sm:$0xff]  }
  0x86   : > { %3810 = vmatprep.subr.bf16.mxu1 %v4224_v15  ;;  %v4277_v15 = vld [vmem:[%s4495_s6 + $0x5c0] sm:$0xff]  }
  0x87   : > { %3789 = vmatpush3.bf16.msra.mxu0 %v4225_v16  ;;  %v932_v16 = vrot.slane %v904_v9, %v4533_v42  ;;  %v4330_v9 = vld [vmem:[%s4495_s6 + $0x6e8] sm:$0xff]  }
  0x88   : > { %3790 = vmatprep.subr.bf16.mxu0 %v4227_v18  ;;  %v4279_v18 = vld [vmem:[%s4495_s6 + $0x580] sm:$0xff]  }
  0x89   : > { %3811 = vmatpush3.bf16.msra.mxu1 %v4226_v17  ;;  %v4278_v17 = vld [vmem:[%s4495_s6 + $0x500] sm:$0xff]  }
  0x8a   : > { %3812 = vmatprep.subr.bf16.mxu1 %v4228_v19  ;;  %v933_v19 = vcombine.high %v911_v13, %v911_v13 }
  0x8b   : > { %3791 = vmatpush3.bf16.msra.mxu0 %v4229_v20  ;;  %v4280_v20 = vld [vmem:[%s4495_s6 + $0x548] sm:$0xff]  }
  0x8c   : > { %3792 = vmatprep.subr.bf16.mxu0 %v4231_v22  ;;  %v936_v22 = vcombine.high %v932_v16, %v932_v16 }
  0x8d   : > { %3813 = vmatpush3.bf16.msra.mxu1 %v4230_v21  ;;  %v4281_v21 = vld [vmem:[%s4495_s6 + $0x5c8] sm:$0xff]  }
  0x8e   : > { %3814 = vmatprep.subr.bf16.mxu1 %v4232_v23  ;;  %v4282_v23 = vld [vmem:[%s4495_s6 + $0x508] sm:$0xff]  }
  0x8f   : > { %3793 = vmatpush3.bf16.msra.mxu0 %v4233_v24  ;;  %v4283_v24 = vld [vmem:[%s4495_s6 + $0x588] sm:$0xff]  }
  0x90   : > { %3794 = vmatprep.subr.bf16.mxu0 %v4235_v26  ;;  %v4285_v26 = vld [vmem:[%s4495_s6 + $0x5d0] sm:$0xff]  }
  0x91   : > { %3815 = vmatpush3.bf16.msra.mxu1 %v4234_v25  ;;  %v4284_v25 = vld [vmem:[%s4495_s6 + $0x550] sm:$0xff]  }
  0x92   : > { %3816 = vmatprep.subr.bf16.mxu1 %v4236_v27  ;;  %v4286_v27 = vld [vmem:[%s4495_s6 + $0x510] sm:$0xff]  }
  0x93   : > { %3795 = vmatpush3.bf16.msra.mxu0 %v4237_v28  ;;  %v4287_v28 = vld [vmem:[%s4495_s6 + $0x590] sm:$0xff]  }
  0x94   : > { %3796 = vmatprep.subr.bf16.mxu0 %v4239_v30  ;;  %v4289_v30 = vld [vmem:[%s4495_s6 + $0x5d8] sm:$0xff]  }
  0x95   : > { %3817 = vmatpush3.bf16.msra.mxu1 %v4238_v29  ;;  %v4288_v29 = vld [vmem:[%s4495_s6 + $0x558] sm:$0xff]  }
  0x96   : > { %3818 = vmatprep.subr.bf16.mxu1 %v4240_v31  ;;  %v4290_v31 = vld [vmem:[%s4495_s6 + $0x518] sm:$0xff]  }
  0x97   : > { %3797 = vmatpush3.bf16.msra.mxu0 %v4241_v32  ;;  %v4291_v32 = vld [vmem:[%s4495_s6 + $0x598] sm:$0xff]  }
  0x98   : > { %3826 = vmatprep.subr.bf16.mxu0 %v4244_v35  ;;  %v4294_v35 = vld [vmem:[%s4495_s6 + $0x520] sm:$0xff]  }
  0x99   : > { %3819 = vmatpush3.bf16.msra.mxu1 %v4242_v33  ;;  %v4292_v33 = vld [vmem:[%s4495_s6 + $0x560] sm:$0xff]  }
  0x9a   : > { %2827 = vmatmul.mubr.bf16.vlgmr.msra.gmra.mrb[12].mxu0 %v869_v34  ;;  %3848 = vmatprep.subr.bf16.mxu1 %v4245_v36  ;;  %v4293_v34 = vld [vmem:[%s4495_s6 + $0x5e0] sm:$0xff]  }
  0x9b   : > { %3827 = vmatpush3.bf16.msra.mxu0 %v4246_v37  ;;  %2906 = vmatprep.mubr.bf16.mxu0 %v925_v8  ;;  %v4295_v36 = vld [vmem:[%s4495_s6 + $0x5a0] sm:$0xff]   ;;  %v4296_v37 = vld [vmem:[%s4495_s6 + $0x568] sm:$0xff]  }
  0x9c   : > { %2867 = vmatmul.mubr.bf16.vlgmr.msra.gmra.mrb[12].mxu1 %v885_v39  ;;  %3828 = vmatprep.subr.bf16.mxu0 %v4248_v40  ;;  %v4298_v39 = vld [vmem:[%s4495_s6 + $0x528] sm:$0xff]  }
  0x9d   : > { %3849 = vmatpush3.bf16.msra.mxu1 %v4247_v38  ;;  %2946 = vmatprep.mubr.bf16.mxu1 %v935_v12  ;;  %v4297_v38 = vld [vmem:[%s4495_s6 + $0x5e8] sm:$0xff]   ;;  %v4333_v12 = vld [vmem:[%s4495_s6 + $0x670] sm:$0xff]  }
  0x9e   : > { %3850 = vmatprep.subr.bf16.mxu1 %v4249_v41  ;;  %v4299_v40 = vld [vmem:[%s4495_s6 + $0x5a8] sm:$0xff]   ;;  %v4300_v41 = vld [vmem:[%s4495_s6 + $0x570] sm:$0xff]  }
  0x9f   : > { %3829 = vmatpush3.bf16.msra.mxu0 %v4250_v43  ;;  %v4301_v43 = vld [vmem:[%s4495_s6 + $0x5f0] sm:$0xff]   ;;  %v4329_v8 = vld [vmem:[%s4495_s6 + $0x668] sm:$0xff]  }
  0xa0   : > { %3830 = vmatprep.subr.bf16.mxu0 %v4252_v45  ;;  %v4303_v45 = vld [vmem:[%s4495_s6 + $0x5b0] sm:$0xff]  }
  0xa1   : > { %3851 = vmatpush3.bf16.msra.mxu1 %v4251_v44  ;;  %v4302_v44 = vld [vmem:[%s4495_s6 + $0x530] sm:$0xff]  }
  0xa2   : > { %3852 = vmatprep.subr.bf16.mxu1 %v4253_v46  ;;  %v4304_v46 = vld [vmem:[%s4495_s6 + $0x578] sm:$0xff]  }
  0xa3   : > { %3831 = vmatpush3.bf16.msra.mxu0 %v4254_v47  ;;  %v4305_v47 = vld [vmem:[%s4495_s6 + $0x5f8] sm:$0xff]  }
  0xa4   : > { %3832 = vmatprep.subr.bf16.mxu0 %v4256_v49  ;;  %v4307_v49 = vld [vmem:[%s4495_s6 + $0x5b8] sm:$0xff]  }
  0xa5   : > { %3853 = vmatpush3.bf16.msra.mxu1 %v4255_v48  ;;  %v4306_v48 = vld [vmem:[%s4495_s6 + $0x538] sm:$0xff]  }
  0xa6   : > { %3854 = vmatprep.subr.bf16.mxu1 %v4257_v50  ;;  %v918_v50 = vrot.slane %v4683_v5, %v4533_v42  ;;  %v4326_v5 = vld [vmem:[%s4495_s6 + $0x6e0] sm:$0xff]  }
  0xa7   : > { %3833 = vmatpush3.bf16.msra.mxu0 %v4258_v51  ;;  %v4309_v51 = vld [vmem:[%s4495_s6 + $0x640] sm:$0xff]  }
  0xa8   : > { %3834 = vmatprep.subr.bf16.mxu0 %v4260_v53  ;;  %v4311_v53 = vld [vmem:[%s4495_s6 + $0x600] sm:$0xff]  }
  0xa9   : > { %3855 = vmatpush3.bf16.msra.mxu1 %v4259_v52  ;;  %v4310_v52 = vld [vmem:[%s4495_s6 + $0x6c0] sm:$0xff]  }
  0xaa   : > { %3856 = vmatprep.subr.bf16.mxu1 %v4261_v54  ;;  %v4312_v54 = vld [vmem:[%s4495_s6 + $0x680] sm:$0xff]  }
  0xab   : > { %3835 = vmatpush3.bf16.msra.mxu0 %v4262_v55  ;;  %v934_v55 = vcombine.high %v918_v50, %v918_v50 }
  0xac   : > { %3836 = vmatprep.subr.bf16.mxu0 %v4264_v57  ;;  %v4314_v57 = vld [vmem:[%s4495_s6 + $0x6c8] sm:$0xff]  }
  0xad   : > { %3857 = vmatpush3.bf16.msra.mxu1 %v4263_v56  ;;  %v4313_v56 = vld [vmem:[%s4495_s6 + $0x648] sm:$0xff]  }
  0xae   : > { %3858 = vmatprep.subr.bf16.mxu1 %v4265_v58  ;;  %v4315_v58 = vld [vmem:[%s4495_s6 + $0x608] sm:$0xff]  }
  0xaf   : > { %3837 = vmatpush3.bf16.msra.mxu0 %v4266_v59  ;;  %v4316_v59 = vld [vmem:[%s4495_s6 + $0x688] sm:$0xff]  }
  0xb0   : > { %3838 = vmatprep.subr.bf16.mxu0 %v4268_v61  ;;  %v4318_v61 = vld [vmem:[%s4495_s6 + $0x6d0] sm:$0xff]  }
  0xb1   : > { %3859 = vmatpush3.bf16.msra.mxu1 %v4267_v60  ;;  %v4317_v60 = vld [vmem:[%s4495_s6 + $0x650] sm:$0xff]  }
  0xb2   : > { %3860 = vmatprep.subr.bf16.mxu1 %v4269_v63  ;;  %v4320_v63 = vld [vmem:[%s4495_s6 + $0x690] sm:$0xff]  }
  0xb3   : > { %3839 = vmatpush3.bf16.msra.mxu0 %v4270_v2  ;;  %v4323_v2 = vld [vmem:[%s4495_s6 + $0x618] sm:$0xff]  }
  0xb4   : > { %3840 = vmatprep.subr.bf16.mxu0 %v4272_v6  ;;  %v4327_v6 = vld [vmem:[%s4495_s6 + $0x620] sm:$0xff]  }
  0xb5   : > { %3861 = vmatpush3.bf16.msra.mxu1 %v4271_v3  ;;  %v4324_v3 = vld [vmem:[%s4495_s6 + $0x698] sm:$0xff]  }
  0xb6   : > { %3862 = vmatprep.subr.bf16.mxu1 %v4273_v7  ;;  %v4328_v7 = vld [vmem:[%s4495_s6 + $0x6a0] sm:$0xff]  }
  0xb7   : > { %3841 = vmatpush3.bf16.msra.mxu0 %v4274_v10  ;;  %v4331_v10 = vld [vmem:[%s4495_s6 + $0x628] sm:$0xff]  }
  0xb8   : > { %3870 = vmatprep.subr.bf16.mxu0 %v4276_v14  ;;  %v4334_v14 = vld [vmem:[%s4495_s6 + $0x6f0] sm:$0xff]  }
  0xb9   : > { %3863 = vmatpush3.bf16.msra.mxu1 %v4275_v11  ;;  %v4332_v11 = vld [vmem:[%s4495_s6 + $0x6a8] sm:$0xff]  }
  0xba   : > { %2907 = vmatmul.mubr.bf16.vlgmr.msra.gmra.mrb[16].mxu0 %v911_v13  ;;  %3892 = vmatprep.subr.bf16.mxu1 %v4277_v15  ;;  %v273_v13 = vld [vmem:[%s4490_s27 + $0x18] sm:$0xff] }
  0xbb   : > { %3871 = vmatpush3.bf16.msra.mxu0 %v4278_v17  ;;  %2986 = vmatprep.mubr.bf16.mxu0 %v932_v16  ;;  %v944_v15 = vrot.slane %v273_v13, %v4533_v42  ;;  %v937_v16 = vcombine.high %v273_v13, %v273_v13  ;;  %v4335_v17 = vld [vmem:[%s4495_s6 + $0x630] sm:$0xff]  }
  0xbc   : > { %2947 = vmatmul.mubr.bf16.vlgmr.msra.gmra.mrb[16].mxu1 %v933_v19  ;;  %3872 = vmatprep.subr.bf16.mxu0 %v4280_v20 }
  0xbd   : > { %3893 = vmatpush3.bf16.msra.mxu1 %v4279_v18  ;;  %3026 = vmatprep.mubr.bf16.mxu1 %v936_v22  ;;  %v4337_v18 = vld [vmem:[%s4495_s6 + $0x678] sm:$0xff]   ;;  %v952_v19 = vcombine.high %v944_v15, %v944_v15  ;;  %v4759_v20 = vrot.slane %v937_v16, %v4533_v42 }
  0xbe   : > { %3894 = vmatprep.subr.bf16.mxu1 %v4281_v21  ;;  %v4336_v21 = vld [vmem:[%s4495_s6 + $0x6b0] sm:$0xff]   ;;  %v4338_v22 = vld [vmem:[%s4495_s6 + $0x6f8] sm:$0xff]  }
  0xbf   : > { %3873 = vmatpush3.bf16.msra.mxu0 %v4282_v23  ;;  %v974_v23 = vrot.slane %v952_v19, %v4533_v42 }
  0xc0   : > { %3874 = vmatprep.subr.bf16.mxu0 %v4284_v25  ;;  %v4339_v25 = vld [vmem:[%s4495_s6 + $0x638] sm:$0xff]  }
  0xc1   : > { %3895 = vmatpush3.bf16.msra.mxu1 %v4283_v24  ;;  %v953_v24 = vcombine.high %v4759_v20, %v4759_v20 }
  0xc2   : > { %3896 = vmatprep.subr.bf16.mxu1 %v4285_v26  ;;  %v984_v26 = vcombine.high %v974_v23, %v974_v23 }
  0xc3   : > { %3875 = vmatpush3.bf16.msra.mxu0 %v4286_v27  ;;  %v960_v27 = vrot.slane %v944_v15, %v4533_v42 }
  0xc4   : > { %3876 = vmatprep.subr.bf16.mxu0 %v4288_v29  ;;  %v4340_v29 = vld [vmem:[%s4495_s6 + $0x6b8] sm:$0xff]  }
  0xc5   : > { %3897 = vmatpush3.bf16.msra.mxu1 %v4287_v28  ;;  %v4341_v28 = vld [vmem:[%s4495_s6 + $0x740] sm:$0xff]  }
  0xc6   : > { %3898 = vmatprep.subr.bf16.mxu1 %v4289_v30  ;;  %v981_v30 = vrot.slane %v953_v24, %v4533_v42 }
  0xc7   : > { %3877 = vmatpush3.bf16.msra.mxu0 %v4290_v31  ;;  %v4342_v31 = vld [vmem:[%s4495_s6 + $0x7c0] sm:$0xff]  }
  0xc8   : > { %3878 = vmatprep.subr.bf16.mxu0 %v4292_v33  ;;  %v982_v33 = vcombine.high %v960_v27, %v960_v27 }
  0xc9   : > { %3899 = vmatpush3.bf16.msra.mxu1 %v4291_v32  ;;  %v4343_v32 = vld [vmem:[%s4495_s6 + $0x700] sm:$0xff]  }
  0xca   : > { %3900 = vmatprep.subr.bf16.mxu1 %v4293_v34  ;;  %v4345_v34 = vld [vmem:[%s4495_s6 + $0x748] sm:$0xff]  }
  0xcb   : > { %3879 = vmatpush3.bf16.msra.mxu0 %v4294_v35  ;;  %v4344_v35 = vld [vmem:[%s4495_s6 + $0x780] sm:$0xff]  }
  0xcc   : > { %3880 = vmatprep.subr.bf16.mxu0 %v4296_v37  ;;  %v4346_v37 = vld [vmem:[%s4495_s6 + $0x7c8] sm:$0xff]  }
  0xcd   : > { %3901 = vmatpush3.bf16.msra.mxu1 %v4295_v36  ;;  %v985_v36 = vcombine.high %v981_v30, %v981_v30 }
  0xce   : > { %3902 = vmatprep.subr.bf16.mxu1 %v4297_v38  ;;  %v4347_v38 = vld [vmem:[%s4495_s6 + $0x708] sm:$0xff]  }
  0xcf   : > { %3881 = vmatpush3.bf16.msra.mxu0 %v4298_v39  ;;  %v4349_v39 = vld [vmem:[%s4495_s6 + $0x750] sm:$0xff]  }
  0xd0   : > { %3882 = vmatprep.subr.bf16.mxu0 %v4300_v41  ;;  %v4350_v41 = vld [vmem:[%s4495_s6 + $0x7d0] sm:$0xff]  }
  0xd1   : > { %3903 = vmatpush3.bf16.msra.mxu1 %v4299_v40  ;;  %v4348_v40 = vld [vmem:[%s4495_s6 + $0x788] sm:$0xff]  }
  0xd2   : > { %3904 = vmatprep.subr.bf16.mxu1 %v4301_v43  ;;  %v4351_v43 = vld [vmem:[%s4495_s6 + $0x710] sm:$0xff]  }
  0xd3   : > { %3883 = vmatpush3.bf16.msra.mxu0 %v4302_v44  ;;  %v4353_v44 = vld [vmem:[%s4495_s6 + $0x758] sm:$0xff]  }
  0xd4   : > { %3884 = vmatprep.subr.bf16.mxu0 %v4304_v46  ;;  %v4354_v46 = vld [vmem:[%s4495_s6 + $0x7d8] sm:$0xff]  }
  0xd5   : > { %3905 = vmatpush3.bf16.msra.mxu1 %v4303_v45  ;;  %v4352_v45 = vld [vmem:[%s4495_s6 + $0x790] sm:$0xff]  }
  0xd6   : > { %3906 = vmatprep.subr.bf16.mxu1 %v4305_v47  ;;  %v4355_v47 = vld [vmem:[%s4495_s6 + $0x718] sm:$0xff]  }
  0xd7   : > { %3885 = vmatpush3.bf16.msra.mxu0 %v4306_v48  ;;  %v4357_v48 = vld [vmem:[%s4495_s6 + $0x760] sm:$0xff]  }
  0xd8   : > { %3914 = vmatprep.subr.bf16.mxu0 %v4309_v51  ;;  %v4359_v51 = vld [vmem:[%s4495_s6 + $0x720] sm:$0xff]  }
  0xd9   : > { %3907 = vmatpush3.bf16.msra.mxu1 %v4307_v49  ;;  %v4356_v49 = vld [vmem:[%s4495_s6 + $0x798] sm:$0xff]  }
  0xda   : > { %2987 = vmatmul.mubr.bf16.vlgmr.msra.gmra.mrb[20].mxu0 %v918_v50  ;;  %3936 = vmatprep.subr.bf16.mxu1 %v4310_v52  ;;  %v4358_v50 = vld [vmem:[%s4495_s6 + $0x7e0] sm:$0xff]   ;;  %v4361_v52 = vld [vmem:[%s4495_s6 + $0x768] sm:$0xff]  }
  0xdb   : > { %3915 = vmatpush3.bf16.msra.mxu0 %v4311_v53  ;;  %3066 = vmatprep.mubr.bf16.mxu0 %v974_v23  ;;  %v4360_v53 = vld [vmem:[%s4495_s6 + $0x7a0] sm:$0xff]  }
  0xdc   : > { %3027 = vmatmul.mubr.bf16.vlgmr.msra.gmra.mrb[20].mxu1 %v934_v55  ;;  %3916 = vmatprep.subr.bf16.mxu0 %v4313_v56  ;;  %v4363_v55 = vld [vmem:[%s4495_s6 + $0x728] sm:$0xff]   ;;  %v4365_v56 = vld [vmem:[%s4495_s6 + $0x770] sm:$0xff]  }
  0xdd   : > { %3937 = vmatpush3.bf16.msra.mxu1 %v4312_v54  ;;  %3106 = vmatprep.mubr.bf16.mxu1 %v984_v26  ;;  %v4362_v54 = vld [vmem:[%s4495_s6 + $0x7e8] sm:$0xff]  }
  0xde   : > { %3938 = vmatprep.subr.bf16.mxu1 %v4314_v57 }
  0xdf   : > { %3917 = vmatpush3.bf16.msra.mxu0 %v4315_v58  ;;  %v4364_v58 = vld [vmem:[%s4495_s6 + $0x7a8] sm:$0xff]  }
  0xe0   : > { %3918 = vmatprep.subr.bf16.mxu0 %v4317_v60  ;;  %v4366_v60 = vld [vmem:[%s4495_s6 + $0x7f0] sm:$0xff]  }
  0xe1   : > { %3939 = vmatpush3.bf16.msra.mxu1 %v4316_v59 }
  0xe2   : > { %3940 = vmatprep.subr.bf16.mxu1 %v4318_v61 }
  0xe3   : > { %3919 = vmatpush3.bf16.msra.mxu0 %v4319_v62 }
  0xe4   : > { %3920 = vmatprep.subr.bf16.mxu0 %v4321_v0  ;;  %v4367_v0 = vld [vmem:[%s4495_s6 + $0x730] sm:$0xff]  }
  0xe5   : > { %3941 = vmatpush3.bf16.msra.mxu1 %v4320_v63 }
  0xe6   : > { %3942 = vmatprep.subr.bf16.mxu1 %v4322_v1 }
  0xe7   : > { %3921 = vmatpush3.bf16.msra.mxu0 %v4323_v2 }
  0xe8   : > { %3922 = vmatprep.subr.bf16.mxu0 %v4325_v4 }
  0xe9   : > { %3943 = vmatpush3.bf16.msra.mxu1 %v4324_v3  ;;  %v4369_v3 = vld [vmem:[%s4495_s6 + $0x778] sm:$0xff]  }
  0xea   : > { %3944 = vmatprep.subr.bf16.mxu1 %v4326_v5 }
  0xeb   : > { %3923 = vmatpush3.bf16.msra.mxu0 %v4327_v6  ;;  %v4368_v6 = vld [vmem:[%s4495_s6 + $0x7b0] sm:$0xff]  }
  0xec   : > { %3924 = vmatprep.subr.bf16.mxu0 %v4329_v8  ;;  %v4370_v8 = vld [vmem:[%s4495_s6 + $0x7f8] sm:$0xff]  }
  0xed   : > { %3945 = vmatpush3.bf16.msra.mxu1 %v4328_v7 }
  0xee   : > { %3946 = vmatprep.subr.bf16.mxu1 %v4330_v9 }
  0xef   : > { %3925 = vmatpush3.bf16.msra.mxu0 %v4331_v10  ;;  %v4371_v10 = vld [vmem:[%s4495_s6 + $0x738] sm:$0xff]  }
  0xf0   : > { %3926 = vmatprep.subr.bf16.mxu0 %v4333_v12  ;;  %v4372_v12 = vld [vmem:[%s4495_s6 + $0x7b8] sm:$0xff]  }
  0xf1   : > { %3947 = vmatpush3.bf16.msra.mxu1 %v4332_v11  ;;  %v967_v11 = vrot.slane %v4759_v20, %v4533_v42 }
  0xf2   : > { %3948 = vmatprep.subr.bf16.mxu1 %v4334_v14 }
  0xf3   : > { %3927 = vmatpush3.bf16.msra.mxu0 %v4335_v17  ;;  %v983_v13 = vcombine.high %v967_v11, %v967_v11 }
  0xf4   : > { %3928 = vmatprep.subr.bf16.mxu0 %v4337_v18 }
  0xf5   : > { %3949 = vmatpush3.bf16.msra.mxu1 %v4336_v21 }
  0xf6   : > { %3950 = vmatprep.subr.bf16.mxu1 %v4338_v22 }
  0xf7   : > { %3929 = vmatpush3.bf16.msra.mxu0 %v4339_v25 }
  0xf8   : > { %3958 = vmatprep.subr.bf16.mxu0 %v4341_v28 }
  0xf9   : > { %3951 = vmatpush3.bf16.msra.mxu1 %v4340_v29 }
  0xfa   : > { %3067 = vmatmul.mubr.bf16.vlgmr.msra.gmra.mrb[24].mxu0 %v960_v27  ;;  %3980 = vmatprep.subr.bf16.mxu1 %v4342_v31 }
  0xfb   : > { %3959 = vmatpush3.bf16.msra.mxu0 %v4343_v32  ;;  %3146 = vmatprep.mubr.bf16.mxu0 %v981_v30 }
  0xfc   : > { %3107 = vmatmul.mubr.bf16.vlgmr.msra.gmra.mrb[24].mxu1 %v982_v33  ;;  %3960 = vmatprep.subr.bf16.mxu0 %v4345_v34 }
  0xfd   : > { %3981 = vmatpush3.bf16.msra.mxu1 %v4344_v35  ;;  %3186 = vmatprep.mubr.bf16.mxu1 %v985_v36 }
  0xfe   : > { %3982 = vmatprep.subr.bf16.mxu1 %v4346_v37 }
  0xff   : > { %3961 = vmatpush3.bf16.msra.mxu0 %v4347_v38 }
 0x100   : > { %3962 = vmatprep.subr.bf16.mxu0 %v4349_v39 }
 0x101   : > { %3983 = vmatpush3.bf16.msra.mxu1 %v4348_v40 }
 0x102   : > { %3984 = vmatprep.subr.bf16.mxu1 %v4350_v41 }
 0x103   : > { %3963 = vmatpush3.bf16.msra.mxu0 %v4351_v43 }
 0x104   : > { %3964 = vmatprep.subr.bf16.mxu0 %v4353_v44 }
 0x105   : > { %3985 = vmatpush3.bf16.msra.mxu1 %v4352_v45 }
 0x106   : > { %3986 = vmatprep.subr.bf16.mxu1 %v4354_v46 }
 0x107   : > { %3965 = vmatpush3.bf16.msra.mxu0 %v4355_v47 }
 0x108   : > { %3966 = vmatprep.subr.bf16.mxu0 %v4357_v48 }
 0x109   : > { %3987 = vmatpush3.bf16.msra.mxu1 %v4356_v49 }
 0x10a   : > { %3988 = vmatprep.subr.bf16.mxu1 %v4358_v50 }
 0x10b   : > { %3967 = vmatpush3.bf16.msra.mxu0 %v4359_v51 }
 0x10c   : > { %3968 = vmatprep.subr.bf16.mxu0 %v4361_v52 }
 0x10d   : > { %3989 = vmatpush3.bf16.msra.mxu1 %v4360_v53  ;;  %v3666_v57 = vpop.f32.mrb[0].mxu0 }
 0x10e   : > { %v3667_v59 = vpop.f32.mrb[1].mxu0  ;;  %3990 = vmatprep.subr.bf16.mxu1 %v4362_v54  ;;  %v3688_v61 = vpop.f32.mrb[0].mxu1 }
 0x10f   : > { %v3668_v62 = vadd.f32 %v3667_v59, %v3666_v57  ;;  %v3669_v63 = vpop.f32.mrb[2].mxu0  ;;  %3969 = vmatpush3.bf16.msra.mxu0 %v4363_v55  ;;  %v3689_v1 = vpop.f32.mrb[1].mxu1 }
 0x110   : > { %v3670_v2 = vpop.f32.mrb[3].mxu0  ;;  %3970 = vmatprep.subr.bf16.mxu0 %v4365_v56  ;;  %v3690_v4 = vadd.f32 %v3689_v1, %v3688_v61  ;;  %v3691_v5 = vpop.f32.mrb[2].mxu1 }
 0x111   : > { %3991 = vmatpush3.bf16.msra.mxu1 %v4364_v58  ;;  %v3692_v7 = vpop.f32.mrb[3].mxu1 }
 0x112   : > { %3992 = vmatprep.subr.bf16.mxu1 %v4366_v60  ;;  %v2629_v9 = vadd.f32 %v3690_v4, %v3668_v62 }
 0x113   : > { %3971 = vmatpush3.bf16.msra.mxu0 %v4367_v0 }
 0x114   : > { %3972 = vmatprep.subr.bf16.mxu0 %v4369_v3 }
 0x115   : > { %3993 = vmatpush3.bf16.msra.mxu1 %v4368_v6 }
 0x116   : > { %3994 = vmatprep.subr.bf16.mxu1 %v4370_v8 }
 0x117   : > { %3973 = vmatpush3.bf16.msra.mxu0 %v4371_v10 }
 0x119   : > { %3995 = vmatpush3.bf16.msra.mxu1 %v4372_v12 }
 0x11a   : > { %3147 = vmatmul.mubr.bf16.vlgmr.msra.gmra.mrb[28].mxu0 %v967_v11 }
 0x11c   : > { %3187 = vmatmul.mubr.bf16.vlgmr.msra.gmra.mrb[28].mxu1 %v983_v13 }
 0x12d   : > { %v3710_v14 = vpop.f32.mrb[4].mxu0 }
 0x12e   : > { %v3711_v15 = vpop.f32.mrb[5].mxu0  ;;  %v3732_v16 = vpop.f32.mrb[4].mxu1 }
 0x12f   : > { %v3712_v17 = vadd.f32 %v3711_v15, %v3710_v14  ;;  %v3713_v18 = vpop.f32.mrb[6].mxu0  ;;  %v3733_v19 = vpop.f32.mrb[5].mxu1 }
 0x130   : > { %v3714_v21 = vpop.f32.mrb[7].mxu0  ;;  %v3734_v23 = vadd.f32 %v3733_v19, %v3732_v16  ;;  %v3735_v24 = vpop.f32.mrb[6].mxu1 }
 0x131   : > { %v2669_v22 = vadd.f32 %v3712_v17, %v2629_v9  ;;  %v3736_v25 = vpop.f32.mrb[7].mxu1 }
 0x133   : > { %v2709_v42 = vadd.f32 %v3734_v23, %v2669_v22 }
 0x14d   : > { %v3754_v20 = vpop.f32.mrb[8].mxu0 }
 0x14e   : > { %v3755_v26 = vpop.f32.mrb[9].mxu0 }
 0x14f   : > { %v3776_v27 = vpop.f32.mrb[8].mxu1  ;;  %v3756_v28 = vadd.f32 %v3755_v26, %v3754_v20  ;;  %v3757_v29 = vpop.f32.mrb[10].mxu0 }
 0x150   : > { %v3777_v30 = vpop.f32.mrb[9].mxu1  ;;  %v3758_v31 = vpop.f32.mrb[11].mxu0 }
 0x151   : > { %v2749_v32 = vadd.f32 %v3756_v28, %v2709_v42  ;;  %v3778_v33 = vadd.f32 %v3777_v30, %v3776_v27  ;;  %v3779_v34 = vpop.f32.mrb[10].mxu1  ;;  %v269_v31 = vld [vmem:[#allocation2] sm:$0x3] }
 0x152   : > { %v3780_v35 = vpop.f32.mrb[11].mxu1 }
 0x153   : > { %v2789_v36 = vadd.f32 %v3778_v33, %v2749_v32  ;;  %v3210_v35 = vld [vmem:[%s4899_s3] sm:$0xff] (!%p3643_p7) }
 0x16d   : > { %v3798_v37 = vpop.f32.mrb[12].mxu0 }
 0x16e   : > { %v3799_v38 = vpop.f32.mrb[13].mxu0 }
 0x16f   : > { %v3820_v39 = vpop.f32.mrb[12].mxu1  ;;  %v3800_v40 = vadd.f32 %v3799_v38, %v3798_v37  ;;  %v3801_v41 = vpop.f32.mrb[14].mxu0  ;;  %v3212_v37 = vld [vmem:[%s4899_s3 + $0x10] sm:$0xff] (!%p3643_p7)  ;;  %v4430_v38 = vmov (!%p3643_p7), 0.0|0.0  }
 0x170   : > { %v3821_v43 = vpop.f32.mrb[13].mxu1  ;;  %v3802_v44 = vpop.f32.mrb[15].mxu0  ;;  %4054 = vmatprep.subr.bf16.mxu0 (!%p3643_p7), %v4430_v38  ;;  %v4432_v41 = vmov (!%p3643_p7), 0.0  }
 0x171   : > { %v2829_v45 = vadd.f32 %v3800_v40, %v2789_v36  ;;  %v3822_v46 = vadd.f32 %v3821_v43, %v3820_v39  ;;  %v3823_v47 = vpop.f32.mrb[14].mxu1  ;;  %v3211_v36 = vld [vmem:[%s4899_s3 + $0x8] sm:$0xff] (!%p3643_p7)  ;;  %v3213_v40 = vld [vmem:[%s4899_s3 + $0x18] sm:$0xff] (!%p3643_p7)  ;;  %4051 = vmatprep.mubr.msk.f32.mxu0 (!%p3643_p7), %vm4431_vm0, %v4432_v41  ;;  %v3214_v44 = vld [vmem:[%s4899_s3 + $0x20] sm:$0xff] (!%p3643_p7) }
 0x172   : > { %v3824_v48 = vpop.f32.mrb[15].mxu1  ;;  %v4055_v39 = vpack.c.bf16 (!%p3643_p7), %v3211_v36, %v3210_v35  ;;  %v4058_v43 = vpack.c.bf16 (!%p3643_p7), %v3213_v40, %v3212_v37  ;;  %v3216_v47 = vld [vmem:[%s4899_s3 + $0x30] sm:$0xff] (!%p3643_p7) }
 0x173   : > { %v2869_v49 = vadd.f32 %v3822_v46, %v2829_v45  ;;  %v3215_v45 = vld [vmem:[%s4899_s3 + $0x28] sm:$0xff] (!%p3643_p7)  ;;  %v3217_v48 = vld [vmem:[%s4899_s3 + $0x38] sm:$0xff] (!%p3643_p7) }
 0x174   : > { %4056 = vmatpush3.bf16.msra.mxu0 (!%p3643_p7), %v4055_v39  ;;  %v4061_v46 = vpack.c.bf16 (!%p3643_p7), %v3215_v45, %v3214_v44 }
 0x175   : > { %4057 = vmatprep.subr.bf16.mxu0 (!%p3643_p7), %v4430_v38 }
 0x178   : > { %4059 = vmatpush3.bf16.msra.mxu0 (!%p3643_p7), %v4058_v43 }
 0x179   : > { %4060 = vmatprep.subr.bf16.mxu0 (!%p3643_p7), %v4430_v38 }
 0x17c   : > { %4062 = vmatpush3.bf16.msra.mxu0 (!%p3643_p7), %v4061_v46 }
 0x17d   : > { %4063 = vmatprep.subr.bf16.mxu0 (!%p3643_p7), %v4430_v38 }
 0x18d   : > { %v3842_v50 = vpop.f32.mrb[16].mxu0 }
 0x18e   : > { %v3843_v51 = vpop.f32.mrb[17].mxu0 }
 0x18f   : > { %v3864_v52 = vpop.f32.mrb[16].mxu1  ;;  %v3844_v53 = vadd.f32 %v3843_v51, %v3842_v50  ;;  %v3845_v54 = vpop.f32.mrb[18].mxu0  ;;  %v3218_v50 = vld [vmem:[%s4899_s3 + $0x40] sm:$0xff] (!%p3643_p7)  ;;  %v3219_v51 = vld [vmem:[%s4899_s3 + $0x48] sm:$0xff] (!%p3643_p7) }
 0x190   : > { %v3865_v55 = vpop.f32.mrb[17].mxu1  ;;  %v3846_v56 = vpop.f32.mrb[19].mxu0  ;;  %v3221_v54 = vld [vmem:[%s4899_s3 + $0x58] sm:$0xff] (!%p3643_p7) }
 0x191   : > { %v2909_v57 = vadd.f32 %v3844_v53, %v2869_v49  ;;  %v3866_v58 = vadd.f32 %v3865_v55, %v3864_v52  ;;  %v3867_v59 = vpop.f32.mrb[18].mxu1  ;;  %v4064_v49 = vpack.c.bf16 (!%p3643_p7), %v3217_v48, %v3216_v47  ;;  %v4067_v52 = vpack.c.bf16 (!%p3643_p7), %v3219_v51, %v3218_v50  ;;  %v3220_v53 = vld [vmem:[%s4899_s3 + $0x50] sm:$0xff] (!%p3643_p7)  ;;  %v3222_v56 = vld [vmem:[%s4899_s3 + $0x60] sm:$0xff] (!%p3643_p7) }
 0x192   : > { %v3868_v60 = vpop.f32.mrb[19].mxu1  ;;  %v4070_v55 = vpack.c.bf16 (!%p3643_p7), %v3221_v54, %v3220_v53 }
 0x193   : > { %v2949_v61 = vadd.f32 %v3866_v58, %v2909_v57  ;;  %4065 = vmatpush3.bf16.msra.mxu0 (!%p3643_p7), %v4064_v49  ;;  %v3223_v57 = vld [vmem:[%s4899_s3 + $0x68] sm:$0xff] (!%p3643_p7)  ;;  %v3644_v60 = vld [vmem:[%s4898_s2] ss:$0 sm:$0xff] (!%p3643_p7) }
 0x194   : > { %4066 = vmatprep.subr.bf16.mxu0 (!%p3643_p7), %v4430_v38  ;;  %v4073_v58 = vpack.c.bf16 (!%p3643_p7), %v3223_v57, %v3222_v56 }
 0x197   : > { %4068 = vmatpush3.bf16.msra.mxu0 (!%p3643_p7), %v4067_v52 }
 0x198   : > { %4069 = vmatprep.subr.bf16.mxu0 (!%p3643_p7), %v4430_v38 }
 0x19b   : > { %4071 = vmatpush3.bf16.msra.mxu0 (!%p3643_p7), %v4070_v55 }
 0x19c   : > { %4072 = vmatprep.subr.bf16.mxu0 (!%p3643_p7), %v4430_v38 }
 0x19f   : > { %4074 = vmatpush3.bf16.msra.mxu0 (!%p3643_p7), %v4073_v58 }
 0x1a0   : > { %4075 = vmatprep.subr.bf16.mxu0 (!%p3643_p7), %v4430_v38 }
 0x1ad   : > { %v3886_v62 = vpop.f32.mrb[20].mxu0 }
 0x1ae   : > { %v3887_v63 = vpop.f32.mrb[21].mxu0 }
 0x1af   : > { %v3908_v0 = vpop.f32.mrb[20].mxu1  ;;  %v3888_v1 = vadd.f32 %v3887_v63, %v3886_v62  ;;  %v3889_v2 = vpop.f32.mrb[22].mxu0  ;;  %v3225_v62 = vld [vmem:[%s4899_s3 + $0x78] sm:$0xff] (!%p3643_p7) }
 0x1b0   : > { %v3909_v3 = vpop.f32.mrb[21].mxu1  ;;  %v3890_v4 = vpop.f32.mrb[23].mxu0  ;;  %v3645_v2 = vld [vmem:[%s4900_s4] ss:$0 sm:$0xff] (!%p3643_p7) }
 0x1b1   : > { %v2989_v5 = vadd.f32 %v3888_v1, %v2949_v61  ;;  %v3910_v6 = vadd.f32 %v3909_v3, %v3908_v0  ;;  %v3911_v7 = vpop.f32.mrb[22].mxu1  ;;  %v3224_v61 = vld [vmem:[%s4899_s3 + $0x70] sm:$0xff] (!%p3643_p7) }
 0x1b2   : > { %v3912_v8 = vpop.f32.mrb[23].mxu1  ;;  %v4076_v0 = vpack.c.bf16 (!%p3643_p7), %v3225_v62, %v3224_v61 }
 0x1b3   : > { %v3029_v9 = vadd.f32 %v3910_v6, %v2989_v5 }
 0x1b4   : > { %4077 = vmatpush3.bf16.msra.mxu0 (!%p3643_p7), %v4076_v0 }
 0x1cd   : > { %v3930_v10 = vpop.f32.mrb[24].mxu0 }
 0x1ce   : > { %v3931_v11 = vpop.f32.mrb[25].mxu0 }
 0x1cf   : > { %v3952_v12 = vpop.f32.mrb[24].mxu1  ;;  %v3932_v13 = vadd.f32 %v3931_v11, %v3930_v10  ;;  %v3933_v14 = vpop.f32.mrb[26].mxu0 }
 0x1d0   : > { %v3953_v15 = vpop.f32.mrb[25].mxu1  ;;  %v3934_v16 = vpop.f32.mrb[27].mxu0 }
 0x1d1   : > { %v3069_v17 = vadd.f32 %v3932_v13, %v3029_v9  ;;  %v3954_v18 = vadd.f32 %v3953_v15, %v3952_v12  ;;  %v3955_v19 = vpop.f32.mrb[26].mxu1 }
 0x1d2   : > { %v3956_v21 = vpop.f32.mrb[27].mxu1 }
 0x1d3   : > { %v3109_v22 = vadd.f32 %v3954_v18, %v3069_v17 }
 0x1ed   : > { %v3974_v23 = vpop.f32.mrb[28].mxu0 }
 0x1ee   : > { %v3975_v24 = vpop.f32.mrb[29].mxu0 }
 0x1ef   : > { %v3996_v25 = vpop.f32.mrb[28].mxu1  ;;  %v3976_v42 = vadd.f32 %v3975_v24, %v3974_v23  ;;  %v3977_v20 = vpop.f32.mrb[30].mxu0 }
 0x1f0   : > { %v3997_v26 = vpop.f32.mrb[29].mxu1  ;;  %v3978_v27 = vpop.f32.mrb[31].mxu0 }
 0x1f1   : > { %v3149_v28 = vadd.f32 %v3976_v42, %v3109_v22  ;;  %v3998_v29 = vadd.f32 %v3997_v26, %v3996_v25  ;;  %v3999_v30 = vpop.f32.mrb[30].mxu1  ;;  %3199 = sbr.rel (%p3643_p7) target bundleno = 730 (0x2da), region = 48 }
 0x1f2   : > { %v4000_v32 = vpop.f32.mrb[31].mxu1 }
 0x1f3   : > { %v3189_v33 = vadd.f32 %v3998_v29, %v3149_v28 }
 0x1f5   : > { %v3194_v34 = vadd.f32 %v3189_v33, %v269_v31 }
 0x1f7   : > { %3195 = vst [vmem:[#allocation2] sm:$0x3] %v3194_v34 }
 0x1fe   : > { %v3200_v59 = vld [vmem:[#allocation2] sm:$0x3] }
 0x1ff   : > { %v3208_v63 = vadd.f32 %v3644_v60, %v3200_v59 }
 0x201   : > { %v3209_v1 = vmax.f32 %v3208_v63, 0.0 }
 0x203   : > { %4052 = vmatmul.mubr.f32.vlgmr.msra.gmra.mrb[0].mxu0 %v3209_v1 }
 0x2d6   : > { %v3299_v3 = vpop.f32.mrb[0].mxu0 }
 0x2d7   : > { %v3300_v4 = vadd.f32 %v3645_v2, %v3299_v3  ;;  %v4053_v5 = vpop.f32.mrb[1].mxu0 }
 0x2d9   : > { %3304 = vst.msk [vmem:[#allocation3] sm:$0x3] %vm3303_vm1, %v3300_v4 }
 0x2da PF: > { %p4861_p8 = scmp.eq.s32.totalorder %s3379_s21, 3  ;;  %s4433_s27 = smov [#allocation3]  }
 0x2db   : > { %s3314_s28 = sshll.u32 %s4433_s27, 4  ;;  %s3315_s28 = int_to_ptr.vmem [resolvable:$true] %s3314_s28 }
 0x2dc   : > { %s4374_s29 = scalar_lea.vmem %s3315_s28, 32  ;;  %p4381_p12 = scmp.lt.s32.totalorder %s3315_s28, %s3315_s28 }
 0x2dd   : > { %p4375_p9 = scmp.ne.s32.totalorder %s3315_s28, %s4374_s29  ;;  %p4382_p13 = scmp.lt.s32.totalorder %s4374_s29, %s4374_s29 }
 0x2df   : > { %p4376_p10 = pnand %p4375_p9, %p4861_p8  ;;  %p4383_p0 = por %p4382_p13, %p4381_p12 }
 0x2e1   : > { %p4377_p11 = pneg %p4376_p10 }
 0x2e3   : > { %p4384_p1 = pnand %p4383_p0, %p4377_p11 }
 0x2e5   : > { %4387 = shalt.err (!%p4384_p1)
}
 0x2e6   : > { %s4388_s21 = scalar_lea.hbm %s4901_s5, 32 }
 0x2e7   : > { %p4389_p2 = scmp.ne.s32.totalorder %s4901_s5, %s4388_s21  ;;  %p4394_p5 = scmp.lt.u32.totalorder %s4388_s21, %s4901_s5 }
 0x2e9   : > { %p4390_p3 = pnand %p4389_p2, %p4861_p8 }
 0x2eb   : > { %p4391_p4 = pneg %p4390_p3 }
 0x2ed   : > { %p4396_p6 = pnand %p4394_p5, %p4391_p4 }
 0x2ef   : > { %4399 = shalt.err (!%p4396_p6)
}
 0x2f0   : > { %4079 = dma.vmem_to_hbm [thread:$0]  (%p4861_p8), %s3315_s28, 32, %s4901_s5, [#allocation4]  }
 0x2f1   : > { %4413 = dma.done.wait (%p4861_p8), [#allocation4], 32  }
 0x2f2   : > { %4415 = vsyncadd (%p4861_p8), [#allocation4], 4294967264 }
 0x2f3 PF: > { %s16_s20 = sadd.s32 1, %s4426_s20   ;;  %s4903_s18 = smov %s4422_s19 }
 0x2f4   : > { %p13_p7 = scmp.ge.s32.totalorder %s16_s20, 6   ;;  %s4904_s19 = smov %s4906_s22 }
 0x2f6   :  { %15 = sbr.rel (!%p13_p7) target bundleno = 2 (0x2), region = 79 }
 0x2fd   :  { %3327 = vsyncpa [#allocation4], 1 }
 0x2fe   :  { %3329 = vsyncpa [#allocation4 + $0x1], 1 }

</bundles_post_ra>
